<compile_context>
chip_gen: v6e
topology: v6e:2x2x1
jax: 0.10.0
libtpu: 0.0.40
codegen_flags: <defaults>
</compile_context>

<pallas_src>
import jax
import jax.numpy as jnp
from jax.experimental import pallas as pl
from jax.experimental.pallas import tpu as pltpu


def _round_up(n, m):
    return ((n + m - 1) // m) * m


def _timeatt_kernel(x_ref, w_ref, b_ref, o_ref):
    """One grid step handles rows [i*tt, (i+1)*tt) of the (T, B*C) view of x.

    x_ref: (tt, B*C)   contiguous row slab (all batches for tt time steps), VMEM
    w_ref: (B*C, B)    block-diagonal collapsed weights  -- or --
           (C, 1)      collapsed weight column (large-B fallback), VMEM
    b_ref: (1, 1)      collapsed bias (SMEM, f32)
    o_ref: (B, tt, C)  output tile, batch-major: the (T,B)->(B,T) permute is
                       done by addressing, never by an XLA transpose.

    att[t,b] = sigmoid(<x[t,b,:], w_eff> + b_eff);  out[b,t,:] = att[t,b] * x[t,b,:]
    """
    nb, tt, C = o_ref.shape
    b_eff = b_ref[0, 0]
    # Full-precision MXU passes for f32 inputs; native bf16 MXU otherwise.
    prec = (jax.lax.Precision.HIGHEST if x_ref.dtype == jnp.float32
            else jax.lax.Precision.DEFAULT)

    if w_ref.shape[0] != C:
        # Block-diagonal weights: every batch's score from ONE MXU matmul, and
        # the sigmoid runs lane-batched on (tt, B) instead of (tt, 1) per batch.
        s = jnp.dot(x_ref[...], w_ref[...],
                    preferred_element_type=jnp.float32, precision=prec)   # (tt, B)
        att = jax.nn.sigmoid(s + b_eff).astype(o_ref.dtype)               # EUP
        for b in range(nb):                            # static unroll; B is small
            xb = x_ref[:, b * C:(b + 1) * C]           # (tt, C) slab of batch b
            o_ref[b, :, :] = att[:, b:b + 1] * xb      # native-dtype multiply
    else:
        # (C, 1) weight column: per-batch MXU dot (tiny resident weight).
        for b in range(nb):
            xb = x_ref[:, b * C:(b + 1) * C]
            s = jnp.dot(xb, w_ref[...],
                        preferred_element_type=jnp.float32, precision=prec)  # (tt, 1)
            att = jax.nn.sigmoid(s + b_eff).astype(o_ref.dtype)
            o_ref[b, :, :] = att * xb


def _collapse_params(params):
    """Fold Linear(C,C/4) -> Linear(C/4,C/8) -> Linear(C/8,1) into (w_eff, b_eff).

    h3 = x @ (W3@W2@W1).T + (b1 @ (W3@W2).T + b2 @ W3.T + b3)   (exact algebra)
    """
    w1, b1, w2, b2, w3, b3 = [p.astype(jnp.float32) for p in params]
    w_eff = w3 @ w2 @ w1                                    # (1, C)
    b_eff = b1 @ (w3 @ w2).T + b2 @ w3.T + b3               # (1,)
    return w_eff, b_eff.reshape(1, 1)


def timeattention_forward(x, params, *, block_rows=None,
                          target_block_bytes=4 * 1024 * 1024,
                          use_blockdiag_weights=None):
    """x: (T, B, C) -> (B, T, C), matching the PyTorch module's forward."""
    T, B, C = x.shape
    dtype = x.dtype
    itemsize = jnp.dtype(dtype).itemsize
    sub = max(8, 32 // itemsize)            # sublane packing: 8 f32, 16 bf16, 32 i8

    w_eff, b_eff = _collapse_params(params)              # (1, C) f32, (1, 1) f32
    w_dtype = jnp.bfloat16 if dtype == jnp.bfloat16 else jnp.float32
    w_itemsize = jnp.dtype(w_dtype).itemsize

    # Weight operand: block-diagonal (B*C, B) by default (one matmul for all
    # batches + lane-dense sigmoid); per-batch (C, 1) column for large B so the
    # MXU work stays well under the HBM roofline and the resident weight is tiny.
    if use_blockdiag_weights is None:
        use_blockdiag_weights = (1 < B <= 16
                                 and B * B * C * w_itemsize <= 2 * 1024 * 1024)
    if use_blockdiag_weights and B > 1:
        eye = jnp.eye(B, dtype=jnp.float32)
        w_op = (w_eff.reshape(1, C, 1) * eye.reshape(B, 1, B)).reshape(B * C, B)
    else:
        w_op = w_eff.reshape(C, 1)
    w_op = w_op.astype(w_dtype)

    # Generation-aware VMEM budget: v5e/v6e have 128 MiB physical VMEM, v7x has
    # only 64 MiB per TensorCore — don't carry a v6e-sized scoped limit to v7x.
    try:
        vmem_cap = int(getattr(pltpu.get_tpu_info(), "vmem_capacity_bytes",
                               64 * 1024 * 1024))
    except Exception:   # no TPU info available: assume the smallest (v7x-like)
        vmem_cap = 64 * 1024 * 1024
    vmem_limit = (64 * 1024 * 1024 if vmem_cap >= 96 * 1024 * 1024
                  else 40 * 1024 * 1024)

    # Working set ~= 2x(in block) + 2x(out block) (double-buffered) + weights.
    w_bytes = int(w_op.size) * w_itemsize
    budget = min(target_block_bytes,
                 max(256 * 1024,
                     (vmem_limit - 2 * w_bytes - 2 * 1024 * 1024) // 4))
    row_bytes = B * C * itemsize
    # TODO(synk): pathological shapes (B*C*itemsize > a few MiB per row) would
    # need a channel-split grid axis; not needed for this head's sizes.

    # Row-tile size: as large as the budget allows, sublane aligned; split into
    # >= 2 grid steps when T permits so v7x's 2 TensorCores share the work.
    if block_rows is not None:
        tt = int(block_rows)
    else:
        tt = budget // max(1, row_bytes)
    tt = max(sub, (tt // sub) * sub)
    if tt >= T:
        half = _round_up(-(-T // 2), sub)
        tt = half if half < T else T
    n_t = pl.cdiv(T, tt)

    x2 = x.reshape(T, B * C)                 # row-major collapse: metadata only

    return pl.pallas_call(
        _timeatt_kernel,
        out_shape=jax.ShapeDtypeStruct((B, T, C), dtype),
        grid_spec=pltpu.PrefetchScalarGridSpec(
            num_scalar_prefetch=0,
            grid=(n_t,),
            in_specs=[
                # Contiguous (tt, B*C) row slab per step; Pallas masks the
                # ragged tail along T (no wrapper-side pad / slice).
                pl.BlockSpec((tt, B * C), lambda i: (i, 0)),
                # Resident weight operand (constant index map -> fetched once).
                pl.BlockSpec(w_op.shape, lambda i: (0, 0)),
                # Collapsed bias scalar.
                pl.BlockSpec(memory_space=pltpu.MemorySpace.SMEM),
            ],
            # (T,B)->(B,T) permute fused into the output block addressing.
            out_specs=pl.BlockSpec((B, tt, C), lambda i: (0, i, 0)),
        ),
        compiler_params=pltpu.CompilerParams(
            dimension_semantics=("parallel",),
            vmem_limit_bytes=vmem_limit),
    )(x2, w_op, b_eff)


def init_params(key, inchannel):
    c1 = inchannel // 4
    c2 = inchannel // 8
    ks = jax.random.split(key, 6)

    def u(k, shape, fan_in):
        bound = 1.0 / jnp.sqrt(fan_in)
        return jax.random.uniform(k, shape, jnp.float32, -bound, bound)

    w1 = u(ks[0], (c1, inchannel), inchannel)
    b1 = u(ks[1], (c1,), inchannel)
    w2 = u(ks[2], (c2, c1), c1)
    b2 = u(ks[3], (c2,), c1)
    w3 = u(ks[4], (1, c2), c2)
    b3 = u(ks[5], (1,), c2)
    return w1, b1, w2, b2, w3, b3


def reference_forward(x, params):
    """Plain-JAX reference of the PyTorch module (uncollapsed 3-linear chain)."""
    w1, b1, w2, b2, w3, b3 = params
    h = x @ w1.T + b1
    h = h @ w2.T + b2
    h = h @ w3.T + b3
    att = jax.nn.sigmoid(h)
    out = att * x
    return jnp.transpose(out, (1, 0, 2))


if __name__ == "__main__":
    key = jax.random.PRNGKey(0)
    k_x, k_p, k_x2, k_p2, k_x3, k_p3 = jax.random.split(key, 6)

    # Case 1: lane-dense channels, ragged T -> 2-step grid, tail masking,
    # block-diagonal MXU reduce, fused permute.
    T, B, C = 300, 2, 128
    x = jax.random.normal(k_x, (T, B, C), jnp.float32)
    params = init_params(k_p, C)
    out = jax.block_until_ready(timeattention_forward(x, params))
    ref = reference_forward(x, params)
    assert out.shape == (B, T, C)
    assert jnp.allclose(out, ref, atol=1e-4, rtol=1e-4), \
        float(jnp.max(jnp.abs(out - ref)))

    # Case 2: narrow channels, odd batch, ragged T -> non-lane-aligned per-batch
    # slabs, still no XLA transpose and no padding round-trip.
    T2, B2, C2 = 37, 3, 32
    x2 = jax.random.normal(k_x2, (T2, B2, C2), jnp.float32)
    params2 = init_params(k_p2, C2)
    out2 = jax.block_until_ready(timeattention_forward(x2, params2))
    ref2 = reference_forward(x2, params2)
    assert out2.shape == (B2, T2, C2)
    assert jnp.allclose(out2, ref2, atol=1e-4, rtol=1e-4), \
        float(jnp.max(jnp.abs(out2 - ref2)))

    # Case 3: bf16 inputs, forced (C, 1) weight-column path (native bf16 MXU dot
    # and bf16 VPU multiply; no full-tile f32 materialization).
    T3, B3, C3 = 64, 2, 256
    x3 = jax.random.normal(k_x3, (T3, B3, C3), jnp.float32).astype(jnp.bfloat16)
    params3 = init_params(k_p3, C3)
    out3 = jax.block_until_ready(
        timeattention_forward(x3, params3, use_blockdiag_weights=False))
    ref3 = reference_forward(x3.astype(jnp.float32), params3)
    assert out3.shape == (B3, T3, C3)
    err3 = float(jnp.max(jnp.abs(out3.astype(jnp.float32) - ref3)))
    assert err3 < 1.2e-1, err3

    print("KERNEL_OK")
</pallas_src>

<mosaic_0001>
module attributes {stable_mosaic.version = 11 : i64} {
  func.func @_timeatt_kernel(%arg0: i32, %arg1: memref<152x256xf32, #tpu.memory_space<vmem>>, %arg2: memref<256x2xf32, #tpu.memory_space<vmem>>, %arg3: memref<1x1xf32, #tpu.memory_space<smem>>, %arg4: memref<2x152x128xf32, #tpu.memory_space<vmem>>) attributes {dimension_semantics = [#tpu.dimension_semantics<parallel>], iteration_bounds = array<i64: 2>, scalar_prefetch = 0 : i64, scratch_operands = 0 : i64, tpu.core_type = #tpu.core_type<tc>, window_params = [{transform_indices = @transform_0, window_bounds = array<i64: 152, 256>}, {pipeline_mode = #tpu.pipeline_mode<synchronous>, transform_indices = @transform_1, window_bounds = array<i64: 256, 2>}, {transform_indices = @transform_2, window_bounds = array<i64: 1, 1>}, {transform_indices = @transform_3, window_bounds = array<i64: 2, 152, 128>}]} {
    %c0 = arith.constant 0 : index
    %c0_0 = arith.constant 0 : index
    %0 = memref.load %arg3[%c0, %c0_0] : memref<1x1xf32, #tpu.memory_space<smem>>
    %c0_1 = arith.constant 0 : index
    %c0_2 = arith.constant 0 : index
    %1 = vector.load %arg1[%c0_1, %c0_2] : memref<152x256xf32, #tpu.memory_space<vmem>>, vector<152x256xf32>
    %c0_3 = arith.constant 0 : index
    %c0_4 = arith.constant 0 : index
    %2 = vector.load %arg2[%c0_3, %c0_4] : memref<256x2xf32, #tpu.memory_space<vmem>>, vector<256x2xf32>
    %cst = arith.constant dense<0.000000e+00> : vector<152x2xf32>
    %3 = tpu.matmul %1, %2, %cst {dimension_numbers = #tpu.dot_dimension_numbers<[1], [0], [0], [1], [0, 0, 1, 1], [], []>, precision = #tpu.contract_precision<fp32>} : vector<152x256xf32>, vector<256x2xf32>, vector<152x2xf32> -> vector<152x2xf32>
    %4 = vector.broadcast %0 : f32 to vector<152x2xf32>
    %5 = arith.addf %3, %4 : vector<152x2xf32>
    %6 = arith.negf %5 : vector<152x2xf32>
    %7 = math.exp %6 : vector<152x2xf32>
    %cst_5 = arith.constant 1.000000e+00 : f32
    %8 = vector.broadcast %cst_5 : f32 to vector<152x2xf32>
    %9 = arith.addf %8, %7 : vector<152x2xf32>
    %10 = arith.divf %8, %9 : vector<152x2xf32>
    %c0_6 = arith.constant 0 : index
    %c0_7 = arith.constant 0 : index
    %11 = vector.load %arg1[%c0_6, %c0_7] : memref<152x256xf32, #tpu.memory_space<vmem>>, vector<152x128xf32>
    %12 = vector.extract_strided_slice %10 {offsets = [0, 0], sizes = [152, 1], strides = [1, 1]} : vector<152x2xf32> to vector<152x1xf32>
    %13 = vector.broadcast %12 : vector<152x1xf32> to vector<152x128xf32>
    %14 = arith.mulf %13, %11 : vector<152x128xf32>
    %c0_8 = arith.constant 0 : index
    %c0_9 = arith.constant 0 : index
    %c0_10 = arith.constant 0 : index
    %15 = vector.load %arg4[%c0_8, %c0_9, %c0_10] : memref<2x152x128xf32, #tpu.memory_space<vmem>>, vector<1x152x128xf32>
    %16 = vector.shape_cast %15 : vector<1x152x128xf32> to vector<152x128xf32>
    %17 = vector.shape_cast %14 : vector<152x128xf32> to vector<1x152x128xf32>
    tpu.vector_store %arg4[%c0_8, %c0_9, %c0_10], %17 {strides = array<i32>} : memref<2x152x128xf32, #tpu.memory_space<vmem>>, vector<1x152x128xf32>,
    %c0_11 = arith.constant 0 : index
    %c128 = arith.constant 128 : index
    %18 = vector.load %arg1[%c0_11, %c128] : memref<152x256xf32, #tpu.memory_space<vmem>>, vector<152x128xf32>
    %19 = vector.extract_strided_slice %10 {offsets = [0, 1], sizes = [152, 1], strides = [1, 1]} : vector<152x2xf32> to vector<152x1xf32>
    %20 = vector.broadcast %19 : vector<152x1xf32> to vector<152x128xf32>
    %21 = arith.mulf %20, %18 : vector<152x128xf32>
    %c1 = arith.constant 1 : index
    %c0_12 = arith.constant 0 : index
    %c0_13 = arith.constant 0 : index
    %22 = vector.load %arg4[%c1, %c0_12, %c0_13] : memref<2x152x128xf32, #tpu.memory_space<vmem>>, vector<1x152x128xf32>
    %23 = vector.shape_cast %22 : vector<1x152x128xf32> to vector<152x128xf32>
    %24 = vector.shape_cast %21 : vector<152x128xf32> to vector<1x152x128xf32>
    tpu.vector_store %arg4[%c1, %c0_12, %c0_13], %24 {strides = array<i32>} : memref<2x152x128xf32, #tpu.memory_space<vmem>>, vector<1x152x128xf32>,
    return
  }
  func.func @transform_0(%arg0: i32) -> (i32, i32) {
    %c0_i32 = arith.constant 0 : i32
    %c0_i32_0 = arith.constant 0 : i32
    return %arg0, %c0_i32 : i32, i32
  }
  func.func @transform_1(%arg0: i32) -> (i32, i32) {
    %c0_i32 = arith.constant 0 : i32
    %c0_i32_0 = arith.constant 0 : i32
    %c0_i32_1 = arith.constant 0 : i32
    return %c0_i32, %c0_i32_0 : i32, i32
  }
  func.func @transform_2(%arg0: i32) -> (i32, i32) {
    %c0_i32 = arith.constant 0 : i32
    %c0_i32_0 = arith.constant 0 : i32
    %c0_i32_1 = arith.constant 0 : i32
    return %c0_i32, %c0_i32_0 : i32, i32
  }
  func.func @transform_3(%arg0: i32) -> (i32, i32, i32) {
    %c0_i32 = arith.constant 0 : i32
    %c0_i32_0 = arith.constant 0 : i32
    %c0_i32_1 = arith.constant 0 : i32
    return %c0_i32, %arg0, %c0_i32_0 : i32, i32, i32
  }
}

</mosaic_0001>

<bundles_post_ra>
// kernel: tpu_custom_call.1
= control target key start
LH: loop header
LB: loop body
LE: loop exit
PB: predicated region body
PF: predicated region fallthrough
CT: control target
= control target key end

     0   :  { %s4904_s0 = inlined_call_operand.hbm [shape: f32[300,256], index: 0, kind: input, shape index: {}]   ;;  %s4905_s1 = inlined_call_operand.vmem [shape: f32[256,2], index: 1, kind: input, shape index: {}]   ;;  %s4906_s2 = inlined_call_operand.<no memory space> [shape: f32[1,1], index: 2, kind: input, shape index: {}]   ;;  %s4907_s3 = inlined_call_operand.vmem [shape: f32[2,300,128], index: 3, kind: output, shape index: {}]  }
   0x1   :  { %8 = sst [smem:[#allocation2]] %s4906_s2 }
   0x2   :  { %9 = vsyncpa [#allocation4], 0 }
   0x3   :  { %11 = vsyncpa [#allocation4 + $0x1], 0  ;;  %s3087_s14 = smov 0   ;;  %s3089_s15 = smov 0  }
   0x4   :  { %s3091_s16 = smov 0   ;;  %s3093_s17 = smov 0  }
   0x5 LB: > { %s3106_s2 = sadd.s32 4294967295, %s3056_s17   ;;  %s3109_s18 = sadd.s32 1, %s3056_s17   ;;  %s3056_s17 = sphi %s3093_s17, %s5485_s17   ;;  %s3052_s16 = sphi %s3091_s16, %s5484_s16   ;;  %s3048_s15 = sphi %s3089_s15, %s5483_s15   ;;  %s3044_s14 = sphi %s3087_s14, %s5482_s14  }
   0x6   : > { %s21_s19 = ssub.s32 %s3056_s17, %s3109_s18  ;;  %s24_s20 = sadd.s32 1, %s3052_s16 }
   0x7   : > { %p22_p0 = scmp.eq.s32.totalorder %s21_s19, 0  ;;  %p31_p1 = scmp.ne.s32.totalorder %s3052_s16, %s3048_s15 }
   0x8   : > { %p32_p2 = scmp.eq.s32.totalorder %s3056_s17, 0  ;;  %p37_p3 = scmp.ne.s32.totalorder %s3048_s15, %s3044_s14 }
   0x9   : > { %s3119_s21 = scalar_select %p22_p0, %s3052_s16, %s24_s20  }
   0xa   : > { %p33_p4 = por %p32_p2, %p31_p1  ;;  %p38_p5 = scmp.eq.s32.totalorder %s3106_s2, 0 }
   0xb   : > { %p103_p6 = scmp.eq.s32.totalorder %s3106_s2, 1  ;;  %p2843_p8 = scmp.lt.s32.totalorder %s3056_s17, 2 }
   0xc   : > { %p3123_p7 = por %p38_p5, %p37_p3  ;;  %s135_s24 = sand.u32 1, %s3052_s16  }
   0xd   : > { %p3128_p9 = por %p103_p6, %p31_p1  ;;  %s2835_s25 = smul.u32 304, %s135_s24 }
   0xe   : > { %s5146_s22 = scalar_select %p3123_p7, 1, 0 }
   0xf   : > { %s5147_s23 = scalar_select %p3128_p9, 1, 0 }
  0x10   : > { %s2834_s26 = smul.u32 4864, %s3056_s17  ;;  %p3134_p10 = pnand %p2843_p8, %p33_p4 }
  0x11   : > { %s139_s4 = scalar_lea.vmem [#allocation3], %s2835_s25  ;;  %s3146_s6 = scalar_lea.sflag [#allocation4], %s135_s24 }
  0x12   : > { %s3141_s30 = scalar_lea.hbm %s4904_s0, %s2834_s26  ;;  %s147_s5 = sshll.u32 %s139_s4, 4  ;;  %s3143_s5 = int_to_ptr.vmem [resolvable:$true] %s147_s5 }
  0x13   : > { %s2994_s7 = scalar_lea.hbm %s3141_s30, 4864  ;;  %p2996_p13 = pneg %p3134_p10 }
  0x14   : > { %p2995_p12 = scmp.ne.s32.totalorder %s3141_s30, %s2994_s7  ;;  %s2999_s10 = scalar_lea.hbm %s4904_s0, 9728 }
  0x15   : > { %p3000_p2 = scmp.lt.s32.totalorder %s3141_s30, %s4904_s0  ;;  %p3001_p3 = scmp.lt.s32.totalorder %s2999_s10, %s2994_s7 }
  0x16   : > { %p2997_p0 = pnand %p2996_p13, %p2995_p12 }
  0x17   : > { %p3002_p4 = por %p3001_p3, %p3000_p2 }
  0x18   : > { %p2998_p1 = pneg %p2997_p0 }
  0x1a   : > { %p3003_p5 = pnand %p3002_p4, %p2998_p1 }
  0x1c   : > { %3006 = shalt.err (!%p3003_p5)
}
  0x1d   : > { %s3007_s13 = scalar_lea.vmem %s3143_s5, 4864  ;;  %s3058_s14 = smov [#allocation3]  }
  0x1e   : > { %p3008_p6 = scmp.ne.s32.totalorder %s3143_s5, %s3007_s13  ;;  %s3012_s19 = sshll.u32 %s3058_s14, 4  ;;  %s3013_s19 = int_to_ptr.vmem [resolvable:$false] %s3012_s19 }
  0x1f   : > { %s3014_s20 = scalar_lea.vmem %s3013_s19, 9728  ;;  %p3015_p0 = scmp.lt.s32.totalorder %s3143_s5, %s3013_s19 }
  0x20   : > { %p3010_p8 = pnand %p3008_p6, %p2996_p13  ;;  %p3016_p11 = scmp.lt.s32.totalorder %s3014_s20, %s3007_s13 }
  0x22   : > { %p3011_p12 = pneg %p3010_p8  ;;  %p3017_p9 = por %p3016_p11, %p3015_p0 }
  0x24   : > { %p3018_p7 = pnand %p3017_p9, %p3011_p12 }
  0x26   : > { %3021 = shalt.err (!%p3018_p7)
}
  0x27   : > { %s3059_s24 = smov 256   ;;  %s3060_s25 = smov 16  }
  0x28   : > { %2842 = dma.hbm_to_vmem [thread:$0]  (!%p3134_p10), %s3141_s30, 4864, %s3143_s5, %s3146_s6, %s3059_s24, %s3059_s24, %s3060_s25  }
  0x29   : > { %p155_p13 = scmp.lt.s32.totalorder %s3056_s17, 3  ;;  %p5149_p1 = scmp.ge.s32.totalorder %s3056_s17, 1 }
  0x2b   : > { %p156_p2 = pnand %p5149_p1, %p155_p13 }
  0x2d   : > { %159 = sbr.rel (%p156_p2) target bundleno = 787 (0x313), region = 32 }
  0x32   : > { %s161_s26 = sand.u32 1, %s3048_s15   ;;  %p5150_p7 = scmp.ne.s32.totalorder %s5146_s22, 0 }
  0x33   : > { %s3171_s28 = smul.u32 304, %s161_s26  ;;  %s162_s29 = scalar_lea.sflag [#allocation4], %s161_s26 }
  0x35   : > { %s3174_s4 = scalar_lea.vmem [#allocation3], %s3171_s28 }
  0x36   : > { %3039 = dma.done.wait (%p5150_p7), %s162_s29, 4864  }
  0x37   : > { %3041 = vsyncadd (%p5150_p7), %s162_s29, 4294962432  ;;  %v4939_v0 = vmov 0.0   ;;  %v243_v1 = vld [vmem:[%s4905_s1 + $0x78] sm:$0xff]  ;;  %v242_v2 = vld [vmem:[%s4905_s1 + $0x70] sm:$0xff]  ;;  %s189_s6 = sld [smem:[#allocation2]]  ;;  %s4732_s7 = scalar_lea.vmem [#allocation5], %s3171_s28 }
  0x38   : > { %261 = vmatprep.subr.mxu0 %v4939_v0  ;;  %643 = vmatprep.subr.mxu1 %v4939_v0  ;;  %v241_v3 = vld [vmem:[%s4905_s1 + $0x68] sm:$0xff]  ;;  %v3191_v4 = vand.u32 4294901760, %v243_v1  ;;  %v3193_v5 = vand.u32 4294901760, %v242_v2  ;;  %v240_v7 = vld [vmem:[%s4905_s1 + $0x60] sm:$0xff]  ;;  %v239_v8 = vld [vmem:[%s4905_s1 + $0x58] sm:$0xff]  ;;  %p5481_p9 = scmp.ne.s32.totalorder %s5147_s23, 0 }
  0x39   : > { %v3195_v6 = vand.u32 4294901760, %v241_v3  ;;  %v238_v9 = vld [vmem:[%s4905_s1 + $0x50] sm:$0xff]  ;;  %v3206_v10 = vand.u32 4294901760, %v240_v7  ;;  %v3208_v11 = vand.u32 4294901760, %v239_v8  ;;  %v237_v13 = vld [vmem:[%s4905_s1 + $0x48] sm:$0xff]  ;;  %v236_v14 = vld [vmem:[%s4905_s1 + $0x40] sm:$0xff] }
  0x3a   : > { %v3210_v12 = vand.u32 4294901760, %v238_v9  ;;  %263 = vmatpush1.msra.mxu0 %v3191_v4  ;;  %v3220_v15 = vsub.f32 %v243_v1, %v3191_v4  ;;  %v3223_v16 = vsub.f32 %v242_v2, %v3193_v5  ;;  %v3225_v17 = vand.u32 4294901760, %v237_v13  ;;  %v235_v19 = vld [vmem:[%s4905_s1 + $0x38] sm:$0xff]  ;;  %v234_v26 = vld [vmem:[%s4905_s1 + $0x30] sm:$0xff]  ;;  %v233_v36 = vld [vmem:[%s4905_s1 + $0x28] sm:$0xff]  ;;  %s2833_s28 = smul.u32 (%p5481_p9), 152, %s3106_s2 }
  0x3b   : > { %5151 = vst [vmem:[#allocation7_spill] sm:$0xff] %v3206_v10  ;;  %v3228_v18 = vsub.f32 %v241_v3, %v3195_v6  ;;  %264 = vmatprep.subr.mxu0 %v4939_v0  ;;  %v3235_v20 = vsub.f32 %v240_v7, %v3206_v10  ;;  %v3238_v21 = vsub.f32 %v239_v8, %v3208_v11  ;;  %v3244_v25 = vand.u32 4294901760, %v236_v14  ;;  %v232_v41 = vld [vmem:[%s4905_s1 + $0x20] sm:$0xff]  ;;  %v231_v49 = vld [vmem:[%s4905_s1 + $0x18] sm:$0xff]  ;;  %v230_v53 = vld [vmem:[%s4905_s1 + $0x10] sm:$0xff] }
  0x3c   : > { %266 = vmatpush1.msra.mxu0 %v3193_v5  ;;  %v4927_v22 = vand.u32 4294901760, %v3220_v15  ;;  %v4926_v23 = vand.u32 4294901760, %v3223_v16  ;;  %v3251_v28 = vand.u32 4294901760, %v235_v19  ;;  %v3255_v30 = vsub.f32 %v238_v9, %v3210_v12  ;;  %v229_v59 = vld [vmem:[%s4905_s1 + $0x8] sm:$0xff]  ;;  %v228_v2 = vld [vmem:[%s4905_s1] sm:$0xff]  ;;  %s4819_s22 = scalar_lea.vmem (%p5481_p9), %s4907_s3, %s2833_s28 }
  0x3d   : > { %v4924_v24 = vand.u32 4294901760, %v3228_v18  ;;  %5152 = vst [vmem:[#allocation8_spill] sm:$0xff] %v3244_v25  ;;  %267 = vmatprep.subr.mxu0 %v4939_v0  ;;  %v4922_v27 = vand.u32 4294901760, %v3235_v20  ;;  %v4921_v29 = vand.u32 4294901760, %v3238_v21  ;;  %v3268_v34 = vsub.f32 %v237_v13, %v3225_v17 }
  0x3e   : > { %269 = vmatpush1.msra.mxu0 %v3195_v6  ;;  %v647_v31 = vsub.f32 %v3220_v15, %v4927_v22  ;;  %v654_v32 = vsub.f32 %v3223_v16, %v4926_v23  ;;  %v3271_v35 = vand.u32 4294901760, %v234_v26  ;;  %v4919_v40 = vand.u32 4294901760, %v3255_v30  ;;  %v248_v22 = vld [vmem:[%s4905_s1 + $0xa0] sm:$0xff] }
  0x3f   : > { %v661_v33 = vsub.f32 %v3228_v18, %v4924_v24  ;;  %270 = vmatprep.subr.mxu0 %v4939_v0  ;;  %v668_v39 = vsub.f32 %v3235_v20, %v4922_v27  ;;  %v675_v42 = vsub.f32 %v3238_v21, %v4921_v29  ;;  %v3289_v43 = vsub.f32 %v236_v14, %v3244_v25  ;;  %v259_v14 = vld [vmem:[%s4905_s1 + $0xf8] sm:$0xff]  ;;  %v250_v29 = vld [vmem:[%s4905_s1 + $0xb0] sm:$0xff] }
  0x40   : > { %272 = vmatpush1.msra.mxu0 %v3206_v10  ;;  %v648_v37 = vand.u32 4294901760, %v647_v31  ;;  %v655_v38 = vand.u32 4294901760, %v654_v32  ;;  %v3292_v45 = vand.u32 4294901760, %v233_v36  ;;  %v4918_v46 = vand.u32 4294901760, %v3268_v34 }
  0x41   : > { %273 = vmatprep.subr.mxu0 %v4939_v0  ;;  %v662_v44 = vand.u32 4294901760, %v661_v33  ;;  %v3296_v47 = vsub.f32 %v235_v19, %v3251_v28  ;;  %v3300_v48 = vand.u32 4294901760, %v232_v41  ;;  %v669_v50 = vand.u32 4294901760, %v668_v39 }
  0x42   : > { %275 = vmatpush1.msra.mxu0 %v3208_v11  ;;  %649 = vmatpush1.msra.mxu1 %v648_v37  ;;  %v682_v51 = vsub.f32 %v3255_v30, %v4919_v40  ;;  %v4916_v52 = vand.u32 4294901760, %v3289_v43  ;;  %v3314_v54 = vsub.f32 %v234_v26, %v3271_v35  ;;  %v676_v55 = vand.u32 4294901760, %v675_v42 }
  0x43   : > { %276 = vmatprep.subr.mxu0 %v4939_v0  ;;  %650 = vmatprep.subr.mxu1 %v4939_v0  ;;  %5153 = vst [vmem:[#allocation9_spill] sm:$0xff] %v3300_v48  ;;  %v689_v56 = vsub.f32 %v3268_v34, %v4918_v46  ;;  %v3322_v57 = vand.u32 4294901760, %v231_v49  ;;  %v4915_v58 = vand.u32 4294901760, %v3296_v47  ;;  %v3329_v60 = vsub.f32 %v233_v36, %v3292_v45  ;;  %v258_v36 = vld [vmem:[%s4905_s1 + $0xf0] sm:$0xff] }
  0x44   : > { %278 = vmatpush1.msra.mxu0 %v3210_v12  ;;  %656 = vmatpush1.msra.mxu1 %v655_v38  ;;  %v3333_v61 = vand.u32 4294901760, %v230_v53  ;;  %v683_v62 = vand.u32 4294901760, %v682_v51  ;;  %v696_v63 = vsub.f32 %v3289_v43, %v4916_v52  ;;  %v4913_v1 = vand.u32 4294901760, %v3314_v54 }
  0x45   : > { %279 = vmatprep.subr.mxu0 %v4939_v0  ;;  %657 = vmatprep.subr.mxu1 %v4939_v0  ;;  %5154 = vst [vmem:[#allocation10_spill] sm:$0xff] %v3322_v57  ;;  %v3344_v3 = vsub.f32 %v232_v41, %v3300_v48  ;;  %v3348_v7 = vand.u32 4294901760, %v229_v59  ;;  %v690_v8 = vand.u32 4294901760, %v689_v56  ;;  %v703_v9 = vsub.f32 %v3296_v47, %v4915_v58  ;;  %v256_v56 = vld [vmem:[%s4905_s1 + $0xe0] sm:$0xff] }
  0x46   : > { %281 = vmatpush1.msra.mxu0 %v3225_v17  ;;  %663 = vmatpush1.msra.mxu1 %v662_v44  ;;  %5155 = vst [vmem:[#allocation11_spill] sm:$0xff] %v3333_v61  ;;  %v4912_v13 = vand.u32 4294901760, %v3329_v60  ;;  %v3359_v19 = vsub.f32 %v231_v49, %v3322_v57  ;;  %v3363_v26 = vand.u32 4294901760, %v228_v2  ;;  %v697_v31 = vand.u32 4294901760, %v696_v63  ;;  %v257_v44 = vld [vmem:[%s4905_s1 + $0xe8] sm:$0xff] }
  0x47   : > { %282 = vmatprep.subr.mxu0 %v4939_v0  ;;  %664 = vmatprep.subr.mxu1 %v4939_v0  ;;  %5156 = vst [vmem:[#allocation12_spill] sm:$0xff] %v3348_v7  ;;  %v710_v32 = vsub.f32 %v3314_v54, %v4913_v1  ;;  %v4910_v33 = vand.u32 4294901760, %v3344_v3  ;;  %v3374_v37 = vsub.f32 %v230_v53, %v3333_v61  ;;  %v3378_v38 = vand.u32 4294901760, %v259_v14 }
  0x48   : > { %284 = vmatpush1.msra.mxu0 %v3244_v25  ;;  %670 = vmatpush1.msra.mxu1 %v669_v50  ;;  %5157 = vst [vmem:[#allocation13_spill] sm:$0xff] %v3359_v19  ;;  %5158 = vst [vmem:[#allocation14_spill] sm:$0xff] %v3363_v26  ;;  %v704_v39 = vand.u32 4294901760, %v703_v9  ;;  %v717_v41 = vsub.f32 %v3329_v60, %v4912_v13  ;;  %v4909_v42 = vand.u32 4294901760, %v3359_v19  ;;  %v3393_v50 = vand.u32 4294901760, %v258_v36  ;;  %v253_v13 = vld [vmem:[%s4905_s1 + $0xc8] sm:$0xff] }
  0x49   : > { %285 = vmatprep.subr.mxu0 %v4939_v0  ;;  %671 = vmatprep.subr.mxu1 %v4939_v0  ;;  %5159 = vst [vmem:[#allocation15_spill] sm:$0xff] %v3374_v37  ;;  %5160 = vst [vmem:[#allocation16_spill] sm:$0xff] %v3378_v38  ;;  %v3389_v49 = vsub.f32 %v229_v59, %v3348_v7  ;;  %v711_v51 = vand.u32 4294901760, %v710_v32  ;;  %v724_v53 = vsub.f32 %v3344_v3, %v4910_v33 }
  0x4a   : > { %287 = vmatpush1.msra.mxu0 %v3251_v28  ;;  %677 = vmatpush1.msra.mxu1 %v676_v55  ;;  %5162 = vst [vmem:[#allocation18_spill] sm:$0xff] %v3393_v50  ;;  %v4911_v55 = vand.u32 4294901760, %v3374_v37  ;;  %v3404_v59 = vsub.f32 %v228_v2, %v3363_v26  ;;  %v718_v63 = vand.u32 4294901760, %v717_v41  ;;  %v255_v2 = vld [vmem:[%s4905_s1 + $0xd8] sm:$0xff]  ;;  %v3423_v32 = vand.u32 4294901760, %v256_v56 }
  0x4b   : > { %288 = vmatprep.subr.mxu0 %v4939_v0  ;;  %678 = vmatprep.subr.mxu1 %v4939_v0  ;;  %5161 = vst [vmem:[#allocation17_spill] sm:$0xff] %v3389_v49  ;;  %v4914_v9 = vand.u32 4294901760, %v3389_v49  ;;  %v3431_v33 = vsub.f32 %v258_v36, %v3393_v50  ;;  %v3465_v52 = vand.u32 4294901760, %v253_v13 }
  0x4c   : > { %290 = vmatpush1.msra.mxu0 %v3271_v35  ;;  %684 = vmatpush1.msra.mxu1 %v683_v62  ;;  %5163 = vst [vmem:[#allocation19_spill] sm:$0xff] %v3404_v59  ;;  %v3408_v62 = vand.u32 4294901760, %v257_v44  ;;  %5166 = vst [vmem:[#allocation22_spill] sm:$0xff] %v3423_v32  ;;  %v738_v41 = vsub.f32 %v3374_v37, %v4911_v55 }
  0x4d   : > { %291 = vmatprep.subr.mxu0 %v4939_v0  ;;  %685 = vmatprep.subr.mxu1 %v4939_v0  ;;  %5167 = vst [vmem:[#allocation23_spill] sm:$0xff] %v3431_v33  ;;  %v745_v55 = vsub.f32 %v3389_v49, %v4914_v9  ;;  %5172 = vst [vmem:[#allocation28_spill] sm:$0xff] %v3465_v52 }
  0x4e   : > { %293 = vmatpush1.msra.mxu0 %v3292_v45  ;;  %691 = vmatpush1.msra.mxu1 %v690_v8  ;;  %5164 = vst [vmem:[#allocation20_spill] sm:$0xff] %v3408_v62  ;;  %v731_v8 = vsub.f32 %v3359_v19, %v4909_v42  ;;  %v4917_v42 = vand.u32 4294901760, %v3404_v59  ;;  %v3449_v1 = vsub.f32 %v257_v44, %v3408_v62  ;;  %v4923_v44 = vand.u32 4294901760, %v3431_v33 }
  0x4f   : > { %294 = vmatprep.subr.mxu0 %v4939_v0  ;;  %692 = vmatprep.subr.mxu1 %v4939_v0 }
  0x50   : > { %296 = vmatpush1.msra.mxu0 %v3300_v48  ;;  %698 = vmatpush1.msra.mxu1 %v697_v31  ;;  %v3419_v31 = vsub.f32 %v259_v14, %v3378_v38  ;;  %v3435_v14 = vand.u32 4294901760, %v255_v2  ;;  %5169 = vst [vmem:[#allocation25_spill] sm:$0xff] %v3449_v1  ;;  %v752_v9 = vsub.f32 %v3404_v59, %v4917_v42  ;;  %v4925_v42 = vand.u32 4294901760, %v3449_v1 }
  0x51   : > { %297 = vmatprep.subr.mxu0 %v4939_v0  ;;  %699 = vmatprep.subr.mxu1 %v4939_v0 }
  0x52   : > { %299 = vmatpush1.msra.mxu0 %v3322_v57  ;;  %705 = vmatpush1.msra.mxu1 %v704_v39  ;;  %5165 = vst [vmem:[#allocation21_spill] sm:$0xff] %v3419_v31  ;;  %v725_v39 = vand.u32 4294901760, %v724_v53  ;;  %5168 = vst [vmem:[#allocation24_spill] sm:$0xff] %v3435_v14  ;;  %v732_v53 = vand.u32 4294901760, %v731_v8  ;;  %v4920_v36 = vand.u32 4294901760, %v3419_v31  ;;  %v739_v8 = vand.u32 4294901760, %v738_v41 }
  0x53   : > { %300 = vmatprep.subr.mxu0 %v4939_v0  ;;  %706 = vmatprep.subr.mxu1 %v4939_v0  ;;  %v3476_v46 = vsub.f32 %v255_v2, %v3435_v14  ;;  %v198_v57 = vld [vmem:[%s3174_s4 + $0x40] sm:$0xff] }
  0x54   : > { %302 = vmatpush1.msra.mxu0 %v3333_v61  ;;  %712 = vmatpush1.msra.mxu1 %v711_v51  ;;  %v254_v51 = vld [vmem:[%s4905_s1 + $0xd0] sm:$0xff]  ;;  %v759_v41 = vsub.f32 %v3419_v31, %v4920_v36  ;;  %v766_v36 = vsub.f32 %v3431_v33, %v4923_v44  ;;  %v773_v44 = vsub.f32 %v3449_v1, %v4925_v42 }
  0x55   : > { %303 = vmatprep.subr.mxu0 %v4939_v0  ;;  %713 = vmatprep.subr.mxu1 %v4939_v0  ;;  %v3460_v58 = vand.u32 4294901760, %v254_v51  ;;  %5173 = vst [vmem:[#allocation29_spill] sm:$0xff] %v3476_v46  ;;  %v192_v33 = vld [vmem:[%s3174_s4 + $0x10] sm:$0xff] }
  0x56   : > { %305 = vmatpush1.msra.mxu0 %v3348_v7  ;;  %719 = vmatpush1.msra.mxu1 %v718_v63  ;;  %v3454_v63 = vsub.f32 %v256_v56, %v3423_v32  ;;  %v252_v56 = vld [vmem:[%s4905_s1 + $0xc0] sm:$0xff]  ;;  %v767_v42 = vand.u32 4294901760, %v766_v36  ;;  %v774_v36 = vand.u32 4294901760, %v773_v44  ;;  %v193_v44 = vld [vmem:[%s3174_s4 + $0x18] sm:$0xff] }
  0x57   : > { %306 = vmatprep.subr.mxu0 %v4939_v0  ;;  %720 = vmatprep.subr.mxu1 %v4939_v0  ;;  %5171 = vst [vmem:[#allocation27_spill] sm:$0xff] %v3460_v58  ;;  %v3488_v2 = vand.u32 4294901760, %v252_v56  ;;  %v3494_v27 = vsub.f32 %v254_v51, %v3460_v58 }
  0x58   : > { %5170 = vst [vmem:[#allocation26_spill] sm:$0xff] %v3454_v63  ;;  %308 = vmatpush1.msra.mxu0 %v3363_v26  ;;  %726 = vmatpush1.msra.mxu1 %v725_v39  ;;  %v746_v39 = vand.u32 4294901760, %v745_v55  ;;  %v4928_v40 = vand.u32 4294901760, %v3454_v63  ;;  %v753_v55 = vand.u32 4294901760, %v752_v9  ;;  %v760_v9 = vand.u32 4294901760, %v759_v41  ;;  %v249_v41 = vld [vmem:[%s4905_s1 + $0xa8] sm:$0xff] }
  0x59   : > { %309 = vmatprep.subr.mxu0 %v4939_v0  ;;  %727 = vmatprep.subr.mxu1 %v4939_v0  ;;  %5174 = vst [vmem:[#allocation30_spill] sm:$0xff] %v3488_v2  ;;  %5175 = vst [vmem:[#allocation31_spill] sm:$0xff] %v3494_v27  ;;  %v3524_v51 = vsub.f32 %v252_v56, %v3488_v2 }
  0x5a   : > { %311 = vmatpush2.msra.mxu0 %v3378_v38  ;;  %733 = vmatpush1.msra.mxu1 %v732_v53  ;;  %v251_v53 = vld [vmem:[%s4905_s1 + $0xb8] sm:$0xff]  ;;  %v3573_v38 = vand.u32 4294901760, %v193_v44 }
  0x5b   : > { %312 = vmatprep.subr.mxu0 %v4939_v0  ;;  %734 = vmatprep.subr.mxu1 %v4939_v0  ;;  %v3505_v24 = vand.u32 4294901760, %v251_v53  ;;  %5179 = vst [vmem:[#allocation35_spill] sm:$0xff] %v3524_v51 }
  0x5c   : > { %314 = vmatpush2.msra.mxu0 %v3393_v50  ;;  %740 = vmatpush1.msra.mxu1 %v739_v8  ;;  %v3499_v8 = vsub.f32 %v253_v13, %v3465_v52  ;;  %v780_v13 = vsub.f32 %v3454_v63, %v4928_v40  ;;  %v3535_v63 = vand.u32 4294901760, %v249_v41  ;;  %v3542_v50 = vand.u32 4294901760, %v248_v22  ;;  %5191 = vst [vmem:[#allocation43_spill] sm:$0xff] %v3573_v38 }
  0x5d   : > { %315 = vmatprep.subr.mxu0 %v4939_v0  ;;  %741 = vmatprep.subr.mxu1 %v4939_v0  ;;  %5177 = vst [vmem:[#allocation33_spill] sm:$0xff] %v3505_v24  ;;  %v3538_v56 = vsub.f32 %v251_v53, %v3505_v24 }
  0x5e   : > { %5176 = vst [vmem:[#allocation32_spill] sm:$0xff] %v3499_v8  ;;  %317 = vmatpush2.msra.mxu0 %v3408_v62  ;;  %747 = vmatpush1.msra.mxu1 %v746_v39  ;;  %v3513_v39 = vand.u32 4294901760, %v250_v29  ;;  %v191_v62 = vld [vmem:[%s3174_s4 + $0x8] sm:$0xff]  ;;  %5181 = vst [vmem:[#allocation36_spill] sm:$0xff] %v3535_v63  ;;  %v781_v40 = vand.u32 4294901760, %v780_v13  ;;  %v3571_v1 = vsub.f32 %v249_v41, %v3535_v63 }
  0x5f   : > { %318 = vmatprep.subr.mxu0 %v4939_v0  ;;  %748 = vmatprep.subr.mxu1 %v4939_v0  ;;  %5182 = vst [vmem:[#allocation37_spill] sm:$0xff] %v3538_v56  ;;  %5183 = vst [vmem:[#allocation38_spill] sm:$0xff] %v3542_v50  ;;  %v247_v13 = vld [vmem:[%s4905_s1 + $0x98] sm:$0xff] }
  0x60   : > { %5178 = vst [vmem:[#allocation34_spill] sm:$0xff] %v3513_v39  ;;  %320 = vmatpush2.msra.mxu0 %v3423_v32  ;;  %754 = vmatpush1.msra.mxu1 %v753_v55  ;;  %v190_v32 = vld [vmem:[%s3174_s4] sm:$0xff]  ;;  %v5180_v55 = vand.u32 4294901760, %v3476_v46  ;;  %5190 = vst [vmem:[#allocation42_spill] sm:$0xff] %v3571_v1  ;;  %v3578_v26 = vand.u32 4294901760, %v247_v13 }
  0x61   : > { %321 = vmatprep.subr.mxu0 %v4939_v0  ;;  %755 = vmatprep.subr.mxu1 %v4939_v0 }
  0x62   : > { %323 = vmatpush2.msra.mxu0 %v3435_v14  ;;  %761 = vmatpush2.msra.mxu1 %v760_v9  ;;  %v787_v23 = vsub.f32 %v3476_v46, %v5180_v55  ;;  %v3545_v14 = vsub.f32 %v250_v29, %v3513_v39  ;;  %v5185_v9 = vand.u32 4294901760, %v3494_v27  ;;  %v246_v29 = vld [vmem:[%s4905_s1 + $0x90] sm:$0xff]  ;;  %v3561_v46 = vand.u32 4294901760, %v190_v32  ;;  %5192 = vst [vmem:[#allocation44_spill] sm:$0xff] %v3578_v26 }
  0x63   : > { %324 = vmatprep.subr.mxu0 %v4939_v0  ;;  %762 = vmatprep.subr.mxu1 %v4939_v0  ;;  %v3559_v0 = vand.u32 4294901760, %v191_v62  ;;  %v3580_v31 = vand.u32 4294901760, %v246_v29 }
  0x64   : > { %5184 = vst [vmem:[#allocation39_spill] sm:$0xff] %v3545_v14  ;;  %326 = vmatpush2.msra.mxu0 %v3460_v58  ;;  %768 = vmatpush2.msra.mxu1 %v767_v42  ;;  %v794_v53 = vsub.f32 %v3494_v27, %v5185_v9  ;;  %5187 = vst [vmem:[#allocation41_spill] sm:$0xff] %v3561_v46  ;;  %v5188_v42 = vmov 0.0   ;;  %v5189_v9 = vand.u32 4294901760, %v3499_v8  ;;  %v788_v58 = vand.u32 4294901760, %v787_v23 }
  0x65   : > { %5186 = vst [vmem:[#allocation40_spill] sm:$0xff] %v3559_v0  ;;  %327 = vmatprep.subr.mxu0 %v5188_v42  ;;  %769 = vmatprep.subr.mxu1 %v5188_v42  ;;  %5193 = vst [vmem:[#allocation45_spill] sm:$0xff] %v3580_v31  ;;  %v3584_v23 = vsub.f32 %v248_v22, %v3542_v50  ;;  %v5195_v27 = vand.u32 4294901760, %v3524_v51  ;;  %v3595_v7 = vsub.f32 %v191_v62, %v3559_v0 }
  0x66   : > { %v801_v55 = vsub.f32 %v3499_v8, %v5189_v9  ;;  %329 = vmatpush2.msra.mxu0 %v3465_v52  ;;  %775 = vmatpush2.msra.mxu1 %v774_v36  ;;  %v195_v36 = vld [vmem:[%s3174_s4 + $0x28] sm:$0xff]  ;;  %v795_v41 = vand.u32 4294901760, %v794_v53  ;;  %v3598_v22 = vsub.f32 %v190_v32, %v3561_v46  ;;  %v3602_v53 = vand.u32 4294901760, %v192_v33  ;;  %v244_v32 = vld [vmem:[%s4905_s1 + $0x80] sm:$0xff] }
  0x67   : > { %330 = vmatprep.subr.mxu0 %v5188_v42  ;;  %776 = vmatprep.subr.mxu1 %v5188_v42  ;;  %5194 = vst [vmem:[#allocation46_spill] sm:$0xff] %v3584_v23  ;;  %v808_v52 = vsub.f32 %v3524_v51, %v5195_v27  ;;  %v245_v8 = vld [vmem:[%s4905_s1 + $0x88] sm:$0xff]  ;;  %5196 = vst [vmem:[#allocation47_spill] sm:$0xff] %v3595_v7  ;;  %v5199_v27 = vand.u32 4294901760, %v3538_v56  ;;  %v3615_v51 = vand.u32 4294901760, %v195_v36 }
  0x68   : > { %332 = vmatpush2.msra.mxu0 %v3488_v2  ;;  %782 = vmatpush2.msra.mxu1 %v781_v40  ;;  %5197 = vst [vmem:[#allocation48_spill] sm:$0xff] %v3598_v22  ;;  %v802_v40 = vand.u32 4294901760, %v801_v55  ;;  %5198 = vst [vmem:[#allocation49_spill] sm:$0xff] %v3602_v53  ;;  %v3613_v2 = vsub.f32 %v193_v44, %v3573_v38  ;;  %v194_v55 = vld [vmem:[%s3174_s4 + $0x20] sm:$0xff]  ;;  %v3623_v62 = vand.u32 4294901760, %v245_v8 }
  0x69   : > { %333 = vmatprep.subr.mxu0 %v5188_v42  ;;  %783 = vmatprep.subr.mxu1 %v5188_v42  ;;  %v815_v9 = vsub.f32 %v3538_v56, %v5199_v27  ;;  %5201 = vst [vmem:[#allocation51_spill] sm:$0xff] %v3615_v51  ;;  %v3627_v56 = vsub.f32 %v247_v13, %v3578_v26  ;;  %v809_v44 = vand.u32 4294901760, %v808_v52  ;;  %v197_v52 = vld [vmem:[%s3174_s4 + $0x38] sm:$0xff] }
  0x6a   : > { %335 = vmatpush2.msra.mxu0 %v3505_v24  ;;  %789 = vmatpush2.msra.mxu1 %v788_v58  ;;  %5200 = vst [vmem:[#allocation50_spill] sm:$0xff] %v3613_v2  ;;  %v5202_v58 = vand.u32 4294901760, %v3545_v14  ;;  %5203 = vst [vmem:[#allocation52_spill] sm:$0xff] %v3623_v62  ;;  %v3633_v61 = vsub.f32 %v246_v29, %v3580_v31  ;;  %v3640_v13 = vsub.f32 %v192_v33, %v3602_v53 }
  0x6b   : > { %336 = vmatprep.subr.mxu0 %v5188_v42  ;;  %790 = vmatprep.subr.mxu1 %v5188_v42  ;;  %v3642_v24 = vand.u32 4294901760, %v194_v55  ;;  %v5206_v29 = vand.u32 4294901760, %v3571_v1 }
  0x6c   : > { %v822_v27 = vsub.f32 %v3545_v14, %v5202_v58  ;;  %338 = vmatpush2.msra.mxu0 %v3513_v39  ;;  %796 = vmatpush2.msra.mxu1 %v795_v41  ;;  %v3637_v58 = vand.u32 4294901760, %v244_v32  ;;  %5204 = vst [vmem:[#allocation53_spill] sm:$0xff] %v3640_v13  ;;  %v816_v41 = vand.u32 4294901760, %v815_v9  ;;  %v3651_v39 = vsub.f32 %v195_v36, %v3615_v51 }
  0x6d   : > { %339 = vmatprep.subr.mxu0 %v5188_v42  ;;  %797 = vmatprep.subr.mxu1 %v5188_v42  ;;  %5205 = vst [vmem:[#allocation54_spill] sm:$0xff] %v3642_v24  ;;  %v829_v49 = vsub.f32 %v3571_v1, %v5206_v29  ;;  %v5208_v14 = vand.u32 4294901760, %v3584_v23  ;;  %v196_v29 = vld [vmem:[%s3174_s4 + $0x30] sm:$0xff]  ;;  %v5210_v36 = vand.u32 4294901760, %v3595_v7  ;;  %v3680_v9 = vsub.f32 %v194_v55, %v3642_v24 }
  0x6e   : > { %341 = vmatpush2.msra.mxu0 %v3535_v63  ;;  %803 = vmatpush2.msra.mxu1 %v802_v40  ;;  %5207 = vst [vmem:[#allocation55_spill] sm:$0xff] %v3651_v39  ;;  %v823_v33 = vand.u32 4294901760, %v822_v27  ;;  %v3660_v40 = vsub.f32 %v245_v8, %v3623_v62  ;;  %v5211_v27 = vand.u32 4294901760, %v3598_v22  ;;  %v199_v8 = vld [vmem:[%s3174_s4 + $0x48] sm:$0xff]  ;;  %v5215_v55 = vand.u32 4294901760, %v3627_v56 }
  0x6f   : > { %342 = vmatprep.subr.mxu0 %v5188_v42  ;;  %804 = vmatprep.subr.mxu1 %v5188_v42  ;;  %v836_v63 = vsub.f32 %v3584_v23, %v5208_v14  ;;  %v360_v59 = vsub.f32 %v3595_v7, %v5210_v36  ;;  %v3671_v23 = vand.u32 4294901760, %v197_v52  ;;  %v830_v36 = vand.u32 4294901760, %v829_v49 }
  0x70   : > { %5209 = vst [vmem:[#allocation56_spill] sm:$0xff] %v3660_v40  ;;  %344 = vmatpush2.msra.mxu0 %v3542_v50  ;;  %810 = vmatpush2.msra.mxu1 %v809_v44  ;;  %v366_v1 = vsub.f32 %v3598_v22, %v5211_v27  ;;  %v3677_v44 = vsub.f32 %v244_v32, %v3637_v58  ;;  %v5213_v27 = vand.u32 4294901760, %v3613_v2  ;;  %v3687_v7 = vand.u32 4294901760, %v196_v29 }
  0x71   : > { %5212 = vst [vmem:[#allocation57_spill] sm:$0xff] %v3671_v23  ;;  %345 = vmatprep.subr.mxu0 %v5188_v42  ;;  %811 = vmatprep.subr.mxu1 %v5188_v42  ;;  %v837_v32 = vand.u32 4294901760, %v836_v63  ;;  %v5216_v22 = vand.u32 4294901760, %v3633_v61  ;;  %v3701_v50 = vsub.f32 %v197_v52, %v3671_v23  ;;  %v5217_v63 = vand.u32 4294901760, %v3640_v13 }
  0x72   : > { %347 = vmatpush2.msra.mxu0 %v3578_v26  ;;  %817 = vmatpush2.msra.mxu1 %v816_v41  ;;  %v375_v14 = vsub.f32 %v3613_v2, %v5213_v27  ;;  %5214 = vst [vmem:[#allocation58_spill] sm:$0xff] %v3687_v7  ;;  %v843_v41 = vsub.f32 %v3627_v56, %v5215_v55  ;;  %v361_v27 = vand.u32 4294901760, %v360_v59  ;;  %v367_v2 = vand.u32 4294901760, %v366_v1 }
  0x73   : > { %348 = vmatprep.subr.mxu0 %v5188_v42  ;;  %818 = vmatprep.subr.mxu1 %v5188_v42  ;;  %v850_v26 = vsub.f32 %v3633_v61, %v5216_v22  ;;  %v381_v55 = vsub.f32 %v3640_v13, %v5217_v63  ;;  %v3711_v59 = vand.u32 4294901760, %v199_v8  ;;  %v5219_v52 = vand.u32 4294901760, %v3651_v39 }
  0x74   : > { %350 = vmatpush2.msra.mxu0 %v3580_v31  ;;  %824 = vmatpush2.msra.mxu1 %v823_v33  ;;  %v376_v22 = vand.u32 4294901760, %v375_v14  ;;  %v3718_v31 = vsub.f32 %v196_v29, %v3687_v7  ;;  %v844_v63 = vand.u32 4294901760, %v843_v41  ;;  %v5220_v1 = vand.u32 4294901760, %v3660_v40  ;;  %v201_v29 = vld [vmem:[%s3174_s4 + $0x58] sm:$0xff] }
  0x75   : > { %351 = vmatprep.subr.mxu0 %v5188_v42  ;;  %825 = vmatprep.subr.mxu1 %v5188_v42  ;;  %5218 = vst [vmem:[#allocation59_spill] sm:$0xff] %v3711_v59  ;;  %v390_v49 = vsub.f32 %v3651_v39, %v5219_v52  ;;  %v3725_v13 = vand.u32 4294901760, %v198_v57  ;;  %v851_v14 = vand.u32 4294901760, %v850_v26  ;;  %v382_v52 = vand.u32 4294901760, %v381_v55 }
  0x76   : > { %353 = vmatpush2.msra.mxu0 %v3623_v62  ;;  %831 = vmatpush2.msra.mxu1 %v830_v36  ;;  %v857_v33 = vsub.f32 %v3660_v40, %v5220_v1  ;;  %v5010_v36 = vand.u32 4294901760, %v3701_v50  ;;  %v5222_v39 = vand.u32 4294901760, %v3677_v44  ;;  %v5223_v62 = vand.u32 4294901760, %v3680_v9 }
  0x77   : > { %354 = vmatprep.subr.mxu0 %v5188_v42  ;;  %832 = vmatprep.subr.mxu1 %v5188_v42  ;;  %5221 = vst [vmem:[#allocation60_spill] sm:$0xff] %v3725_v13  ;;  %v3737_v40 = vsub.f32 %v199_v8, %v3711_v59  ;;  %v391_v26 = vand.u32 4294901760, %v390_v49  ;;  %v3746_v55 = vand.u32 4294901760, %v201_v29 }
  0x78   : > { %356 = vmatpush2.msra.mxu0 %v3637_v58  ;;  %362 = vmatprep.mubr.f32.mxu0 %v361_v27  ;;  %v864_v41 = vsub.f32 %v3677_v44, %v5222_v39  ;;  %v396_v1 = vsub.f32 %v3680_v9, %v5223_v62  ;;  %v5009_v27 = vand.u32 4294901760, %v3718_v31  ;;  %v3744_v39 = vsub.f32 %v198_v57, %v3725_v13  ;;  %v203_v57 = vld [vmem:[%s3174_s4 + $0x68] sm:$0xff] }
  0x79   : > { %838 = vmatpush2.msra.mxu1 %v837_v32  ;;  %368 = vmatmul.mubr.f32.vlgmr.msra.gmra.mxu0 %v367_v2  ;;  %v200_v2 = vld [vmem:[%s3174_s4 + $0x50] sm:$0xff]  ;;  %v858_v32 = vand.u32 4294901760, %v857_v33  ;;  %5224 = vst [vmem:[#allocation61_spill] sm:$0xff] %v3746_v55  ;;  %v405_v62 = vsub.f32 %v3701_v50, %v5010_v36  ;;  %v5011_v33 = vand.u32 4294901760, %v3737_v40 }
  0x7a   : > { %839 = vmatprep.subr.mxu1 %v5188_v42  ;;  %377 = vmatprep.mubr.f32.mxu0 %v376_v22  ;;  %v865_v8 = vand.u32 4294901760, %v864_v41  ;;  %v397_v49 = vand.u32 4294901760, %v396_v1  ;;  %v3754_v22 = vand.u32 4294901760, %v200_v2  ;;  %v202_v41 = vld [vmem:[%s3174_s4 + $0x60] sm:$0xff] }
  0x7b   : > { %845 = vmatpush2.msra.mxu1 %v844_v63  ;;  %1001 = vmatprep.subr.mxu0 %v5188_v42  ;;  %v411_v63 = vsub.f32 %v3718_v31, %v5009_v27  ;;  %v406_v1 = vand.u32 4294901760, %v405_v62  ;;  %v3779_v36 = vand.u32 4294901760, %v202_v41 }
  0x7c   : > { %846 = vmatprep.subr.mxu1 %v5188_v42  ;;  %868 = vmatprep.mubr.f32.mxu1 %v3559_v0  ;;  %5225 = vst [vmem:[#allocation62_spill] sm:$0xff] %v3754_v22  ;;  %v3775_v27 = vsub.f32 %v200_v2, %v3754_v22  ;;  %v206_v0 = vld [vmem:[%s3174_s4 + $0x80] sm:$0xff] }
  0x7d   : > { %852 = vmatpush2.msra.mxu1 %v851_v14  ;;  %383 = vmatmul.mubr.f32.gmra.mxu0 %v382_v52  ;;  %v5014_v14 = vand.u32 4294901760, %v3744_v39  ;;  %v3764_v52 = vsub.f32 %v201_v29, %v3746_v55  ;;  %v412_v29 = vand.u32 4294901760, %v411_v63  ;;  %5229 = vst [vmem:[#allocation66_spill] sm:$0xff] %v3779_v36  ;;  %v204_v63 = vld [vmem:[%s3174_s4 + $0x70] sm:$0xff] }
  0x7e   : > { %853 = vmatprep.subr.mxu1 %v5188_v42  ;;  %392 = vmatprep.mubr.f32.mxu0 %v391_v26  ;;  %v3769_v26 = vand.u32 4294901760, %v203_v57  ;;  %5228 = vst [vmem:[#allocation65_spill] sm:$0xff] %v3775_v27 }
  0x7f   : > { %859 = vmatpush2.msra.mxu1 %v858_v32  ;;  %1004 = vmatpush1.msra.mxu0 %v3220_v15  ;;  %5226 = vst [vmem:[#allocation63_spill] sm:$0xff] %v3764_v52  ;;  %v420_v32 = vsub.f32 %v3737_v40, %v5011_v33  ;;  %v426_v62 = vsub.f32 %v3744_v39, %v5014_v14 }
  0x80   : > { %860 = vmatprep.subr.mxu1 %v5188_v42  ;;  %1005 = vmatprep.subr.mxu0 %v5188_v42  ;;  %5227 = vst [vmem:[#allocation64_spill] sm:$0xff] %v3769_v26  ;;  %v3790_v2 = vsub.f32 %v203_v57, %v3769_v26  ;;  %v3798_v14 = vsub.f32 %v202_v41, %v3779_v36 }
  0x81   : > { %866 = vmatpush2.msra.mxu1 %v865_v8  ;;  %398 = vmatmul.mubr.f32.gmra.mxu0 %v397_v49  ;;  %v5017_v8 = vand.u32 4294901760, %v3764_v52  ;;  %v205_v49 = vld [vmem:[%s3174_s4 + $0x78] sm:$0xff]  ;;  %v421_v33 = vand.u32 4294901760, %v420_v32  ;;  %v427_v57 = vand.u32 4294901760, %v426_v62 }
  0x82   : > { %870 = vmatmul.mubr.f32.vlgmr.msra.gmra.mxu1 %v3561_v46  ;;  %1301 = vmatprep.subr.mxu1 %v5188_v42  ;;  %5230 = vst [vmem:[#allocation67_spill] sm:$0xff] %v3790_v2  ;;  %v5024_v46 = vand.u32 4294901760, %v3775_v27 }
  0x83   : > { %1303 = vmatpush1.msra.mxu1 %v3191_v4  ;;  %1008 = vmatpush1.msra.mxu0 %v3223_v16  ;;  %v435_v32 = vsub.f32 %v3764_v52, %v5017_v8  ;;  %v5034_v8 = vand.u32 4294901760, %v3798_v14 }
  0x84   : > { %407 = vmatprep.mubr.f32.mxu0 %v406_v1  ;;  %875 = vmatprep.mubr.f32.mxu1 %v3573_v38  ;;  %v3800_v1 = vand.u32 4294901760, %v205_v49  ;;  %v3807_v38 = vand.u32 4294901760, %v204_v63  ;;  %v441_v62 = vsub.f32 %v3775_v27, %v5024_v46  ;;  %v5236_v46 = vand.u32 4294901760, %v3790_v2 }
  0x85   : > { %1009 = vmatprep.subr.mxu0 %v5188_v42  ;;  %1304 = vmatprep.subr.mxu1 %v5188_v42  ;;  %v436_v41 = vand.u32 4294901760, %v435_v32  ;;  %v3837_v32 = vand.u32 4294901760, %v206_v0 }
  0x86   : > { %413 = vmatmul.mubr.f32.gmra.mxu0 %v412_v29  ;;  %877 = vmatmul.mubr.f32.gmra.mxu1 %v3602_v53  ;;  %5231 = vst [vmem:[#allocation68_spill] sm:$0xff] %v3800_v1  ;;  %5232 = vst [vmem:[#allocation69_spill] sm:$0xff] %v3807_v38  ;;  %v207_v29 = vld [vmem:[%s3174_s4 + $0x88] sm:$0xff]  ;;  %v3821_v53 = vsub.f32 %v205_v49, %v3800_v1  ;;  %v450_v49 = vsub.f32 %v3790_v2, %v5236_v46  ;;  %v208_v2 = vld [vmem:[%s3174_s4 + $0x90] sm:$0xff] }
  0x87   : > { %1012 = vmatpush1.msra.mxu0 %v3228_v18  ;;  %1306 = vmatpush1.msra.mxu1 %v3193_v5  ;;  %v3828_v52 = vand.u32 4294901760, %v207_v29  ;;  %5237 = vst [vmem:[#allocation73_spill] sm:$0xff] %v3837_v32  ;;  %v3865_v46 = vand.u32 4294901760, %v208_v2 }
  0x88   : > { %1307 = vmatprep.subr.mxu1 %v5188_v42  ;;  %1013 = vmatprep.subr.mxu0 %v5188_v42  ;;  %5233 = vst [vmem:[#allocation70_spill] sm:$0xff] %v3821_v53  ;;  %v451_v27 = vand.u32 4294901760, %v450_v49 }
  0x89   : > { %1309 = vmatpush1.msra.mxu1 %v3195_v6  ;;  %422 = vmatprep.mubr.f32.mxu0 %v421_v33  ;;  %v3826_v33 = vsub.f32 %v204_v63, %v3807_v38  ;;  %5235 = vst [vmem:[#allocation72_spill] sm:$0xff] %v3828_v52  ;;  %v209_v63 = vld [vmem:[%s3174_s4 + $0x98] sm:$0xff]  ;;  %5240 = vst [vmem:[#allocation76_spill] sm:$0xff] %v3865_v46 }
  0x8a   : > { %882 = vmatprep.mubr.f32.mxu1 %v3615_v51  ;;  %1016 = vmatpush1.msra.mxu0 %v3235_v20  ;;  %v5037_v51 = vand.u32 4294901760, %v3821_v53 }
  0x8b   : > { %428 = vmatmul.mubr.f32.gmra.mxu0 %v427_v57  ;;  %884 = vmatmul.mubr.f32.gmra.mxu1 %v3642_v24  ;;  %5234 = vst [vmem:[#allocation71_spill] sm:$0xff] %v3826_v33  ;;  %v442_v57 = vand.u32 4294901760, %v441_v62  ;;  %v456_v24 = vsub.f32 %v3798_v14, %v5034_v8  ;;  %v3849_v62 = vsub.f32 %v207_v29, %v3828_v52  ;;  %v5241_v49 = vand.u32 4294901760, %v3826_v33 }
  0x8c   : > { %1017 = vmatprep.subr.mxu0 %v5188_v42  ;;  %1310 = vmatprep.subr.mxu1 %v5188_v42  ;;  %v465_v8 = vsub.f32 %v3821_v53, %v5037_v51  ;;  %v210_v51 = vld [vmem:[%s3174_s4 + $0xa0] sm:$0xff] }
  0x8d   : > { %1020 = vmatpush1.msra.mxu0 %v3238_v21  ;;  %1312 = vmatpush1.msra.mxu1 %v3206_v10  ;;  %5238 = vst [vmem:[#allocation74_spill] sm:$0xff] %v3849_v62  ;;  %v3854_v10 = vand.u32 4294901760, %v209_v63  ;;  %v457_v29 = vand.u32 4294901760, %v456_v24 }
  0x8e   : > { %1021 = vmatprep.subr.mxu0 %v5188_v42  ;;  %1313 = vmatprep.subr.mxu1 %v5188_v42 }
  0x8f   : > { %437 = vmatprep.mubr.f32.mxu0 %v436_v41  ;;  %889 = vmatprep.mubr.f32.mxu1 %v3671_v23  ;;  %5239 = vst [vmem:[#allocation75_spill] sm:$0xff] %v3854_v10  ;;  %v3858_v41 = vsub.f32 %v206_v0, %v3837_v32  ;;  %v471_v0 = vsub.f32 %v3826_v33, %v5241_v49  ;;  %v466_v49 = vand.u32 4294901760, %v465_v8  ;;  %v3893_v23 = vand.u32 4294901760, %v210_v51 }
  0x90   : > { %1024 = vmatpush1.msra.mxu0 %v3255_v30  ;;  %1315 = vmatpush1.msra.mxu1 %v3208_v11  ;;  %v3876_v24 = vsub.f32 %v209_v63, %v3854_v10 }
  0x91   : > { %443 = vmatmul.mubr.f32.gmra.mxu0 %v442_v57  ;;  %891 = vmatmul.mubr.f32.gmra.mxu1 %v3687_v7  ;;  %v211_v7 = vld [vmem:[%s3174_s4 + $0xa8] sm:$0xff]  ;;  %v3884_v57 = vsub.f32 %v208_v2, %v3865_v46  ;;  %v472_v63 = vand.u32 4294901760, %v471_v0  ;;  %5245 = vst [vmem:[#allocation79_spill] sm:$0xff] %v3893_v23  ;;  %v213_v2 = vld [vmem:[%s3174_s4 + $0xb8] sm:$0xff]  ;;  %v3912_v53 = vsub.f32 %v210_v51, %v3893_v23 }
  0x92   : > { %1316 = vmatprep.subr.mxu1 %v5188_v42  ;;  %1025 = vmatprep.subr.mxu0 %v5188_v42  ;;  %5242 = vst [vmem:[#allocation77_spill] sm:$0xff] %v3876_v24 }
  0x93   : > { %1318 = vmatpush1.msra.mxu1 %v3210_v12  ;;  %1028 = vmatpush1.msra.mxu0 %v3268_v34  ;;  %5248 = vst [vmem:[#allocation81_spill] sm:$0xff] %v3912_v53 }
  0x94   : > { %452 = vmatprep.mubr.f32.mxu0 %v451_v27  ;;  %896 = vmatprep.mubr.f32.mxu1 %v3711_v59  ;;  %v3886_v27 = vand.u32 4294901760, %v211_v7  ;;  %v5244_v59 = vand.u32 4294901760, %v3849_v62 }
  0x95   : > { %1029 = vmatprep.subr.mxu0 %v5188_v42  ;;  %1319 = vmatprep.subr.mxu1 %v5188_v42 }
  0x96   : > { %458 = vmatmul.mubr.f32.gmra.mxu0 %v457_v29  ;;  %898 = vmatmul.mubr.f32.gmra.mxu1 %v3725_v13  ;;  %5243 = vst [vmem:[#allocation78_spill] sm:$0xff] %v3886_v27  ;;  %v480_v33 = vsub.f32 %v3849_v62, %v5244_v59  ;;  %v5246_v29 = vand.u32 4294901760, %v3858_v41  ;;  %v5057_v59 = vand.u32 4294901760, %v3884_v57  ;;  %v3907_v13 = vsub.f32 %v211_v7, %v3886_v27  ;;  %v212_v62 = vld [vmem:[%s3174_s4 + $0xb0] sm:$0xff] }
  0x97   : > { %1032 = vmatpush1.msra.mxu0 %v3289_v43  ;;  %1321 = vmatpush1.msra.mxu1 %v3225_v17 }
  0x98   : > { %1033 = vmatprep.subr.mxu0 %v5188_v42  ;;  %1322 = vmatprep.subr.mxu1 %v5188_v42  ;;  %v486_v0 = vsub.f32 %v3858_v41, %v5246_v29  ;;  %5247 = vst [vmem:[#allocation80_spill] sm:$0xff] %v3907_v13  ;;  %v481_v8 = vand.u32 4294901760, %v480_v33  ;;  %v3923_v33 = vand.u32 4294901760, %v212_v62  ;;  %v501_v51 = vsub.f32 %v3884_v57, %v5057_v59 }
  0x99   : > { %1036 = vmatpush1.msra.mxu0 %v3296_v47  ;;  %1324 = vmatpush1.msra.mxu1 %v3244_v25  ;;  %v3914_v25 = vand.u32 4294901760, %v213_v2  ;;  %v5062_v29 = vand.u32 4294901760, %v3907_v13 }
  0x9a   : > { %467 = vmatprep.mubr.f32.mxu0 %v466_v49  ;;  %903 = vmatprep.mubr.f32.mxu1 %v3746_v55  ;;  %v5250_v49 = vand.u32 4294901760, %v3876_v24  ;;  %5251 = vst [vmem:[#allocation83_spill] sm:$0xff] %v3923_v33  ;;  %v3942_v59 = vsub.f32 %v212_v62, %v3923_v33 }
  0x9b   : > { %1325 = vmatprep.subr.mxu1 %v5188_v42  ;;  %473 = vmatmul.mubr.f32.gmra.mxu0 %v472_v63  ;;  %5249 = vst [vmem:[#allocation82_spill] sm:$0xff] %v3914_v25  ;;  %v487_v63 = vand.u32 4294901760, %v486_v0  ;;  %v3935_v0 = vsub.f32 %v213_v2, %v3914_v25  ;;  %v502_v2 = vand.u32 4294901760, %v501_v51 }
  0x9c   : > { %905 = vmatmul.mubr.f32.gmra.mxu1 %v3754_v22  ;;  %1037 = vmatprep.subr.mxu0 %v5188_v42  ;;  %v495_v7 = vsub.f32 %v3876_v24, %v5250_v49  ;;  %v215_v22 = vld [vmem:[%s3174_s4 + $0xc8] sm:$0xff]  ;;  %v214_v24 = vld [vmem:[%s3174_s4 + $0xc0] sm:$0xff]  ;;  %5253 = vst [vmem:[#allocation85_spill] sm:$0xff] %v3942_v59  ;;  %v510_v49 = vsub.f32 %v3907_v13, %v5062_v29  ;;  %v216_v13 = vld [vmem:[%s3174_s4 + $0xd0] sm:$0xff] }
  0x9d   : > { %1327 = vmatpush1.msra.mxu1 %v3251_v28  ;;  %1040 = vmatpush1.msra.mxu0 %v3314_v54  ;;  %5252 = vst [vmem:[#allocation84_spill] sm:$0xff] %v3935_v0 }
  0x9e   : > { %1041 = vmatprep.subr.mxu0 %v5188_v42  ;;  %1328 = vmatprep.subr.mxu1 %v5188_v42  ;;  %v496_v55 = vand.u32 4294901760, %v495_v7  ;;  %v5255_v7 = vand.u32 4294901760, %v3912_v53 }
  0x9f   : > { %482 = vmatprep.mubr.f32.mxu0 %v481_v8  ;;  %910 = vmatprep.mubr.f32.mxu1 %v3769_v26  ;;  %v3944_v8 = vand.u32 4294901760, %v215_v22  ;;  %v217_v26 = vld [vmem:[%s3174_s4 + $0xd8] sm:$0xff] }
  0xa0   : > { %1044 = vmatpush1.msra.mxu0 %v3329_v60  ;;  %1330 = vmatpush1.msra.mxu1 %v3271_v35  ;;  %v516_v62 = vsub.f32 %v3912_v53, %v5255_v7  ;;  %v511_v7 = vand.u32 4294901760, %v510_v49  ;;  %v3981_v49 = vand.u32 4294901760, %v216_v13 }
  0xa1   : > { %488 = vmatmul.mubr.f32.gmra.mxu0 %v487_v63  ;;  %912 = vmatmul.mubr.f32.gmra.mxu1 %v3779_v36  ;;  %5254 = vst [vmem:[#allocation86_spill] sm:$0xff] %v3944_v8  ;;  %v3957_v36 = vand.u32 4294901760, %v214_v24  ;;  %v3965_v29 = vsub.f32 %v215_v22, %v3944_v8  ;;  %v3969_v63 = vand.u32 4294901760, %v217_v26 }
  0xa2   : > { %1331 = vmatprep.subr.mxu1 %v5188_v42  ;;  %1045 = vmatprep.subr.mxu0 %v5188_v42  ;;  %5261 = vst [vmem:[#allocation91_spill] sm:$0xff] %v3981_v49 }
  0xa3   : > { %1333 = vmatpush1.msra.mxu1 %v3292_v45  ;;  %1048 = vmatpush1.msra.mxu0 %v3344_v3  ;;  %5256 = vst [vmem:[#allocation87_spill] sm:$0xff] %v3957_v36  ;;  %5257 = vst [vmem:[#allocation88_spill] sm:$0xff] %v3965_v29  ;;  %v3977_v22 = vsub.f32 %v214_v24, %v3957_v36  ;;  %v3992_v24 = vsub.f32 %v217_v26, %v3969_v63  ;;  %v5268_v26 = vld [vmem:[#allocation17_spill] sm:$0xff] }
  0xa4   : > { %497 = vmatprep.mubr.f32.mxu0 %v496_v55  ;;  %917 = vmatprep.mubr.f32.mxu1 %v3800_v1  ;;  %5258 = vst [vmem:[#allocation89_spill] sm:$0xff] %v3969_v63  ;;  %v517_v55 = vand.u32 4294901760, %v516_v62  ;;  %v5259_v1 = vand.u32 4294901760, %v3935_v0  ;;  %v5263_v62 = vand.u32 4294901760, %v3942_v59 }
  0xa5   : > { %1049 = vmatprep.subr.mxu0 %v5188_v42  ;;  %1334 = vmatprep.subr.mxu1 %v5188_v42  ;;  %5260 = vst [vmem:[#allocation90_spill] sm:$0xff] %v3977_v22  ;;  %5264 = vst [vmem:[#allocation92_spill] sm:$0xff] %v3992_v24 }
  0xa6   : > { %503 = vmatmul.mubr.f32.gmra.mxu0 %v502_v2  ;;  %919 = vmatmul.mubr.f32.gmra.mxu1 %v3807_v38  ;;  %v525_v51 = vsub.f32 %v3935_v0, %v5259_v1  ;;  %v5262_v2 = vld [vmem:[#allocation10_spill] sm:$0xff]  ;;  %v531_v38 = vsub.f32 %v3942_v59, %v5263_v62  ;;  %v4000_v62 = vsub.f32 %v216_v13, %v3981_v49  ;;  %v5267_v1 = vld [vmem:[#allocation11_spill] sm:$0xff] }
  0xa7   : > { %1052 = vmatpush1.msra.mxu0 %v3359_v19  ;;  %1336 = vmatpush1.msra.mxu1 %v3300_v48  ;;  %v219_v0 = vld [vmem:[%s3174_s4 + $0xe8] sm:$0xff]  ;;  %v221_v59 = vld [vmem:[%s3174_s4 + $0xf8] sm:$0xff]  ;;  %v222_v19 = vld [vmem:[%s3174_s4 + $0x100] sm:$0xff] }
  0xa8   : > { %1053 = vmatprep.subr.mxu0 %v5188_v42  ;;  %1337 = vmatprep.subr.mxu1 %v5188_v42  ;;  %v526_v53 = vand.u32 4294901760, %v525_v51  ;;  %5265 = vst [vmem:[#allocation93_spill] sm:$0xff] %v4000_v62  ;;  %v5269_v51 = vand.u32 4294901760, %v3965_v29 }
  0xa9   : > { %1056 = vmatpush1.msra.mxu0 %v3374_v37  ;;  %1339 = vmatpush1.msra.mxu1 %v5262_v2  ;;  %v218_v2 = vld [vmem:[%s3174_s4 + $0xe0] sm:$0xff]  ;;  %v220_v37 = vld [vmem:[%s3174_s4 + $0xf0] sm:$0xff] }
  0xaa   : > { %512 = vmatprep.mubr.f32.mxu0 %v511_v7  ;;  %924 = vmatprep.mubr.f32.mxu1 %v3828_v52  ;;  %v4002_v7 = vand.u32 4294901760, %v219_v0  ;;  %v532_v52 = vand.u32 4294901760, %v531_v38  ;;  %v4012_v13 = vand.u32 4294901760, %v218_v2 }
  0xab   : > { %1340 = vmatprep.subr.mxu1 %v5188_v42  ;;  %518 = vmatmul.mubr.f32.gmra.mxu0 %v517_v55  ;;  %v540_v55 = vsub.f32 %v3965_v29, %v5269_v51  ;;  %v5273_v51 = vld [vmem:[#allocation12_spill] sm:$0xff]  ;;  %v4035_v29 = vand.u32 4294901760, %v221_v59 }
  0xac   : > { %926 = vmatmul.mubr.f32.gmra.mxu1 %v3837_v32  ;;  %1057 = vmatprep.subr.mxu0 %v5188_v42  ;;  %5266 = vst [vmem:[#allocation94_spill] sm:$0xff] %v4002_v7  ;;  %5270 = vst [vmem:[#allocation95_spill] sm:$0xff] %v4012_v13  ;;  %v5271_v32 = vand.u32 4294901760, %v3977_v22 }
  0xad   : > { %1342 = vmatpush1.msra.mxu1 %v5267_v1  ;;  %1060 = vmatpush1.msra.mxu0 %v5268_v26  ;;  %v5272_v26 = vld [vmem:[#allocation19_spill] sm:$0xff]  ;;  %v4023_v1 = vsub.f32 %v219_v0, %v4002_v7  ;;  %5277 = vst [vmem:[#allocation98_spill] sm:$0xff] %v4035_v29  ;;  %v5278_v0 = vld [vmem:[#allocation21_spill] sm:$0xff]  ;;  %v4053_v48 = vsub.f32 %v221_v59, %v4035_v29 }
  0xae   : > { %1061 = vmatprep.subr.mxu0 %v5188_v42  ;;  %1343 = vmatprep.subr.mxu1 %v5188_v42  ;;  %v546_v38 = vsub.f32 %v3977_v22, %v5271_v32  ;;  %v5275_v32 = vand.u32 4294901760, %v3992_v24  ;;  %v4033_v22 = vsub.f32 %v218_v2, %v4012_v13  ;;  %v4045_v2 = vand.u32 4294901760, %v220_v37  ;;  %v5287_v59 = vld [vmem:[#allocation25_spill] sm:$0xff] }
  0xaf   : > { %527 = vmatprep.mubr.f32.mxu0 %v526_v53  ;;  %931 = vmatprep.mubr.f32.mxu1 %v3854_v10  ;;  %5274 = vst [vmem:[#allocation96_spill] sm:$0xff] %v4023_v1  ;;  %v541_v53 = vand.u32 4294901760, %v540_v55 }
  0xb0   : > { %1064 = vmatpush1.msra.mxu0 %v5272_v26  ;;  %1345 = vmatpush1.msra.mxu1 %v5273_v51  ;;  %v555_v10 = vsub.f32 %v3992_v24, %v5275_v32  ;;  %5276 = vst [vmem:[#allocation97_spill] sm:$0xff] %v4033_v22  ;;  %v547_v55 = vand.u32 4294901760, %v546_v38  ;;  %v5098_v32 = vand.u32 4294901760, %v4023_v1  ;;  %5281 = vst [vmem:[#allocation99_spill] sm:$0xff] %v4045_v2  ;;  %v223_v24 = vld [vmem:[%s3174_s4 + $0x108] sm:$0xff] }
  0xb1   : > { %533 = vmatmul.mubr.f32.gmra.mxu0 %v532_v52  ;;  %933 = vmatmul.mubr.f32.gmra.mxu1 %v3865_v46  ;;  %v5279_v52 = vld [vmem:[#allocation14_spill] sm:$0xff]  ;;  %v5280_v46 = vand.u32 4294901760, %v4000_v62  ;;  %v4065_v26 = vsub.f32 %v220_v37, %v4045_v2 }
  0xb2   : > { %1065 = vmatprep.subr.mxu0 %v5188_v42  ;;  %1346 = vmatprep.subr.mxu1 %v5188_v42  ;;  %v556_v38 = vand.u32 4294901760, %v555_v10  ;;  %v570_v10 = vsub.f32 %v4023_v1, %v5098_v32  ;;  %v225_v32 = vld [vmem:[%s3174_s4 + $0x118] sm:$0xff] }
  0xb3   : > { %1068 = vmatpush2.msra.mxu0 %v5278_v0  ;;  %1348 = vmatpush1.msra.mxu1 %v5279_v52  ;;  %v561_v51 = vsub.f32 %v4000_v62, %v5280_v46  ;;  %v5282_v0 = vld [vmem:[#allocation23_spill] sm:$0xff]  ;;  %v5283_v52 = vld [vmem:[#allocation16_spill] sm:$0xff]  ;;  %v4057_v46 = vand.u32 4294901760, %v223_v24  ;;  %5286 = vst [vmem:[#allocation100_spill] sm:$0xff] %v4065_v26  ;;  %v5291_v37 = vld [vmem:[#allocation26_spill] sm:$0xff]  ;;  %v4090_v62 = vand.u32 4294901760, %v225_v32 }
  0xb4   : > { %1069 = vmatprep.subr.mxu0 %v5188_v42  ;;  %1349 = vmatprep.subr.mxu1 %v5188_v42  ;;  %5284 = vst [vmem:[#allocation23_spill] sm:$0xff] %v4053_v48 }
  0xb5   : > { %542 = vmatprep.mubr.f32.mxu0 %v541_v53  ;;  %938 = vmatprep.mubr.f32.mxu1 %v3886_v27  ;;  %5285 = vst [vmem:[#allocation16_spill] sm:$0xff] %v4057_v46  ;;  %v562_v53 = vand.u32 4294901760, %v561_v51  ;;  %v5290_v27 = vand.u32 4294901760, %v4033_v22  ;;  %v4080_v1 = vsub.f32 %v223_v24, %v4057_v46  ;;  %5293 = vst [vmem:[#allocation103_spill] sm:$0xff] %v4090_v62  ;;  %v5295_v24 = vld [vmem:[#allocation29_spill] sm:$0xff] }
  0xb6   : > { %1072 = vmatpush2.msra.mxu0 %v5282_v0  ;;  %1351 = vmatpush2.msra.mxu1 %v5283_v52 }
  0xb7   : > { %548 = vmatmul.mubr.f32.gmra.mxu0 %v547_v55  ;;  %940 = vmatmul.mubr.f32.gmra.mxu1 %v3893_v23  ;;  %v5288_v55 = vld [vmem:[#allocation18_spill] sm:$0xff]  ;;  %v4069_v23 = vand.u32 4294901760, %v222_v19  ;;  %v576_v51 = vsub.f32 %v4033_v22, %v5290_v27  ;;  %5292 = vst [vmem:[#allocation102_spill] sm:$0xff] %v4080_v1 }
  0xb8   : > { %1073 = vmatprep.subr.mxu0 %v5188_v42  ;;  %1352 = vmatprep.subr.mxu1 %v5188_v42 }
  0xb9   : > { %1076 = vmatpush2.msra.mxu0 %v5287_v59  ;;  %1354 = vmatpush2.msra.mxu1 %v5288_v55  ;;  %5289 = vst [vmem:[#allocation101_spill] sm:$0xff] %v4069_v23  ;;  %v571_v55 = vand.u32 4294901760, %v570_v10  ;;  %v224_v59 = vld [vmem:[%s3174_s4 + $0x110] sm:$0xff]  ;;  %v4088_v27 = vsub.f32 %v222_v19, %v4069_v23  ;;  %v577_v22 = vand.u32 4294901760, %v576_v51 }
  0xba   : > { %1077 = vmatprep.subr.mxu0 %v5188_v42  ;;  %557 = vmatprep.mubr.f32.mxu0 %v556_v38  ;;  %v4100_v19 = vand.u32 4294901760, %v224_v59  ;;  %v226_v38 = vld [vmem:[%s3174_s4 + $0x120] sm:$0xff] }
  0xbb   : > { %945 = vmatprep.mubr.f32.mxu1 %v3914_v25  ;;  %1080 = vmatpush2.msra.mxu0 %v5291_v37  ;;  %v5294_v25 = vld [vmem:[#allocation20_spill] sm:$0xff]  ;;  %v4111_v37 = vsub.f32 %v225_v32, %v4090_v62 }
  0xbc   : > { %1355 = vmatprep.subr.mxu1 %v5188_v42  ;;  %563 = vmatmul.mubr.f32.gmra.mxu0 %v562_v53  ;;  %v5296_v53 = vand.u32 4294901760, %v4053_v48  ;;  %5297 = vst [vmem:[#allocation104_spill] sm:$0xff] %v4100_v19  ;;  %v5304_v32 = vld [vmem:[#allocation32_spill] sm:$0xff] }
  0xbd   : > { %947 = vmatmul.mubr.f32.gmra.mxu1 %v3923_v33  ;;  %1081 = vmatprep.subr.mxu0 %v5188_v42  ;;  %v5298_v33 = vand.u32 4294901760, %v4065_v26  ;;  %5301 = vst [vmem:[#allocation105_spill] sm:$0xff] %v4111_v37 }
  0xbe   : > { %1357 = vmatpush2.msra.mxu1 %v5294_v25  ;;  %1084 = vmatpush2.msra.mxu0 %v5295_v24  ;;  %v585_v10 = vsub.f32 %v4053_v48, %v5296_v53  ;;  %v227_v24 = vld [vmem:[%s3174_s4 + $0x128] sm:$0xff]  ;;  %v5299_v25 = vld [vmem:[#allocation31_spill] sm:$0xff] }
  0xbf   : > { %1085 = vmatprep.subr.mxu0 %v5188_v42  ;;  %1358 = vmatprep.subr.mxu1 %v5188_v42  ;;  %v591_v51 = vsub.f32 %v4065_v26, %v5298_v33  ;;  %v5300_v53 = vld [vmem:[#allocation22_spill] sm:$0xff]  ;;  %v5302_v33 = vand.u32 4294901760, %v4080_v1  ;;  %v4121_v26 = vsub.f32 %v224_v59, %v4100_v19  ;;  %v4123_v48 = vand.u32 4294901760, %v227_v24  ;;  %v5308_v59 = vld [vmem:[#allocation35_spill] sm:$0xff] }
  0xc0   : > { %572 = vmatprep.mubr.f32.mxu0 %v571_v55  ;;  %952 = vmatprep.mubr.f32.mxu1 %v3944_v8  ;;  %v586_v55 = vand.u32 4294901760, %v585_v10  ;;  %v5306_v10 = vand.u32 4294901760, %v4088_v27 }
  0xc1   : > { %1088 = vmatpush2.msra.mxu0 %v5299_v25  ;;  %1360 = vmatpush2.msra.mxu1 %v5300_v53  ;;  %v600_v8 = vsub.f32 %v4080_v1, %v5302_v33  ;;  %5303 = vst [vmem:[#allocation106_spill] sm:$0xff] %v4123_v48  ;;  %v5121_v33 = vand.u32 4294901760, %v4111_v37  ;;  %v4133_v1 = vand.u32 4294901760, %v226_v38  ;;  %v4140_v25 = vsub.f32 %v227_v24, %v4123_v48 }
  0xc2   : > { %578 = vmatmul.mubr.f32.gmra.mxu0 %v577_v22  ;;  %954 = vmatmul.mubr.f32.gmra.mxu1 %v3957_v36  ;;  %v5305_v22 = vld [vmem:[#allocation24_spill] sm:$0xff]  ;;  %v592_v36 = vand.u32 4294901760, %v591_v51  ;;  %v606_v53 = vsub.f32 %v4088_v27, %v5306_v10 }
  0xc3   : > { %1089 = vmatprep.subr.mxu0 %v5188_v42  ;;  %1361 = vmatprep.subr.mxu1 %v5188_v42  ;;  %5307 = vst [vmem:[#allocation107_spill] sm:$0xff] %v4133_v1  ;;  %v601_v51 = vand.u32 4294901760, %v600_v8  ;;  %v615_v10 = vsub.f32 %v4111_v37, %v5121_v33  ;;  %v5310_v8 = vld [vmem:[#allocation37_spill] sm:$0xff]  ;;  %v5315_v37 = vld [vmem:[#allocation42_spill] sm:$0xff] }
  0xc4   : > { %1092 = vmatpush2.msra.mxu0 %v5304_v32  ;;  %1363 = vmatpush2.msra.mxu1 %v5305_v22  ;;  %v5309_v32 = vld [vmem:[#allocation27_spill] sm:$0xff]  ;;  %v5311_v22 = vld [vmem:[#allocation28_spill] sm:$0xff] }
  0xc5   : > { %1093 = vmatprep.subr.mxu0 %v5188_v42  ;;  %1364 = vmatprep.subr.mxu1 %v5188_v42 }
  0xc6   : > { %587 = vmatprep.mubr.f32.mxu0 %v586_v55  ;;  %959 = vmatprep.mubr.f32.mxu1 %v3969_v63  ;;  %v607_v55 = vand.u32 4294901760, %v606_v53  ;;  %v4149_v63 = vsub.f32 %v226_v38, %v4133_v1  ;;  %v5128_v53 = vand.u32 4294901760, %v4140_v25  ;;  %v616_v38 = vand.u32 4294901760, %v615_v10 }
  0xc7   : > { %1096 = vmatpush2.msra.mxu0 %v5308_v59  ;;  %1366 = vmatpush2.msra.mxu1 %v5309_v32 }
  0xc8   : > { %593 = vmatmul.mubr.f32.gmra.mxu0 %v592_v36  ;;  %961 = vmatmul.mubr.f32.gmra.mxu1 %v3981_v49  ;;  %v5312_v36 = vand.u32 4294901760, %v4121_v26  ;;  %v5313_v49 = vld [vmem:[#allocation39_spill] sm:$0xff]  ;;  %v5129_v33 = vand.u32 4294901760, %v4149_v63 }
  0xc9   : > { %1097 = vmatprep.subr.mxu0 %v5188_v42  ;;  %1367 = vmatprep.subr.mxu1 %v5188_v42 }
  0xca   : > { %1100 = vmatpush2.msra.mxu0 %v5310_v8  ;;  %1369 = vmatpush2.msra.mxu1 %v5311_v22  ;;  %v621_v24 = vsub.f32 %v4121_v26, %v5312_v36  ;;  %v636_v10 = vsub.f32 %v4149_v63, %v5129_v33  ;;  %v5324_v33 = vld [vmem:[#allocation44_spill] sm:$0xff] }
  0xcb   : > { %1101 = vmatprep.subr.mxu0 %v5188_v42  ;;  %602 = vmatprep.mubr.f32.mxu0 %v601_v51  ;;  %v5314_v51 = vld [vmem:[#allocation30_spill] sm:$0xff] }
  0xcc   : > { %966 = vmatprep.mubr.f32.mxu1 %v4002_v7  ;;  %1104 = vmatpush2.msra.mxu0 %v5313_v49  ;;  %v622_v36 = vand.u32 4294901760, %v621_v24  ;;  %v630_v7 = vsub.f32 %v4140_v25, %v5128_v53  ;;  %v5318_v53 = vld [vmem:[#allocation34_spill] sm:$0xff] }
  0xcd   : > { %1370 = vmatprep.subr.mxu1 %v5188_v42  ;;  %608 = vmatmul.mubr.f32.gmra.mxu0 %v607_v55  ;;  %v5316_v55 = vld [vmem:[#allocation33_spill] sm:$0xff] }
  0xce   : > { %968 = vmatmul.mubr.f32.gmra.mxu1 %v4012_v13  ;;  %1105 = vmatprep.subr.mxu0 %v5188_v42  ;;  %v5317_v13 = vld [vmem:[#allocation46_spill] sm:$0xff]  ;;  %v631_v24 = vand.u32 4294901760, %v630_v7  ;;  %v5320_v7 = vld [vmem:[#allocation56_spill] sm:$0xff] }
  0xcf   : > { %1372 = vmatpush2.msra.mxu1 %v5314_v51  ;;  %1108 = vmatpush2.msra.mxu0 %v5315_v37 }
  0xd0   : > { %1373 = vmatprep.subr.mxu1 %v5188_v42  ;;  %1109 = vmatprep.subr.mxu0 %v5188_v42 }
  0xd1   : > { %1375 = vmatpush2.msra.mxu1 %v5316_v55  ;;  %617 = vmatprep.mubr.f32.mxu0 %v616_v38  ;;  %v637_v38 = vand.u32 4294901760, %v636_v10  ;;  %v5321_v10 = vld [vmem:[#allocation38_spill] sm:$0xff] }
  0xd2   : > { %973 = vmatprep.mubr.f32.mxu1 %v4035_v29  ;;  %1112 = vmatpush2.msra.mxu0 %v5317_v13  ;;  %v5331_v29 = vand.u32 4294901760, %v3220_v15 }
  0xd3   : > { %623 = vmatmul.mubr.f32.gmra.mxu0 %v622_v36  ;;  %975 = vmatmul.mubr.f32.gmra.mxu1 %v4045_v2  ;;  %v5319_v36 = vld [vmem:[#allocation36_spill] sm:$0xff] }
  0xd4   : > { %1113 = vmatprep.subr.mxu0 %v5188_v42  ;;  %1376 = vmatprep.subr.mxu1 %v5188_v42  ;;  %v5328_v2 = vld [vmem:[#allocation52_spill] sm:$0xff] }
  0xd5   : > { %1116 = vmatpush2.msra.mxu0 %v3627_v56  ;;  %1378 = vmatpush2.msra.mxu1 %v5318_v53 }
  0xd6   : > { %1117 = vmatprep.subr.mxu0 %v5188_v42  ;;  %1379 = vmatprep.subr.mxu1 %v5188_v42 }
  0xd7   : > { %632 = vmatprep.mubr.f32.mxu0 %v631_v24  ;;  %980 = vmatprep.mubr.f32.mxu1 %v4057_v46  ;;  %v5322_v24 = vld [vmem:[#allocation47_spill] sm:$0xff]  ;;  %v5326_v46 = vld [vmem:[#allocation50_spill] sm:$0xff] }
  0xd8   : > { %1120 = vmatpush2.msra.mxu0 %v3633_v61  ;;  %1381 = vmatpush2.msra.mxu1 %v5319_v36 }
  0xd9   : > { %638 = vmatmul.mubr.f32.gmra.mxu0 %v637_v38  ;;  %982 = vmatmul.mubr.f32.gmra.mxu1 %v4069_v23  ;;  %v5323_v38 = vld [vmem:[#allocation48_spill] sm:$0xff]  ;;  %v5325_v23 = vld [vmem:[#allocation45_spill] sm:$0xff] }
  0xda   : > { %1121 = vmatprep.subr.mxu0 %v5188_v42  ;;  %1382 = vmatprep.subr.mxu1 %v5188_v42 }
  0xdb   : > { %1124 = vmatpush2.msra.mxu0 %v5320_v7  ;;  %1384 = vmatpush2.msra.mxu1 %v5321_v10 }
  0xdc   : > { %1125 = vmatprep.subr.mxu0 %v5188_v42  ;;  %987 = vmatprep.mubr.f32.mxu1 %v4090_v62  ;;  %v5327_v62 = vld [vmem:[#allocation53_spill] sm:$0xff] }
  0xdd   : > { %1128 = vmatpush2.msra.mxu0 %v3677_v44  ;;  %1131 = vmatprep.mubr.f32.mxu0 %v5322_v24  ;;  %v5335_v15 = vand.u32 4294901760, %v5327_v62 }
  0xde   : > { %1385 = vmatprep.subr.mxu1 %v5188_v42  ;;  %989 = vmatmul.mubr.f32.gmra.mxu1 %v4100_v19  ;;  %v5329_v19 = vld [vmem:[#allocation55_spill] sm:$0xff] }
  0xdf   : > { %1134 = vmatmul.mubr.f32.vlgmr.msra.gmra.mxu0 %v5323_v38  ;;  %1387 = vmatpush2.msra.mxu1 %v5324_v33 }
  0xe0   : > { %1388 = vmatprep.subr.mxu1 %v5188_v42  ;;  %994 = vmatprep.mubr.f32.mxu1 %v4123_v48  ;;  %v5330_v48 = vand.u32 4294901760, %v5322_v24  ;;  %v5361_v24 = vand.u32 4294901760, %v3329_v60 }
  0xe1   : > { %1390 = vmatpush2.msra.mxu1 %v5325_v23  ;;  %1140 = vmatprep.mubr.f32.mxu0 %v5326_v46 }
  0xe2   : > { %996 = vmatmul.mubr.f32.gmra.mxu1 %v4133_v1  ;;  %1391 = vmatprep.subr.mxu1 %v5188_v42  ;;  %v5332_v1 = vand.u32 4294901760, %v5323_v38  ;;  %v5364_v38 = vld [vmem:[#allocation77_spill] sm:$0xff] }
  0xe3   : > { %1143 = vmatmul.mubr.f32.gmra.mxu0 %v5327_v62  ;;  %1393 = vmatpush2.msra.mxu1 %v5328_v2  ;;  %v5333_v2 = vand.u32 4294901760, %v3223_v16  ;;  %v5338_v16 = vand.u32 4294901760, %v3235_v20  ;;  %v5342_v20 = vld [vmem:[#allocation63_spill] sm:$0xff]  ;;  %v5345_v62 = vld [vmem:[#allocation65_spill] sm:$0xff] }
  0xe4   : > { %1394 = vmatprep.subr.mxu1 %v5188_v42  ;;  %1607 = vmatprep.subr.mxu0 %v5188_v42 }
  0xe5   : > { %1149 = vmatprep.mubr.f32.mxu0 %v5329_v19  ;;  %1396 = vmatpush2.msra.mxu1 %v3637_v58 }
  0xe6   : > { %1400 = vmatprep.mubr.f32.mxu1 %v5330_v48  ;;  %1611 = vmatpush1.msra.mxu0 %v5331_v29  ;;  %v5334_v48 = vand.u32 4294901760, %v5326_v46  ;;  %v5336_v29 = vand.u32 4294901760, %v3228_v18  ;;  %v5339_v18 = vand.u32 4294901760, %v3680_v9  ;;  %v5355_v46 = vand.u32 4294901760, %v5342_v20 }
  0xe7   : > { %1152 = vmatmul.mubr.f32.gmra.mxu0 %v3680_v9  ;;  %1404 = vmatmul.mubr.f32.vlgmr.msra.gmra.mxu1 %v5332_v1  ;;  %v5343_v1 = vand.u32 4294901760, %v3701_v50  ;;  %v5344_v9 = vand.u32 4294901760, %v3255_v30  ;;  %v5349_v30 = vand.u32 4294901760, %v3737_v40 }
  0xe8   : > { %1901 = vmatprep.subr.mxu1 %v5188_v42  ;;  %1612 = vmatprep.subr.mxu0 %v5188_v42 }
  0xe9   : > { %1903 = vmatpush1.msra.mxu1 %v3191_v4  ;;  %1616 = vmatpush1.msra.mxu0 %v5333_v2  ;;  %v5337_v4 = vand.u32 4294901760, %v5329_v19  ;;  %v5347_v2 = vand.u32 4294901760, %v3268_v34  ;;  %v5353_v34 = vld [vmem:[#allocation8_spill] sm:$0xff] }
  0xea   : > { %1158 = vmatprep.mubr.f32.mxu0 %v3701_v50  ;;  %1411 = vmatprep.mubr.f32.mxu1 %v5334_v48  ;;  %v5348_v50 = vld [vmem:[#allocation67_spill] sm:$0xff] }
  0xeb   : > { %1617 = vmatprep.subr.mxu0 %v5188_v42  ;;  %1904 = vmatprep.subr.mxu1 %v5188_v42  ;;  %v5360_v19 = vand.u32 4294901760, %v5348_v50 }
  0xec   : > { %1161 = vmatmul.mubr.f32.gmra.mxu0 %v3718_v31  ;;  %1415 = vmatmul.mubr.f32.gmra.mxu1 %v5335_v15 }
  0xed   : > { %1621 = vmatpush1.msra.mxu0 %v5336_v29  ;;  %1906 = vmatpush1.msra.mxu1 %v3193_v5  ;;  %v5340_v5 = vand.u32 4294901760, %v3238_v21  ;;  %v5346_v21 = vand.u32 4294901760, %v3718_v31  ;;  %v5351_v31 = vand.u32 4294901760, %v3289_v43  ;;  %v5356_v43 = vld [vmem:[#allocation71_spill] sm:$0xff]  ;;  %v5372_v29 = vld [vmem:[#allocation10_spill] sm:$0xff] }
  0xee   : > { %1907 = vmatprep.subr.mxu1 %v5188_v42  ;;  %1622 = vmatprep.subr.mxu0 %v5188_v42 }
  0xef   : > { %1909 = vmatpush1.msra.mxu1 %v3195_v6  ;;  %1167 = vmatprep.mubr.f32.mxu0 %v3737_v40  ;;  %v5341_v6 = vld [vmem:[#allocation7_spill] sm:$0xff]  ;;  %v5354_v40 = vld [vmem:[#allocation70_spill] sm:$0xff] }
  0xf0   : > { %1422 = vmatprep.mubr.f32.mxu1 %v5337_v4  ;;  %1626 = vmatpush1.msra.mxu0 %v5338_v16  ;;  %v5365_v60 = vand.u32 4294901760, %v5354_v40  ;;  %v5373_v4 = vld [vmem:[#allocation80_spill] sm:$0xff] }
  0xf1   : > { %1170 = vmatmul.mubr.f32.gmra.mxu0 %v3744_v39  ;;  %1426 = vmatmul.mubr.f32.gmra.mxu1 %v5339_v18  ;;  %v5375_v18 = vld [vmem:[#allocation81_spill] sm:$0xff] }
  0xf2   : > { %1627 = vmatprep.subr.mxu0 %v5188_v42  ;;  %1910 = vmatprep.subr.mxu1 %v5188_v42 }
  0xf3   : > { %1631 = vmatpush1.msra.mxu0 %v5340_v5  ;;  %1912 = vmatpush1.msra.mxu1 %v5341_v6  ;;  %v5376_v5 = vand.u32 4294901760, %v3858_v41  ;;  %v5377_v6 = vld [vmem:[#allocation11_spill] sm:$0xff] }
  0xf4   : > { %1632 = vmatprep.subr.mxu0 %v5188_v42  ;;  %1913 = vmatprep.subr.mxu1 %v5188_v42 }
  0xf5   : > { %1176 = vmatprep.mubr.f32.mxu0 %v5342_v20  ;;  %1433 = vmatprep.mubr.f32.mxu1 %v5343_v1  ;;  %v5378_v20 = vld [vmem:[#allocation17_spill] sm:$0xff] }
  0xf6   : > { %1636 = vmatpush1.msra.mxu0 %v5344_v9  ;;  %1915 = vmatpush1.msra.mxu1 %v3208_v11  ;;  %v5350_v11 = vand.u32 4294901760, %v3744_v39  ;;  %v5359_v39 = vld [vmem:[#allocation74_spill] sm:$0xff]  ;;  %v5379_v1 = vand.u32 4294901760, %v5378_v20  ;;  %v5380_v9 = vld [vmem:[#allocation84_spill] sm:$0xff] }
  0xf7   : > { %1179 = vmatmul.mubr.f32.gmra.mxu0 %v5345_v62  ;;  %1437 = vmatmul.mubr.f32.gmra.mxu1 %v5346_v21  ;;  %v5374_v16 = vand.u32 4294901760, %v5359_v39  ;;  %v5382_v21 = vld [vmem:[#allocation19_spill] sm:$0xff] }
  0xf8   : > { %1916 = vmatprep.subr.mxu1 %v5188_v42  ;;  %1637 = vmatprep.subr.mxu0 %v5188_v42 }
  0xf9   : > { %1918 = vmatpush1.msra.mxu1 %v3210_v12  ;;  %1641 = vmatpush1.msra.mxu0 %v5347_v2  ;;  %v5352_v12 = vand.u32 4294901760, %v3296_v47  ;;  %v5358_v47 = vand.u32 4294901760, %v3314_v54  ;;  %v5363_v54 = vand.u32 4294901760, %v3344_v3  ;;  %v5370_v3 = vld [vmem:[#allocation15_spill] sm:$0xff]  ;;  %v5383_v2 = vand.u32 4294901760, %v5382_v21 }
  0xfa   : > { %1185 = vmatprep.mubr.f32.mxu0 %v5348_v50  ;;  %1444 = vmatprep.mubr.f32.mxu1 %v5349_v30  ;;  %v5371_v15 = vand.u32 4294901760, %v5370_v3  ;;  %v5385_v50 = vld [vmem:[#allocation85_spill] sm:$0xff]  ;;  %v5386_v30 = vand.u32 4294901760, %v3884_v57  ;;  %v5422_v21 = vand.u32 4294901760, %v5310_v8 }
  0xfb   : > { %1642 = vmatprep.subr.mxu0 %v5188_v42  ;;  %1919 = vmatprep.subr.mxu1 %v5188_v42 }
  0xfc   : > { %1188 = vmatmul.mubr.f32.gmra.mxu0 %v3798_v14  ;;  %1448 = vmatmul.mubr.f32.gmra.mxu1 %v5350_v11  ;;  %v5387_v11 = vld [vmem:[#allocation21_spill] sm:$0xff] }
  0xfd   : > { %1646 = vmatpush1.msra.mxu0 %v5351_v31  ;;  %1921 = vmatpush1.msra.mxu1 %v3225_v17  ;;  %v5357_v17 = vand.u32 4294901760, %v5345_v62  ;;  %v5381_v62 = vand.u32 4294901760, %v5364_v38  ;;  %v5388_v31 = vand.u32 4294901760, %v5387_v11 }
  0xfe   : > { %1647 = vmatprep.subr.mxu0 %v5188_v42  ;;  %1922 = vmatprep.subr.mxu1 %v5188_v42 }
  0xff   : > { %1651 = vmatpush1.msra.mxu0 %v5352_v12  ;;  %1924 = vmatpush1.msra.mxu1 %v5353_v34  ;;  %v5389_v12 = vld [vmem:[#allocation14_spill] sm:$0xff]  ;;  %v5390_v34 = vld [vmem:[#allocation88_spill] sm:$0xff] }
 0x100   : > { %1194 = vmatprep.mubr.f32.mxu0 %v5354_v40  ;;  %1455 = vmatprep.mubr.f32.mxu1 %v5355_v46  ;;  %v5391_v40 = vand.u32 4294901760, %v5373_v4  ;;  %v5393_v46 = vld [vmem:[#allocation90_spill] sm:$0xff] }
 0x101   : > { %1925 = vmatprep.subr.mxu1 %v5188_v42  ;;  %1197 = vmatmul.mubr.f32.gmra.mxu0 %v5356_v43 }
 0x102   : > { %1459 = vmatmul.mubr.f32.gmra.mxu1 %v5357_v17  ;;  %1652 = vmatprep.subr.mxu0 %v5188_v42  ;;  %v5395_v17 = vld [vmem:[#allocation25_spill] sm:$0xff] }
 0x103   : > { %1927 = vmatpush1.msra.mxu1 %v3251_v28  ;;  %1656 = vmatpush1.msra.mxu0 %v5358_v47  ;;  %v5362_v28 = vand.u32 4294901760, %v3798_v14  ;;  %v5367_v14 = vld [vmem:[#allocation13_spill] sm:$0xff]  ;;  %v5396_v47 = vand.u32 4294901760, %v5395_v17 }
 0x104   : > { %1657 = vmatprep.subr.mxu0 %v5188_v42  ;;  %1928 = vmatprep.subr.mxu1 %v5188_v42  ;;  %v5368_v48 = vand.u32 4294901760, %v5367_v14  ;;  %v5407_v14 = vld [vmem:[#allocation96_spill] sm:$0xff] }
 0x105   : > { %1203 = vmatprep.mubr.f32.mxu0 %v5359_v39  ;;  %1466 = vmatprep.mubr.f32.mxu1 %v5360_v19  ;;  %v5397_v39 = vld [vmem:[#allocation18_spill] sm:$0xff] }
 0x106   : > { %1661 = vmatpush1.msra.mxu0 %v5361_v24  ;;  %1930 = vmatpush1.msra.mxu1 %v3271_v35  ;;  %v5366_v35 = vand.u32 4294901760, %v5356_v43  ;;  %v5394_v43 = vand.u32 4294901760, %v5375_v18  ;;  %v5400_v19 = vld [vmem:[#allocation26_spill] sm:$0xff] }
 0x107   : > { %1206 = vmatmul.mubr.f32.gmra.mxu0 %v3858_v41  ;;  %1470 = vmatmul.mubr.f32.gmra.mxu1 %v5362_v28  ;;  %v5384_v41 = vld [vmem:[#allocation12_spill] sm:$0xff]  ;;  %v5401_v24 = vand.u32 4294901760, %v5400_v19  ;;  %v5402_v28 = vld [vmem:[#allocation93_spill] sm:$0xff]  ;;  %v5443_v19 = vld [vmem:[#allocation43_spill] sm:$0xff] }
 0x108   : > { %1931 = vmatprep.subr.mxu1 %v5188_v42  ;;  %1662 = vmatprep.subr.mxu0 %v5188_v42 }
 0x109   : > { %1933 = vmatpush1.msra.mxu1 %v3292_v45  ;;  %1666 = vmatpush1.msra.mxu0 %v5363_v54  ;;  %v5369_v45 = vld [vmem:[#allocation9_spill] sm:$0xff]  ;;  %v5403_v54 = vand.u32 4294901760, %v5385_v50 }
 0x10a   : > { %1212 = vmatprep.mubr.f32.mxu0 %v5364_v38  ;;  %1477 = vmatprep.mubr.f32.mxu1 %v5365_v60  ;;  %v5404_v38 = vld [vmem:[#allocation20_spill] sm:$0xff]  ;;  %v5405_v60 = vld [vmem:[#allocation29_spill] sm:$0xff] }
 0x10b   : > { %1667 = vmatprep.subr.mxu0 %v5188_v42  ;;  %1934 = vmatprep.subr.mxu1 %v5188_v42 }
 0x10c   : > { %1215 = vmatmul.mubr.f32.gmra.mxu0 %v3884_v57  ;;  %1481 = vmatmul.mubr.f32.gmra.mxu1 %v5366_v35  ;;  %v5392_v57 = vand.u32 4294901760, %v5282_v0  ;;  %v5398_v0 = vld [vmem:[#allocation92_spill] sm:$0xff]  ;;  %v5406_v35 = vand.u32 4294901760, %v5405_v60 }
 0x10d   : > { %1671 = vmatpush1.msra.mxu0 %v5368_v48  ;;  %1936 = vmatpush1.msra.mxu1 %v5369_v45  ;;  %v5408_v48 = vand.u32 4294901760, %v5390_v34  ;;  %v5409_v45 = vld [vmem:[#allocation31_spill] sm:$0xff]  ;;  %v5418_v20 = vand.u32 4294901760, %v5398_v0 }
 0x10e   : > { %1672 = vmatprep.subr.mxu0 %v5188_v42  ;;  %1937 = vmatprep.subr.mxu1 %v5188_v42  ;;  %v5410_v3 = vand.u32 4294901760, %v5409_v45 }
 0x10f   : > { %1676 = vmatpush1.msra.mxu0 %v5371_v15  ;;  %1939 = vmatpush1.msra.mxu1 %v5372_v29  ;;  %v5411_v15 = vld [vmem:[#allocation22_spill] sm:$0xff]  ;;  %v5412_v29 = vld [vmem:[#allocation97_spill] sm:$0xff] }
 0x110   : > { %1221 = vmatprep.mubr.f32.mxu0 %v5373_v4  ;;  %1488 = vmatprep.mubr.f32.mxu1 %v5374_v16  ;;  %v5413_v4 = vand.u32 4294901760, %v5393_v46  ;;  %v5414_v16 = vld [vmem:[#allocation32_spill] sm:$0xff] }
 0x111   : > { %1940 = vmatprep.subr.mxu1 %v5188_v42  ;;  %1224 = vmatmul.mubr.f32.gmra.mxu0 %v5375_v18  ;;  %v5415_v18 = vand.u32 4294901760, %v5414_v16 }
 0x112   : > { %1492 = vmatmul.mubr.f32.gmra.mxu1 %v5376_v5  ;;  %1677 = vmatprep.subr.mxu0 %v5188_v42  ;;  %v5416_v5 = vld [vmem:[#allocation24_spill] sm:$0xff] }
 0x113   : > { %1942 = vmatpush1.msra.mxu1 %v5377_v6  ;;  %1681 = vmatpush1.msra.mxu0 %v5379_v1  ;;  %v5417_v6 = vld [vmem:[#allocation23_spill] sm:$0xff]  ;;  %v5419_v1 = vand.u32 4294901760, %v5308_v59  ;;  %v5423_v59 = vld [vmem:[#allocation102_spill] sm:$0xff] }
 0x114   : > { %1682 = vmatprep.subr.mxu0 %v5188_v42  ;;  %1943 = vmatprep.subr.mxu1 %v5188_v42  ;;  %v5429_v8 = vand.u32 4294901760, %v5417_v6  ;;  %v5433_v11 = vand.u32 4294901760, %v5423_v59 }
 0x115   : > { %1230 = vmatprep.mubr.f32.mxu0 %v5380_v9  ;;  %1499 = vmatprep.mubr.f32.mxu1 %v5381_v62  ;;  %v5421_v62 = vand.u32 4294901760, %v5402_v28 }
 0x116   : > { %1686 = vmatpush1.msra.mxu0 %v5383_v2  ;;  %1945 = vmatpush1.msra.mxu1 %v5384_v41  ;;  %v5425_v2 = vand.u32 4294901760, %v5313_v49  ;;  %v5426_v41 = vand.u32 4294901760, %v5412_v29  ;;  %v5428_v49 = vld [vmem:[#allocation105_spill] sm:$0xff] }
 0x117   : > { %1233 = vmatmul.mubr.f32.gmra.mxu0 %v5385_v50  ;;  %1503 = vmatmul.mubr.f32.gmra.mxu1 %v5386_v30  ;;  %v5430_v50 = vand.u32 4294901760, %v5317_v13  ;;  %v4447_v13 = vstv %s189_s6 }
 0x118   : > { %1687 = vmatprep.subr.mxu0 %v5188_v42  ;;  %1946 = vmatprep.subr.mxu1 %v5188_v42 }
 0x119   : > { %1691 = vmatpush2.msra.mxu0 %v5388_v31  ;;  %1948 = vmatpush1.msra.mxu1 %v5389_v12  ;;  %v5434_v12 = vand.u32 4294901760, %v3633_v61 }
 0x11a   : > { %1692 = vmatprep.subr.mxu0 %v5188_v42  ;;  %1949 = vmatprep.subr.mxu1 %v5188_v42 }
 0x11b   : > { %1239 = vmatprep.mubr.f32.mxu0 %v5390_v34  ;;  %1510 = vmatprep.mubr.f32.mxu1 %v5391_v40  ;;  %v5436_v40 = vand.u32 4294901760, %v5320_v7 }
 0x11c   : > { %1696 = vmatpush2.msra.mxu0 %v5392_v57  ;;  %1951 = vmatpush2.msra.mxu1 %v5283_v52  ;;  %v5399_v52 = vand.u32 4294901760, %v5380_v9  ;;  %v5420_v9 = vld [vmem:[#allocation100_spill] sm:$0xff]  ;;  %v5438_v57 = vand.u32 4294901760, %v3677_v44  ;;  %v5442_v44 = vand.u32 4294901760, %v4140_v25 }
 0x11d   : > { %1242 = vmatmul.mubr.f32.gmra.mxu0 %v5393_v46  ;;  %1514 = vmatmul.mubr.f32.gmra.mxu1 %v5394_v43  ;;  %v5439_v46 = vld [vmem:[#allocation40_spill] sm:$0xff] }
 0x11e   : > { %1697 = vmatprep.subr.mxu0 %v5188_v42  ;;  %1952 = vmatprep.subr.mxu1 %v5188_v42 }
 0x11f   : > { %1701 = vmatpush2.msra.mxu0 %v5396_v47  ;;  %1954 = vmatpush2.msra.mxu1 %v5397_v39  ;;  %v5441_v39 = vld [vmem:[#allocation41_spill] sm:$0xff] }
 0x120   : > { %1702 = vmatprep.subr.mxu0 %v5188_v42  ;;  %1248 = vmatprep.mubr.f32.mxu0 %v5398_v0 }
 0x121   : > { %1521 = vmatprep.mubr.f32.mxu1 %v5399_v52  ;;  %1706 = vmatpush2.msra.mxu0 %v5401_v24 }
 0x122   : > { %1955 = vmatprep.subr.mxu1 %v5188_v42  ;;  %1251 = vmatmul.mubr.f32.gmra.mxu0 %v5402_v28 }
 0x123   : > { %1525 = vmatmul.mubr.f32.gmra.mxu1 %v5403_v54  ;;  %1707 = vmatprep.subr.mxu0 %v5188_v42 }
 0x124   : > { %1957 = vmatpush2.msra.mxu1 %v5404_v38  ;;  %1711 = vmatpush2.msra.mxu0 %v5406_v35  ;;  %v5445_v38 = vld [vmem:[#allocation49_spill] sm:$0xff] }
 0x125   : > { %1712 = vmatprep.subr.mxu0 %v5188_v42  ;;  %1958 = vmatprep.subr.mxu1 %v5188_v42 }
 0x126   : > { %1257 = vmatprep.mubr.f32.mxu0 %v5407_v14  ;;  %1532 = vmatprep.mubr.f32.mxu1 %v5408_v48 }
 0x127   : > { %1716 = vmatpush2.msra.mxu0 %v5410_v3  ;;  %1960 = vmatpush2.msra.mxu1 %v5411_v15  ;;  %v5449_v3 = vld [vmem:[#allocation57_spill] sm:$0xff] }
 0x128   : > { %1260 = vmatmul.mubr.f32.gmra.mxu0 %v5412_v29  ;;  %1536 = vmatmul.mubr.f32.gmra.mxu1 %v5413_v4  ;;  %v5451_v4 = vld [vmem:[#allocation59_spill] sm:$0xff] }
 0x129   : > { %1717 = vmatprep.subr.mxu0 %v5188_v42  ;;  %1961 = vmatprep.subr.mxu1 %v5188_v42 }
 0x12a   : > { %1721 = vmatpush2.msra.mxu0 %v5415_v18  ;;  %1963 = vmatpush2.msra.mxu1 %v5416_v5 }
 0x12b   : > { %1722 = vmatprep.subr.mxu0 %v5188_v42  ;;  %1964 = vmatprep.subr.mxu1 %v5188_v42 }
 0x12c   : > { %1266 = vmatprep.mubr.f32.mxu0 %v5417_v6  ;;  %1543 = vmatprep.mubr.f32.mxu1 %v5418_v20  ;;  %v5452_v20 = vld [vmem:[#allocation60_spill] sm:$0xff] }
 0x12d   : > { %1726 = vmatpush2.msra.mxu0 %v5419_v1  ;;  %1966 = vmatpush2.msra.mxu1 %v5309_v32  ;;  %v5424_v32 = vand.u32 4294901760, %v5407_v14  ;;  %v5448_v14 = vld [vmem:[#allocation54_spill] sm:$0xff]  ;;  %v5453_v1 = vld [vmem:[#allocation61_spill] sm:$0xff] }
 0x12e   : > { %1269 = vmatmul.mubr.f32.gmra.mxu0 %v5420_v9  ;;  %1547 = vmatmul.mubr.f32.gmra.mxu1 %v5421_v62 }
 0x12f   : > { %1727 = vmatprep.subr.mxu0 %v5188_v42  ;;  %1967 = vmatprep.subr.mxu1 %v5188_v42 }
 0x130   : > { %1731 = vmatpush2.msra.mxu0 %v5422_v21  ;;  %1969 = vmatpush2.msra.mxu1 %v5311_v22  ;;  %v5427_v22 = vand.u32 4294901760, %v5315_v37 }
 0x131   : > { %1732 = vmatprep.subr.mxu0 %v5188_v42  ;;  %1275 = vmatprep.mubr.f32.mxu0 %v5423_v59 }
 0x132   : > { %1554 = vmatprep.mubr.f32.mxu1 %v5424_v32  ;;  %1736 = vmatpush2.msra.mxu0 %v5425_v2  ;;  %v5454_v2 = vld [vmem:[#allocation62_spill] sm:$0xff] }
 0x133   : > { %1970 = vmatprep.subr.mxu1 %v5188_v42  ;;  %1278 = vmatmul.mubr.f32.gmra.mxu0 %v4088_v27 }
 0x134   : > { %1558 = vmatmul.mubr.f32.gmra.mxu1 %v5426_v41  ;;  %1737 = vmatprep.subr.mxu0 %v5188_v42 }
 0x135   : > { %1972 = vmatpush2.msra.mxu1 %v5314_v51  ;;  %1741 = vmatpush2.msra.mxu0 %v5427_v22  ;;  %v5431_v51 = vand.u32 4294901760, %v5420_v9  ;;  %v5455_v22 = vld [vmem:[#allocation64_spill] sm:$0xff] }
 0x136   : > { %1973 = vmatprep.subr.mxu1 %v5188_v42  ;;  %1742 = vmatprep.subr.mxu0 %v5188_v42 }
 0x137   : > { %1975 = vmatpush2.msra.mxu1 %v5316_v55  ;;  %1284 = vmatprep.mubr.f32.mxu0 %v5428_v49  ;;  %v5432_v55 = vand.u32 4294901760, %v3627_v56  ;;  %v5435_v56 = vand.u32 4294901760, %v4088_v27 }
 0x138   : > { %1565 = vmatprep.mubr.f32.mxu1 %v5429_v8  ;;  %1746 = vmatpush2.msra.mxu0 %v5430_v50  ;;  %v5456_v50 = vld [vmem:[#allocation66_spill] sm:$0xff] }
 0x139   : > { %1287 = vmatmul.mubr.f32.gmra.mxu0 %v4121_v26  ;;  %1569 = vmatmul.mubr.f32.gmra.mxu1 %v5431_v51  ;;  %v369_v37 = vpop.f32.mrf.mxu0 }
 0x13a   : > { %1747 = vmatprep.subr.mxu0 %v5188_v42  ;;  %1976 = vmatprep.subr.mxu1 %v5188_v42 }
 0x13b   : > { %1751 = vmatpush2.msra.mxu0 %v5432_v55  ;;  %1978 = vmatpush2.msra.mxu1 %v5318_v53  ;;  %v371_v30 = vpop.f32.mrf.mxu0  ;;  %v370_v53 = vadd.f32 %v369_v37, %v4447_v13  ;;  %v5457_v55 = vld [vmem:[#allocation68_spill] sm:$0xff] }
 0x13c   : > { %1752 = vmatprep.subr.mxu0 %v5188_v42  ;;  %1979 = vmatprep.subr.mxu1 %v5188_v42 }
 0x13d   : > { %1293 = vmatprep.mubr.f32.mxu0 %v4140_v25  ;;  %1576 = vmatprep.mubr.f32.mxu1 %v5433_v11  ;;  %v384_v31 = vpop.f32.mrf.mxu0  ;;  %v5446_v25 = vld [vmem:[#allocation52_spill] sm:$0xff] }
 0x13e   : > { %1756 = vmatpush2.msra.mxu0 %v5434_v12  ;;  %1981 = vmatpush2.msra.mxu1 %v5319_v36  ;;  %v5437_v36 = vand.u32 4294901760, %v5428_v49  ;;  %v385_v43 = vadd.f32 %v384_v31, %v4447_v13  ;;  %v5458_v31 = vld [vmem:[#allocation69_spill] sm:$0xff] }
 0x13f   : > { %1296 = vmatmul.mubr.f32.gmra.mxu0 %v4149_v63  ;;  %1580 = vmatmul.mubr.f32.gmra.mxu1 %v5435_v56  ;;  %v386_v34 = vpop.f32.mrf.mxu0 }
 0x140   : > { %1757 = vmatprep.subr.mxu0 %v5188_v42  ;;  %1982 = vmatprep.subr.mxu1 %v5188_v42 }
 0x141   : > { %1761 = vmatpush2.msra.mxu0 %v5436_v40  ;;  %1984 = vmatpush2.msra.mxu1 %v5321_v10  ;;  %v399_v61 = vpop.f32.mrf.mxu0  ;;  %v5440_v10 = vand.u32 4294901760, %v4121_v26  ;;  %v5444_v26 = vand.u32 4294901760, %v4149_v63 }
 0x142   : > { %1762 = vmatprep.subr.mxu0 %v5188_v42  ;;  %1587 = vmatprep.mubr.f32.mxu1 %v5437_v36  ;;  %v871_v27 = vpop.f32.mrf.mxu1 }
 0x143   : > { %1766 = vmatpush2.msra.mxu0 %v5438_v57  ;;  %1768 = vmatprep.mubr.f32.mxu0 %v5439_v46  ;;  %v4471_v17 = vadd.f32 %v871_v27, %v370_v53  ;;  %v401_v7 = vpop.f32.mrf.mxu0  ;;  %v5459_v53 = vld [vmem:[#allocation72_spill] sm:$0xff]  ;;  %v5460_v27 = vld [vmem:[#allocation73_spill] sm:$0xff]  ;;  %v5461_v57 = vld [vmem:[#allocation75_spill] sm:$0xff] }
 0x144   : > { %1985 = vmatprep.subr.mxu1 %v5188_v42  ;;  %1591 = vmatmul.mubr.f32.gmra.mxu1 %v5440_v10  ;;  %v873_v47 = vpop.f32.mrf.mxu1 }
 0x145   : > { %1770 = vmatmul.mubr.f32.vlgmr.msra.gmra.mxu0 %v5441_v39  ;;  %1987 = vmatpush2.msra.mxu1 %v5324_v33  ;;  %v400_v33 = vadd.f32 %v399_v61, %v4447_v13 }
 0x146   : > { %1988 = vmatprep.subr.mxu1 %v5188_v42  ;;  %1598 = vmatprep.mubr.f32.mxu1 %v5442_v44  ;;  %v414_v0 = vpop.f32.mrf.mxu0  ;;  %v878_v52 = vpop.f32.mrf.mxu1 }
 0x147   : > { %1990 = vmatpush2.msra.mxu1 %v5325_v23  ;;  %1775 = vmatprep.mubr.f32.mxu0 %v5443_v19  ;;  %v4483_v24 = vadd.f32 %v878_v52, %v385_v43  ;;  %v5447_v23 = vld [vmem:[#allocation51_spill] sm:$0xff] }
 0x148   : > { %1602 = vmatmul.mubr.f32.gmra.mxu1 %v5444_v26  ;;  %1991 = vmatprep.subr.mxu1 %v5188_v42  ;;  %v416_v28 = vpop.f32.mrf.mxu0  ;;  %v880_v54 = vpop.f32.mrf.mxu1  ;;  %v5464_v26 = vld [vmem:[#allocation79_spill] sm:$0xff] }
 0x149   : > { %1777 = vmatmul.mubr.f32.gmra.mxu0 %v5445_v38  ;;  %1993 = vmatpush2.msra.mxu1 %v5446_v25  ;;  %v5465_v54 = vld [vmem:[#allocation82_spill] sm:$0xff] }
 0x14a   : > { %1994 = vmatprep.subr.mxu1 %v5188_v42  ;;  %1782 = vmatprep.mubr.f32.mxu0 %v5447_v23  ;;  %v415_v42 = vadd.f32 %v414_v0, %v4447_v13  ;;  %v5463_v0 = vld [vmem:[#allocation78_spill] sm:$0xff] }
 0x14b   : > { %1996 = vmatpush2.msra.mxu1 %v3637_v58  ;;  %1998 = vmatprep.mubr.f32.mxu1 %v5439_v46  ;;  %v429_v63 = vpop.f32.mrf.mxu0  ;;  %v885_v60 = vpop.f32.mrf.mxu1  ;;  %v5450_v58 = vld [vmem:[#allocation58_spill] sm:$0xff] }
 0x14c   : > { %2000 = vmatmul.mubr.f32.vlgmr.msra.gmra.mxu1 %v5441_v39  ;;  %v4496_v35 = vadd.f32 %v885_v60, %v400_v33  ;;  %v430_v18 = vadd.f32 %v429_v63, %v4447_v13  ;;  %v5462_v39 = vld [vmem:[#allocation76_spill] sm:$0xff] }
 0x14d   : > { %1784 = vmatmul.mubr.f32.gmra.mxu0 %v5448_v14  ;;  %2005 = vmatprep.mubr.f32.mxu1 %v5443_v19  ;;  %v431_v48 = vpop.f32.mrf.mxu0  ;;  %v887_v45 = vpop.f32.mrf.mxu1 }
 0x14e   : > { %1789 = vmatprep.mubr.f32.mxu0 %v5449_v3 }
 0x150   : > { %2007 = vmatmul.mubr.f32.gmra.mxu1 %v5445_v38 }
 0x151   : > { %1791 = vmatmul.mubr.f32.gmra.mxu0 %v5450_v58  ;;  %2012 = vmatprep.mubr.f32.mxu1 %v5447_v23  ;;  %v444_v15 = vpop.f32.mrf.mxu0  ;;  %v892_v29 = vpop.f32.mrf.mxu1  ;;  %v5466_v23 = vld [vmem:[#allocation83_spill] sm:$0xff] }
 0x152   : > { %1796 = vmatprep.mubr.f32.mxu0 %v5451_v4  ;;  %v4506_v16 = vadd.f32 %v892_v29, %v415_v42  ;;  %v445_v41 = vadd.f32 %v444_v15, %v4447_v13  ;;  %v5469_v15 = vld [vmem:[#allocation89_spill] sm:$0xff] }
 0x153   : > { %v446_v5 = vpop.f32.mrf.mxu0  ;;  %v894_v6 = vpop.f32.mrf.mxu1 }
 0x154   : > { %2014 = vmatmul.mubr.f32.gmra.mxu1 %v5448_v14  ;;  %v5467_v14 = vld [vmem:[#allocation86_spill] sm:$0xff]  ;;  %v5470_v5 = vld [vmem:[#allocation91_spill] sm:$0xff] }
 0x155   : > { %1798 = vmatmul.mubr.f32.gmra.mxu0 %v5452_v20  ;;  %2019 = vmatprep.mubr.f32.mxu1 %v5449_v3 }
 0x156   : > { %1803 = vmatprep.mubr.f32.mxu0 %v5453_v1  ;;  %v459_v9 = vpop.f32.mrf.mxu0  ;;  %v899_v62 = vpop.f32.mrf.mxu1 }
 0x157   : > { %v4513_v21 = vadd.f32 %v899_v62, %v430_v18  ;;  %v460_v30 = vadd.f32 %v459_v9, %v4447_v13 }
 0x158   : > { %2021 = vmatmul.mubr.f32.gmra.mxu1 %v5450_v58  ;;  %v461_v59 = vpop.f32.mrf.mxu0  ;;  %v901_v32 = vpop.f32.mrf.mxu1  ;;  %v5468_v58 = vld [vmem:[#allocation87_spill] sm:$0xff] }
 0x159   : > { %1805 = vmatmul.mubr.f32.gmra.mxu0 %v5454_v2  ;;  %2026 = vmatprep.mubr.f32.mxu1 %v5451_v4  ;;  %v5472_v59 = vld [vmem:[#allocation95_spill] sm:$0xff] }
 0x15a   : > { %1810 = vmatprep.mubr.f32.mxu0 %v5455_v22 }
 0x15b   : > { %v474_v49 = vpop.f32.mrf.mxu0 }
 0x15c   : > { %2028 = vmatmul.mubr.f32.gmra.mxu1 %v5452_v20  ;;  %v906_v8 = vpop.f32.mrf.mxu1  ;;  %v475_v40 = vadd.f32 %v474_v49, %v4447_v13 }
 0x15d   : > { %1812 = vmatmul.mubr.f32.gmra.mxu0 %v5456_v50  ;;  %2033 = vmatprep.mubr.f32.mxu1 %v5453_v1  ;;  %v4523_v51 = vadd.f32 %v906_v8, %v445_v41  ;;  %v476_v37 = vpop.f32.mrf.mxu0  ;;  %v5471_v1 = vld [vmem:[#allocation94_spill] sm:$0xff] }
 0x15e   : > { %1817 = vmatprep.mubr.f32.mxu0 %v5457_v55  ;;  %v908_v11 = vpop.f32.mrf.mxu1  ;;  %v5475_v37 = vld [vmem:[#allocation16_spill] sm:$0xff] }
 0x160   : > { %2035 = vmatmul.mubr.f32.gmra.mxu1 %v5454_v2  ;;  %v5473_v2 = vld [vmem:[#allocation98_spill] sm:$0xff] }
 0x161   : > { %1819 = vmatmul.mubr.f32.gmra.mxu0 %v5458_v31  ;;  %2040 = vmatprep.mubr.f32.mxu1 %v5455_v22  ;;  %v489_v12 = vpop.f32.mrf.mxu0  ;;  %v913_v56 = vpop.f32.mrf.mxu1 }
 0x162   : > { %1824 = vmatprep.mubr.f32.mxu0 %v5459_v53  ;;  %v4531_v34 = vadd.f32 %v913_v56, %v460_v30  ;;  %v490_v44 = vadd.f32 %v489_v12, %v4447_v13  ;;  %v5476_v56 = vld [vmem:[#allocation101_spill] sm:$0xff] }
 0x163   : > { %v491_v61 = vpop.f32.mrf.mxu0  ;;  %v915_v36 = vpop.f32.mrf.mxu1 }
 0x164   : > { %2042 = vmatmul.mubr.f32.gmra.mxu1 %v5456_v50  ;;  %v5474_v50 = vld [vmem:[#allocation99_spill] sm:$0xff] }
 0x165   : > { %1826 = vmatmul.mubr.f32.gmra.mxu0 %v5460_v27  ;;  %2047 = vmatprep.mubr.f32.mxu1 %v5457_v55 }
 0x166   : > { %1831 = vmatprep.mubr.f32.mxu0 %v5461_v57  ;;  %v504_v46 = vpop.f32.mrf.mxu0  ;;  %v920_v43 = vpop.f32.mrf.mxu1 }
 0x167   : > { %v4538_v7 = vadd.f32 %v920_v43, %v475_v40  ;;  %v505_v38 = vadd.f32 %v504_v46, %v4447_v13  ;;  %v5477_v40 = vld [vmem:[#allocation103_spill] sm:$0xff]  ;;  %v5479_v46 = vld [vmem:[#allocation106_spill] sm:$0xff] }
 0x168   : > { %2049 = vmatmul.mubr.f32.gmra.mxu1 %v5458_v31  ;;  %v506_v10 = vpop.f32.mrf.mxu0  ;;  %v922_v47 = vpop.f32.mrf.mxu1 }
 0x169   : > { %1833 = vmatmul.mubr.f32.gmra.mxu0 %v5462_v39  ;;  %2054 = vmatprep.mubr.f32.mxu1 %v5459_v53 }
 0x16a   : > { %1838 = vmatprep.mubr.f32.mxu0 %v5463_v0 }
 0x16b   : > { %v519_v52 = vpop.f32.mrf.mxu0 }
 0x16c   : > { %2056 = vmatmul.mubr.f32.gmra.mxu1 %v5460_v27  ;;  %v927_v19 = vpop.f32.mrf.mxu1  ;;  %v520_v42 = vadd.f32 %v519_v52, %v4447_v13  ;;  %v5478_v27 = vld [vmem:[#allocation104_spill] sm:$0xff] }
 0x16d   : > { %1840 = vmatmul.mubr.f32.gmra.mxu0 %v5464_v26  ;;  %2061 = vmatprep.mubr.f32.mxu1 %v5461_v57  ;;  %v4548_v33 = vadd.f32 %v927_v19, %v490_v44  ;;  %v521_v28 = vpop.f32.mrf.mxu0 }
 0x16e   : > { %1845 = vmatprep.mubr.f32.mxu0 %v5465_v54  ;;  %v929_v25 = vpop.f32.mrf.mxu1 }
 0x170   : > { %2063 = vmatmul.mubr.f32.gmra.mxu1 %v5462_v39  ;;  %v5480_v39 = vld [vmem:[#allocation107_spill] sm:$0xff] }
 0x171   : > { %1847 = vmatmul.mubr.f32.gmra.mxu0 %v5466_v23  ;;  %2068 = vmatprep.mubr.f32.mxu1 %v5463_v0  ;;  %v534_v63 = vpop.f32.mrf.mxu0  ;;  %v934_v60 = vpop.f32.mrf.mxu1 }
 0x172   : > { %1852 = vmatprep.mubr.f32.mxu0 %v5467_v14  ;;  %v4556_v48 = vadd.f32 %v934_v60, %v505_v38  ;;  %v535_v9 = vadd.f32 %v534_v63, %v4447_v13 }
 0x173   : > { %v536_v45 = vpop.f32.mrf.mxu0  ;;  %v936_v3 = vpop.f32.mrf.mxu1 }
 0x174   : > { %2070 = vmatmul.mubr.f32.gmra.mxu1 %v5464_v26 }
 0x175   : > { %1854 = vmatmul.mubr.f32.gmra.mxu0 %v5468_v58  ;;  %2075 = vmatprep.mubr.f32.mxu1 %v5465_v54 }
 0x176   : > { %1859 = vmatprep.mubr.f32.mxu0 %v5469_v15 }
 0x177   : > { %v549_v29 = vpop.f32.mrf.mxu0  ;;  %v941_v4 = vpop.f32.mrf.mxu1 }
 0x178   : > { %2077 = vmatmul.mubr.f32.gmra.mxu1 %v5466_v23  ;;  %v4564_v18 = vadd.f32 %v941_v4, %v520_v42  ;;  %v550_v49 = vadd.f32 %v549_v29, %v4447_v13 }
 0x179   : > { %1861 = vmatmul.mubr.f32.gmra.mxu0 %v5470_v5  ;;  %2082 = vmatprep.mubr.f32.mxu1 %v5467_v14  ;;  %v551_v6 = vpop.f32.mrf.mxu0  ;;  %v943_v20 = vpop.f32.mrf.mxu1 }
 0x17a   : > { %1866 = vmatprep.mubr.f32.mxu0 %v5471_v1 }
 0x17c   : > { %2084 = vmatmul.mubr.f32.gmra.mxu1 %v5468_v58  ;;  %v564_v62 = vpop.f32.mrf.mxu0 }
 0x17d   : > { %1868 = vmatmul.mubr.f32.gmra.mxu0 %v5472_v59  ;;  %2089 = vmatprep.mubr.f32.mxu1 %v5469_v15  ;;  %v948_v32 = vpop.f32.mrf.mxu1  ;;  %v565_v53 = vadd.f32 %v564_v62, %v4447_v13 }
 0x17e   : > { %1873 = vmatprep.mubr.f32.mxu0 %v5473_v2  ;;  %v4574_v41 = vadd.f32 %v948_v32, %v535_v9  ;;  %v566_v22 = vpop.f32.mrf.mxu0 }
 0x17f   : > { %v950_v8 = vpop.f32.mrf.mxu1 }
 0x180   : > { %2091 = vmatmul.mubr.f32.gmra.mxu1 %v5470_v5 }
 0x181   : > { %1875 = vmatmul.mubr.f32.gmra.mxu0 %v5474_v50  ;;  %2096 = vmatprep.mubr.f32.mxu1 %v5471_v1 }
 0x182   : > { %1880 = vmatprep.mubr.f32.mxu0 %v5475_v37  ;;  %v579_v55 = vpop.f32.mrf.mxu0  ;;  %v955_v30 = vpop.f32.mrf.mxu1 }
 0x183   : > { %v4581_v11 = vadd.f32 %v955_v30, %v550_v49  ;;  %v580_v47 = vadd.f32 %v579_v55, %v4447_v13 }
 0x184   : > { %2098 = vmatmul.mubr.f32.gmra.mxu1 %v5472_v59  ;;  %v581_v31 = vpop.f32.mrf.mxu0  ;;  %v957_v12 = vpop.f32.mrf.mxu1 }
 0x185   : > { %1882 = vmatmul.mubr.f32.gmra.mxu0 %v5476_v56  ;;  %2103 = vmatprep.mubr.f32.mxu1 %v5473_v2 }
 0x186   : > { %1887 = vmatprep.mubr.f32.mxu0 %v5477_v40 }
 0x188   : > { %2105 = vmatmul.mubr.f32.gmra.mxu1 %v5474_v50  ;;  %v594_v61 = vpop.f32.mrf.mxu0  ;;  %v962_v36 = vpop.f32.mrf.mxu1 }
 0x189   : > { %1889 = vmatmul.mubr.f32.gmra.mxu0 %v5478_v27  ;;  %2110 = vmatprep.mubr.f32.mxu1 %v5475_v37  ;;  %v4591_v57 = vadd.f32 %v962_v36, %v565_v53  ;;  %v595_v26 = vadd.f32 %v594_v61, %v4447_v13  ;;  %v3062_v61 = vmov 1  }
 0x18a   : > { %1894 = vmatprep.mubr.f32.mxu0 %v5479_v46  ;;  %v596_v43 = vpop.f32.mrf.mxu0  ;;  %v964_v10 = vpop.f32.mrf.mxu1  ;;  %2882 = vset.pattern.permute.xlu1 %v3062_v61 }
 0x18c   : > { %2112 = vmatmul.mubr.f32.gmra.mxu1 %v5476_v56 }
 0x18d   : > { %1896 = vmatmul.mubr.f32.gmra.mxu0 %v5480_v39  ;;  %2117 = vmatprep.mubr.f32.mxu1 %v5477_v40  ;;  %v609_v44 = vpop.f32.mrf.mxu0 }
 0x18e   : > { %v969_v0 = vpop.f32.mrf.mxu1  ;;  %v610_v60 = vadd.f32 %v609_v44, %v4447_v13 }
 0x18f   : > { %v4598_v52 = vadd.f32 %v969_v0, %v580_v47  ;;  %v611_v19 = vpop.f32.mrf.mxu0 }
 0x190   : > { %2119 = vmatmul.mubr.f32.gmra.mxu1 %v5478_v27  ;;  %v971_v28 = vpop.f32.mrf.mxu1 }
 0x191   : > { %2124 = vmatprep.mubr.f32.mxu1 %v5479_v46 }
 0x193   : > { %v624_v54 = vpop.f32.mrf.mxu0  ;;  %v976_v38 = vpop.f32.mrf.mxu1 }
 0x194   : > { %2126 = vmatmul.mubr.f32.gmra.mxu1 %v5480_v39  ;;  %v4604_v25 = vadd.f32 %v976_v38, %v595_v26  ;;  %v625_v42 = vadd.f32 %v624_v54, %v4447_v13 }
 0x195   : > { %v626_v23 = vpop.f32.mrf.mxu0  ;;  %v978_v63 = vpop.f32.mrf.mxu1 }
 0x199   : > { %v639_v14 = vpop.f32.mrf.mxu0  ;;  %v983_v45 = vpop.f32.mrf.mxu1 }
 0x19a   : > { %v4607_v3 = vadd.f32 %v983_v45, %v610_v60  ;;  %v640_v4 = vadd.f32 %v639_v14, %v4447_v13 }
 0x19b   : > { %v641_v58 = vpop.f32.mrf.mxu0  ;;  %v985_v15 = vpop.f32.mrf.mxu1 }
 0x19e   : > { %v990_v29 = vpop.f32.mrf.mxu1 }
 0x19f   : > { %v4611_v5 = vadd.f32 %v990_v29, %v625_v42  ;;  %v1135_v6 = vpop.f32.mrf.mxu0 }
 0x1a0   : > { %v1136_v20 = vadd.f32 %v1135_v6, %v4471_v17  ;;  %v992_v1 = vpop.f32.mrf.mxu1 }
 0x1a1   : > { %v1137_v9 = vpop.f32.mrf.mxu0 }
 0x1a2   : > { %v997_v62 = vpop.f32.mrf.mxu1 }
 0x1a3   : > { %v4614_v59 = vadd.f32 %v997_v62, %v640_v4  ;;  %v1144_v32 = vpop.f32.mrf.mxu0 }
 0x1a4   : > { %v1145_v2 = vadd.f32 %v1144_v32, %v4483_v24  ;;  %v999_v22 = vpop.f32.mrf.mxu1  ;;  %v3063_v24 = vmov 0  }
 0x1a5   : > { %v1146_v49 = vpop.f32.mrf.mxu0  ;;  %2881 = vset.pattern.permute.xlu0 %v3063_v24 }
 0x1a7   : > { %v1153_v8 = vpop.f32.mrf.mxu0  ;;  %v1405_v50 = vpop.f32.mrf.mxu1 }
 0x1a8   : > { %v1154_v37 = vadd.f32 %v1153_v8, %v4496_v35  ;;  %v4618_v13 = vadd.f32 %v1405_v50, %v1136_v20 }
 0x1a9   : > { %v1155_v55 = vpop.f32.mrf.mxu0  ;;  %v1407_v30 = vpop.f32.mrf.mxu1 }
 0x1ac   : > { %v1162_v31 = vpop.f32.mrf.mxu0  ;;  %v1416_v17 = vpop.f32.mrf.mxu1 }
 0x1ad   : > { %v1163_v12 = vadd.f32 %v1162_v31, %v4506_v16  ;;  %v4621_v56 = vadd.f32 %v1416_v17, %v1145_v2 }
 0x1ae   : > { %v1164_v53 = vpop.f32.mrf.mxu0  ;;  %v1418_v40 = vpop.f32.mrf.mxu1 }
 0x1b1   : > { %v1171_v36 = vpop.f32.mrf.mxu0  ;;  %v1427_v35 = vpop.f32.mrf.mxu1 }
 0x1b2   : > { %v1172_v27 = vadd.f32 %v1171_v36, %v4513_v21  ;;  %v4626_v46 = vadd.f32 %v1427_v35, %v1154_v37 }
 0x1b3   : > { %v1173_v43 = vpop.f32.mrf.mxu0  ;;  %v1429_v10 = vpop.f32.mrf.mxu1 }
 0x1b7   : > { %v1180_v47 = vpop.f32.mrf.mxu0  ;;  %v1438_v16 = vpop.f32.mrf.mxu1 }
 0x1b8   : > { %v1181_v39 = vadd.f32 %v1180_v47, %v4523_v51  ;;  %v4629_v44 = vadd.f32 %v1438_v16, %v1163_v12 }
 0x1b9   : > { %v1182_v0 = vpop.f32.mrf.mxu0  ;;  %v1440_v19 = vpop.f32.mrf.mxu1 }
 0x1bc   : > { %v1189_v26 = vpop.f32.mrf.mxu0  ;;  %v1449_v28 = vpop.f32.mrf.mxu1 }
 0x1bd   : > { %v1190_v54 = vadd.f32 %v1189_v26, %v4531_v34  ;;  %v4632_v38 = vadd.f32 %v1449_v28, %v1172_v27 }
 0x1be   : > { %v1191_v23 = vpop.f32.mrf.mxu0  ;;  %v1451_v21 = vpop.f32.mrf.mxu1 }
 0x1c1   : > { %v1198_v63 = vpop.f32.mrf.mxu0 }
 0x1c2   : > { %v1199_v60 = vadd.f32 %v1198_v63, %v4538_v7  ;;  %v1460_v14 = vpop.f32.mrf.mxu1 }
 0x1c3   : > { %v4635_v45 = vadd.f32 %v1460_v14, %v1181_v39  ;;  %v1200_v42 = vpop.f32.mrf.mxu0 }
 0x1c4   : > { %v1462_v51 = vpop.f32.mrf.mxu1 }
 0x1c7   : > { %v1207_v58 = vpop.f32.mrf.mxu0  ;;  %v1471_v15 = vpop.f32.mrf.mxu1 }
 0x1c8   : > { %v1208_v29 = vadd.f32 %v1207_v58, %v4548_v33  ;;  %v4638_v4 = vadd.f32 %v1471_v15, %v1190_v54 }
 0x1c9   : > { %v1209_v6 = vpop.f32.mrf.mxu0  ;;  %v1473_v34 = vpop.f32.mrf.mxu1 }
 0x1cc   : > { %v1216_v20 = vpop.f32.mrf.mxu0  ;;  %v1482_v1 = vpop.f32.mrf.mxu1 }
 0x1cd   : > { %v1217_v9 = vadd.f32 %v1216_v20, %v4556_v48  ;;  %v4641_v62 = vadd.f32 %v1482_v1, %v1199_v60 }
 0x1ce   : > { %v1218_v7 = vpop.f32.mrf.mxu0  ;;  %v1484_v32 = vpop.f32.mrf.mxu1 }
 0x1d1   : > { %v1225_v2 = vpop.f32.mrf.mxu0 }
 0x1d2   : > { %v1226_v22 = vadd.f32 %v1225_v2, %v4564_v18  ;;  %v1493_v49 = vpop.f32.mrf.mxu1 }
 0x1d3   : > { %v4644_v8 = vadd.f32 %v1493_v49, %v1208_v29  ;;  %v1227_v50 = vpop.f32.mrf.mxu0 }
 0x1d4   : > { %v1495_v33 = vpop.f32.mrf.mxu1 }
 0x1d7   : > { %v1234_v37 = vpop.f32.mrf.mxu0  ;;  %v1504_v55 = vpop.f32.mrf.mxu1 }
 0x1d8   : > { %v1235_v30 = vadd.f32 %v1234_v37, %v4574_v41  ;;  %v4647_v31 = vadd.f32 %v1504_v55, %v1217_v9 }
 0x1d9   : > { %v1236_v17 = vpop.f32.mrf.mxu0  ;;  %v1506_v48 = vpop.f32.mrf.mxu1 }
 0x1dd   : > { %v1243_v12 = vpop.f32.mrf.mxu0  ;;  %v1515_v53 = vpop.f32.mrf.mxu1 }
 0x1de   : > { %v1244_v40 = vadd.f32 %v1243_v12, %v4581_v11  ;;  %v4650_v36 = vadd.f32 %v1515_v53, %v1226_v22 }
 0x1df   : > { %v1245_v18 = vpop.f32.mrf.mxu0  ;;  %v1517_v35 = vpop.f32.mrf.mxu1 }
 0x1e2   : > { %v1252_v27 = vpop.f32.mrf.mxu0 }
 0x1e3   : > { %v1253_v43 = vadd.f32 %v1252_v27, %v4591_v57  ;;  %v1526_v10 = vpop.f32.mrf.mxu1 }
 0x1e4   : > { %v4653_v47 = vadd.f32 %v1526_v10, %v1235_v30  ;;  %v1254_v16 = vpop.f32.mrf.mxu0 }
 0x1e5   : > { %v1528_v41 = vpop.f32.mrf.mxu1 }
 0x1e8   : > { %v1261_v39 = vpop.f32.mrf.mxu0  ;;  %v1537_v0 = vpop.f32.mrf.mxu1 }
 0x1e9   : > { %v1262_v19 = vadd.f32 %v1261_v39, %v4598_v52  ;;  %v4656_v26 = vadd.f32 %v1537_v0, %v1244_v40 }
 0x1ea   : > { %v1263_v28 = vpop.f32.mrf.mxu0  ;;  %v1539_v11 = vpop.f32.mrf.mxu1 }
 0x1ee   : > { %v1270_v54 = vpop.f32.mrf.mxu0  ;;  %v1548_v23 = vpop.f32.mrf.mxu1 }
 0x1ef   : > { %v1271_v21 = vadd.f32 %v1270_v54, %v4604_v25  ;;  %v4659_v63 = vadd.f32 %v1548_v23, %v1253_v43 }
 0x1f0   : > { %v1272_v57 = vpop.f32.mrf.mxu0  ;;  %v1550_v60 = vpop.f32.mrf.mxu1 }
 0x1f3   : > { %v1279_v14 = vpop.f32.mrf.mxu0 }
 0x1f4   : > { %v1280_v42 = vadd.f32 %v1279_v14, %v4607_v3  ;;  %v1559_v51 = vpop.f32.mrf.mxu1 }
 0x1f5   : > { %v4662_v58 = vadd.f32 %v1559_v51, %v1262_v19  ;;  %v1281_v15 = vpop.f32.mrf.mxu0 }
 0x1f6   : > { %v1561_v52 = vpop.f32.mrf.mxu1 }
 0x1f9   : > { %v1288_v29 = vpop.f32.mrf.mxu0  ;;  %v1570_v6 = vpop.f32.mrf.mxu1 }
 0x1fa   : > { %v1289_v34 = vadd.f32 %v1288_v29, %v4611_v5  ;;  %v4665_v20 = vadd.f32 %v1570_v6, %v1271_v21 }
 0x1fb   : > { %v1290_v1 = vpop.f32.mrf.mxu0  ;;  %v1572_v25 = vpop.f32.mrf.mxu1 }
 0x1ff   : > { %v1297_v9 = vpop.f32.mrf.mxu0  ;;  %v1581_v7 = vpop.f32.mrf.mxu1 }
 0x200   : > { %v1298_v32 = vadd.f32 %v1297_v9, %v4614_v59  ;;  %v4668_v2 = vadd.f32 %v1581_v7, %v1280_v42 }
 0x201   : > { %v1299_v3 = vpop.f32.mrf.mxu0  ;;  %v1583_v22 = vpop.f32.mrf.mxu1 }
 0x204   : > { %v1592_v49 = vpop.f32.mrf.mxu1 }
 0x205   : > { %v4670_v50 = vadd.f32 %v1592_v49, %v1289_v34  ;;  %v1771_v33 = vpop.f32.mrf.mxu0 }
 0x206   : > { %v1594_v37 = vpop.f32.mrf.mxu1  ;;  %v1772_v12 = vadd.f32 %v1771_v33, %v4618_v13 }
 0x207   : > { %v1773_v55 = vpop.f32.mrf.mxu0 }
 0x208   : > { %v1603_v30 = vpop.f32.mrf.mxu1 }
 0x209   : > { %v4672_v5 = vadd.f32 %v1603_v30, %v1298_v32  ;;  %v1778_v17 = vpop.f32.mrf.mxu0 }
 0x20a   : > { %v1605_v48 = vpop.f32.mrf.mxu1  ;;  %v1779_v27 = vadd.f32 %v1778_v17, %v4621_v56 }
 0x20b   : > { %v1780_v53 = vpop.f32.mrf.mxu0 }
 0x20c   : > { %v2001_v40 = vpop.f32.mrf.mxu1 }
 0x20d   : > { %v1785_v59 = vpop.f32.mrf.mxu0  ;;  %v2002_v18 = vadd.f32 %v2001_v40, %v1772_v12 }
 0x20e   : > { %v2003_v35 = vpop.f32.mrf.mxu1  ;;  %v1786_v19 = vadd.f32 %v1785_v59, %v4626_v46 }
 0x20f   : > { %v2790_v43 = vmul.f32 -1.442695, %v2002_v18  ;;  %v1787_v10 = vpop.f32.mrf.mxu0 }
 0x210   : > { %v2008_v16 = vpop.f32.mrf.mxu1 }
 0x211   : > { %2918 = vpow2.f32 %v2790_v43  ;;  %v1792_v41 = vpop.f32.mrf.mxu0  ;;  %v2009_v39 = vadd.f32 %v2008_v16, %v1779_v27 }
 0x212   : > { %v2010_v0 = vpop.f32.mrf.mxu1  ;;  %v1793_v57 = vadd.f32 %v1792_v41, %v4629_v44 }
 0x213   : > { %v2791_v28 = vmul.f32 -1.442695, %v2009_v39  ;;  %v1794_v11 = vpop.f32.mrf.mxu0 }
 0x214   : > { %v2015_v54 = vpop.f32.mrf.mxu1 }
 0x215   : > { %2920 = vpow2.f32 %v2791_v28  ;;  %v1799_v13 = vpop.f32.mrf.mxu0  ;;  %v2016_v23 = vadd.f32 %v2015_v54, %v1786_v19 }
 0x216   : > { %v2017_v21 = vpop.f32.mrf.mxu1  ;;  %v1800_v52 = vadd.f32 %v1799_v13, %v4632_v38 }
 0x217   : > { %v2792_v60 = vmul.f32 -1.442695, %v2016_v23  ;;  %v1801_v56 = vpop.f32.mrf.mxu0 }
 0x218   : > { %v2022_v14 = vpop.f32.mrf.mxu1 }
 0x219   : > { %2922 = vpow2.f32 %v2792_v60  ;;  %v1806_v42 = vpop.f32.mrf.mxu0  ;;  %v2023_v51 = vadd.f32 %v2022_v14, %v1793_v57 }
 0x21a   : > { %v2024_v15 = vpop.f32.mrf.mxu1  ;;  %v1807_v44 = vadd.f32 %v1806_v42, %v4635_v45 }
 0x21b   : > { %v2793_v29 = vmul.f32 -1.442695, %v2023_v51  ;;  %v1808_v46 = vpop.f32.mrf.mxu0 }
 0x21c   : > { %v2029_v6 = vpop.f32.mrf.mxu1 }
 0x21d   : > { %2924 = vpow2.f32 %v2793_v29  ;;  %v1813_v34 = vpop.f32.mrf.mxu0  ;;  %v2030_v1 = vadd.f32 %v2029_v6, %v1800_v52 }
 0x21e   : > { %v2919_v25 = vpop.eup %2918  ;;  %v2031_v9 = vpop.f32.mrf.mxu1  ;;  %v1814_v30 = vadd.f32 %v1813_v34, %v4638_v4 }
 0x21f   : > { %v2188_v7 = vadd.f32 1.0, %v2919_v25  ;;  %v2794_v32 = vmul.f32 -1.442695, %v2030_v1  ;;  %v1815_v3 = vpop.f32.mrf.mxu0 }
 0x220   : > { %v2036_v22 = vpop.f32.mrf.mxu1 }
 0x221   : > { %2926 = vrcp.f32 %v2188_v7  ;;  %v1820_v49 = vpop.f32.mrf.mxu0  ;;  %v2037_v33 = vadd.f32 %v2036_v22, %v1807_v44 }
 0x222   : > { %v2921_v37 = vpop.eup %2920  ;;  %2928 = vpow2.f32 %v2794_v32  ;;  %v2038_v38 = vpop.f32.mrf.mxu1  ;;  %v1821_v10 = vadd.f32 %v1820_v49, %v4641_v62 }
 0x223   : > { %v2189_v55 = vadd.f32 1.0, %v2921_v37  ;;  %v1822_v17 = vpop.f32.mrf.mxu0  ;;  %v2795_v48 = vmul.f32 -1.442695, %v2037_v33 }
 0x224   : > { %v2043_v12 = vpop.f32.mrf.mxu1 }
 0x225   : > { %2930 = vrcp.f32 %v2189_v55  ;;  %v1827_v53 = vpop.f32.mrf.mxu0  ;;  %v2044_v40 = vadd.f32 %v2043_v12, %v1814_v30 }
 0x226   : > { %v2923_v59 = vpop.eup %2922  ;;  %v2045_v45 = vpop.f32.mrf.mxu1  ;;  %2932 = vpow2.f32 %v2795_v48  ;;  %v1828_v39 = vadd.f32 %v1827_v53, %v4644_v8 }
 0x227   : > { %v2190_v18 = vadd.f32 1.0, %v2923_v59  ;;  %v2796_v35 = vmul.f32 -1.442695, %v2044_v40  ;;  %v1829_v27 = vpop.f32.mrf.mxu0 }
 0x228   : > { %v2050_v43 = vpop.f32.mrf.mxu1 }
 0x229   : > { %2934 = vrcp.f32 %v2190_v18  ;;  %v1834_v16 = vpop.f32.mrf.mxu0  ;;  %v2051_v0 = vadd.f32 %v2050_v43, %v1821_v10 }
 0x22a   : > { %v2925_v41 = vpop.eup %2924  ;;  %2936 = vpow2.f32 %v2796_v35  ;;  %v2052_v4 = vpop.f32.mrf.mxu1  ;;  %v1835_v42 = vadd.f32 %v1834_v16, %v4647_v31 }
 0x22b   : > { %v1836_v19 = vpop.f32.mrf.mxu0  ;;  %v2191_v28 = vadd.f32 1.0, %v2925_v41  ;;  %v2797_v60 = vmul.f32 -1.442695, %v2051_v0 }
 0x22c   : > { %v2057_v11 = vpop.f32.mrf.mxu1 }
 0x22d   : > { %v1841_v54 = vpop.f32.mrf.mxu0  ;;  %v2058_v13 = vadd.f32 %v2057_v11, %v1828_v39  ;;  %2938 = vrcp.f32 %v2191_v28 }
 0x22e   : > { %v2927_v23 = vpop.eup %2926  ;;  %v2059_v21 = vpop.f32.mrf.mxu1  ;;  %v1842_v46 = vadd.f32 %v1841_v54, %v4650_v36 }
 0x22f   : > { %v2929_v57 = vpop.eup %2928  ;;  %v2798_v56 = vmul.f32 -1.442695, %v2058_v13  ;;  %v1843_v14 = vpop.f32.mrf.mxu0  ;;  %2417 = vperm.xlu1 %2882, %v2927_v23   ;;  %2266 = vperm.xlu0 %2881, %v2927_v23  }
 0x230   : > { %v2192_v62 = vadd.f32 1.0, %v2929_v57  ;;  %v2064_v51 = vpop.f32.mrf.mxu1 }
 0x231   : > { %2940 = vpow2.f32 %v2798_v56  ;;  %v1848_v8 = vpop.f32.mrf.mxu0  ;;  %v2065_v52 = vadd.f32 %v2064_v51, %v1835_v42 }
 0x232   : > { %v2931_v15 = vpop.eup %2930  ;;  %2942 = vrcp.f32 %v2192_v62  ;;  %v2066_v29 = vpop.f32.mrf.mxu1  ;;  %v1849_v38 = vadd.f32 %v1848_v8, %v4653_v47 }
 0x233   : > { %2944 = vpow2.f32 %v2797_v60  ;;  %v1850_v6 = vpop.f32.mrf.mxu0  ;;  %2271 = vperm.xlu0 %2881, %v2931_v15   ;;  %2884 = vset.pattern.permute.xlu1 %v3063_v24  ;;  %v2933_v1 = vpop.eup %2932  ;;  %v2799_v31 = vmul.f32 -1.442695, %v2065_v52 }
 0x234   : > { %v2071_v34 = vpop.f32.mrf.mxu1  ;;  %v2193_v36 = vadd.f32 1.0, %v2933_v1 }
 0x235   : > { %v1855_v25 = vpop.f32.mrf.mxu0  ;;  %v2072_v9 = vadd.f32 %v2071_v34, %v1842_v46  ;;  %2946 = vpow2.f32 %v2799_v31 }
 0x236   : > { %v2935_v7 = vpop.eup %2934  ;;  %v2073_v44 = vpop.f32.mrf.mxu1  ;;  %v1856_v17 = vadd.f32 %v1855_v25, %v4656_v26 }
 0x237   : > { %v2937_v32 = vpop.eup %2936  ;;  %v2800_v3 = vmul.f32 -1.442695, %v2072_v9  ;;  %v1857_v22 = vpop.f32.mrf.mxu0  ;;  %2276 = vperm.xlu1 %2884, %v2935_v7   ;;  %2883 = vset.pattern.permute.xlu0 %v3062_v61 }
 0x238   : > { %v2194_v49 = vadd.f32 1.0, %v2937_v32  ;;  %v2078_v33 = vpop.f32.mrf.mxu1  ;;  %2421 = vperm.xlu0 %2883, %v2931_v15  }
 0x239   : > { %v1862_v37 = vpop.f32.mrf.mxu0  ;;  %2948 = vpow2.f32 %v2800_v3  ;;  %v2079_v48 = vadd.f32 %v2078_v33, %v1849_v38 }
 0x23a   : > { %v2080_v55 = vpop.f32.mrf.mxu1  ;;  %2950 = vrcp.f32 %v2194_v49  ;;  %v2939_v53 = vpop.eup %2938  ;;  %v1863_v23 = vadd.f32 %v1862_v37, %v4659_v63 }
 0x23b   : > { %v1864_v30 = vpop.f32.mrf.mxu0  ;;  %2885 = vset.pattern.permute.xlu1 %v3062_v61  ;;  %2952 = vrcp.f32 %v2193_v36  ;;  %v2801_v43 = vmul.f32 -1.442695, %v2079_v48 }
 0x23c   : > { %v2085_v12 = vpop.f32.mrf.mxu1  ;;  %2425 = vperm.xlu1 %2885, %v2935_v7   ;;  %2888 = vset.pattern.permute.xlu0 %v3063_v24 }
 0x23d   : > { %v1869_v40 = vpop.f32.mrf.mxu0  ;;  %v2086_v45 = vadd.f32 %v2085_v12, %v1856_v17  ;;  %2954 = vpow2.f32 %v2801_v43 }
 0x23e   : > { %v2941_v59 = vpop.eup %2940  ;;  %v2087_v47 = vpop.f32.mrf.mxu1  ;;  %v1870_v11 = vadd.f32 %v1869_v40, %v4662_v58 }
 0x23f   : > { %v2943_v18 = vpop.eup %2942  ;;  %v1871_v35 = vpop.f32.mrf.mxu0  ;;  %v2196_v26 = vadd.f32 1.0, %v2941_v59  ;;  %v2802_v41 = vmul.f32 -1.442695, %v2086_v45 }
 0x240   : > { %v2945_v27 = vpop.eup %2944  ;;  %2286 = vperm.xlu0 %2888, %v2943_v18   ;;  %v2092_v10 = vpop.f32.mrf.mxu1  ;;  %2886 = vset.pattern.permute.xlu1 %v3063_v24 }
 0x241   : > { %v1876_v16 = vpop.f32.mrf.mxu0  ;;  %2281 = vperm.xlu1 %2886, %v2939_v53   ;;  %v2195_v39 = vadd.f32 1.0, %v2945_v27  ;;  %2956 = vrcp.f32 %v2196_v26  ;;  %v2093_v62 = vadd.f32 %v2092_v10, %v1863_v23 }
 0x242   : > { %v2094_v4 = vpop.f32.mrf.mxu1  ;;  %2958 = vpow2.f32 %v2802_v41  ;;  %v2947_v13 = vpop.eup %2946  ;;  %v1877_v31 = vadd.f32 %v1876_v16, %v4665_v20 }
 0x243   : > { %v1878_v0 = vpop.f32.mrf.mxu0  ;;  %2960 = vrcp.f32 %v2195_v39  ;;  %v2197_v8 = vadd.f32 1.0, %v2947_v13  ;;  %v2803_v46 = vmul.f32 -1.442695, %v2093_v62 }
 0x244   : > { %2889 = vset.pattern.permute.xlu0 %v3062_v61  ;;  %v2099_v19 = vpop.f32.mrf.mxu1 }
 0x245   : > { %v1883_v28 = vpop.f32.mrf.mxu0  ;;  %2433 = vperm.xlu0 %2889, %v2943_v18   ;;  %2887 = vset.pattern.permute.xlu1 %v3062_v61  ;;  %v2100_v60 = vadd.f32 %v2099_v19, %v1870_v11  ;;  %2962 = vrcp.f32 %v2197_v8  ;;  %v2398_v8 = vld [vmem:[%s3174_s4 + $0x18] sm:$0xff] }
 0x246   : > { %v2101_v54 = vpop.f32.mrf.mxu1  ;;  %2429 = vperm.xlu1 %2887, %v2939_v53   ;;  %v2949_v57 = vpop.eup %2948  ;;  %v1884_v1 = vadd.f32 %v1883_v28, %v4668_v2 }
 0x247   : > { %v1885_v21 = vpop.f32.mrf.mxu0  ;;  %v2951_v14 = vpop.eup %2950  ;;  %v2198_v15 = vadd.f32 1.0, %v2949_v57  ;;  %v2804_v29 = vmul.f32 -1.442695, %v2100_v60  ;;  %v2245_v57 = vld [vmem:[%s3174_s4] sm:$0xff] }
 0x248   : > { %v2106_v56 = vpop.f32.mrf.mxu1  ;;  %v2953_v51 = vpop.eup %2952  ;;  %v2397_v21 = vld [vmem:[%s3174_s4 + $0x8] sm:$0xff] }
 0x249   : > { %v1890_v42 = vpop.f32.mrf.mxu0  ;;  %2892 = vset.pattern.permute.xlu0 %v3063_v24  ;;  %2964 = vrcp.f32 %v2198_v15  ;;  %v2107_v49 = vadd.f32 %v2106_v56, %v1877_v31 }
 0x24a   : > { %2296 = vperm.xlu0 %2892, %v2951_v14   ;;  %v2108_v58 = vpop.f32.mrf.mxu1  ;;  %2890 = vset.pattern.permute.xlu1 %v3063_v24  ;;  %2966 = vpow2.f32 %v2804_v29  ;;  %v2955_v7 = vpop.eup %2954  ;;  %v1891_v20 = vadd.f32 %v1890_v42, %v4670_v50  ;;  %v2246_v42 = vld [vmem:[%s3174_s4 + $0x10] sm:$0xff] }
 0x24b   : > { %v1892_v52 = vpop.f32.mrf.mxu0  ;;  %2291 = vperm.xlu1 %2890, %v2953_v51   ;;  %2968 = vpow2.f32 %v2803_v46  ;;  %v2199_v2 = vadd.f32 1.0, %v2955_v7  ;;  %v2805_v30 = vmul.f32 -1.442695, %v2107_v49 }
 0x24c   : > { %v2113_v63 = vpop.f32.mrf.mxu1 }
 0x24d   : > { %v1897_v6 = vpop.f32.mrf.mxu0  ;;  %v2114_v44 = vadd.f32 %v2113_v63, %v1884_v1  ;;  %2970 = vrcp.f32 %v2199_v2  ;;  %v2399_v63 = vld [vmem:[%s3174_s4 + $0x28] sm:$0xff]  ;;  %v2248_v1 = vld [vmem:[%s3174_s4 + $0x30] sm:$0xff]  ;;  %v2251_v2 = vld [vmem:[%s3174_s4 + $0x60] sm:$0xff] }
 0x24e   : > { %2893 = vset.pattern.permute.xlu0 %v3062_v61  ;;  %v2115_v34 = vpop.f32.mrf.mxu1  ;;  %v2957_v32 = vpop.eup %2956  ;;  %v1898_v17 = vadd.f32 %v1897_v6, %v4672_v5 }
 0x24f   : > { %2441 = vperm.xlu0 %2893, %v2951_v14   ;;  %2891 = vset.pattern.permute.xlu1 %v3062_v61  ;;  %v1899_v25 = vpop.f32.mrf.mxu0  ;;  %v2959_v22 = vpop.eup %2958  ;;  %v2806_v37 = vmul.f32 -1.442695, %v2114_v44  ;;  %v2249_v34 = vld [vmem:[%s3174_s4 + $0x40] sm:$0xff]  ;;  %v2401_v44 = vld [vmem:[%s3174_s4 + $0x48] sm:$0xff] }
 0x250   : > { %v2120_v9 = vpop.f32.mrf.mxu1  ;;  %2437 = vperm.xlu1 %2891, %v2953_v51   ;;  %v2961_v33 = vpop.eup %2960  ;;  %v2200_v38 = vadd.f32 1.0, %v2959_v22  ;;  %v2247_v51 = vld [vmem:[%s3174_s4 + $0x20] sm:$0xff] }
 0x251   : > { %2972 = vpow2.f32 %v2806_v37  ;;  %v2121_v48 = vadd.f32 %v2120_v9, %v1891_v20  ;;  %v2403_v20 = vld [vmem:[%s3174_s4 + $0x68] sm:$0xff] }
 0x252   : > { %v2122_v3 = vpop.f32.mrf.mxu1  ;;  %2974 = vrcp.f32 %v2200_v38  ;;  %v2963_v12 = vpop.eup %2962 }
 0x253   : > { %2896 = vset.pattern.permute.xlu0 %v3063_v24  ;;  %2976 = vpow2.f32 %v2805_v30  ;;  %v2807_v50 = vmul.f32 -1.442695, %v2121_v48 }
 0x254   : > { %2306 = vperm.xlu0 %2896, %v2957_v32   ;;  %v2127_v36 = vpop.f32.mrf.mxu1  ;;  %2894 = vset.pattern.permute.xlu1 %v3063_v24 }
 0x255   : > { %2301 = vperm.xlu1 %2894, %v2961_v33   ;;  %v2128_v53 = vadd.f32 %v2127_v36, %v1898_v17  ;;  %2978 = vpow2.f32 %v2807_v50  ;;  %v2250_v36 = vld [vmem:[%s3174_s4 + $0x50] sm:$0xff]  ;;  %v2402_v17 = vld [vmem:[%s3174_s4 + $0x58] sm:$0xff] }
 0x256   : > { %v2129_v55 = vpop.f32.mrf.mxu1  ;;  %v2965_v40 = vpop.eup %2964 }
 0x257   : > { %v2967_v59 = vpop.eup %2966  ;;  %v2808_v5 = vmul.f32 -1.442695, %v2128_v53 }
 0x258   : > { %2897 = vset.pattern.permute.xlu0 %v3062_v61  ;;  %v2969_v45 = vpop.eup %2968  ;;  %v2202_v47 = vadd.f32 1.0, %v2967_v59  ;;  %v2253_v59 = vld [vmem:[%s3174_s4 + $0x80] sm:$0xff] }
 0x259   : > { %2449 = vperm.xlu0 %2897, %v2957_v32   ;;  %2895 = vset.pattern.permute.xlu1 %v3062_v61  ;;  %v2201_v18 = vadd.f32 1.0, %v2969_v45  ;;  %2980 = vpow2.f32 %v2808_v5  ;;  %v2400_v32 = vld [vmem:[%s3174_s4 + $0x38] sm:$0xff]  ;;  %v2252_v45 = vld [vmem:[%s3174_s4 + $0x70] sm:$0xff] }
 0x25a   : > { %2445 = vperm.xlu1 %2895, %v2961_v33   ;;  %2982 = vrcp.f32 %v2202_v47  ;;  %v2971_v35 = vpop.eup %2970 }
 0x25b   : > { %2984 = vrcp.f32 %v2201_v18 }
 0x25d   : > { %2900 = vset.pattern.permute.xlu0 %v3063_v24 }
 0x25e   : > { %2316 = vperm.xlu0 %2900, %v2965_v40   ;;  %2898 = vset.pattern.permute.xlu1 %v3063_v24  ;;  %v2973_v27 = vpop.eup %2972 }
 0x25f   : > { %2311 = vperm.xlu1 %2898, %v2963_v12   ;;  %v2975_v43 = vpop.eup %2974  ;;  %v2204_v26 = vadd.f32 1.0, %v2973_v27  ;;  %v2404_v27 = vld [vmem:[%s3174_s4 + $0x78] sm:$0xff] }
 0x260   : > { %v2977_v10 = vpop.eup %2976 }
 0x261   : > { %v2203_v16 = vadd.f32 1.0, %v2977_v10  ;;  %2986 = vrcp.f32 %v2204_v26 }
 0x262   : > { %2901 = vset.pattern.permute.xlu0 %v3062_v61  ;;  %v2979_v41 = vpop.eup %2978 }
 0x263   : > { %2457 = vperm.xlu0 %2901, %v2965_v40   ;;  %2899 = vset.pattern.permute.xlu1 %v3062_v61  ;;  %2988 = vrcp.f32 %v2203_v16  ;;  %v2205_v28 = vadd.f32 1.0, %v2979_v41  ;;  %v2255_v41 = vld [vmem:[%s3174_s4 + $0xa0] sm:$0xff] }
 0x264   : > { %2453 = vperm.xlu1 %2899, %v2963_v12  }
 0x266   : > { %v2981_v4 = vpop.eup %2980 }
 0x267   : > { %2904 = vset.pattern.permute.xlu0 %v3063_v24  ;;  %v2983_v39 = vpop.eup %2982  ;;  %v2206_v19 = vadd.f32 1.0, %v2981_v4  ;;  %v2254_v4 = vld [vmem:[%s3174_s4 + $0x90] sm:$0xff] }
 0x268   : > { %2326 = vperm.xlu0 %2904, %v2975_v43   ;;  %2902 = vset.pattern.permute.xlu1 %v3063_v24  ;;  %v2985_v0 = vpop.eup %2984 }
 0x269   : > { %2321 = vperm.xlu1 %2902, %v2971_v35   ;;  %2990 = vrcp.f32 %v2206_v19 }
 0x26a   : > { %2992 = vrcp.f32 %v2205_v28 }
 0x26c   : > { %2905 = vset.pattern.permute.xlu0 %v3062_v61 }
 0x26d   : > { %2465 = vperm.xlu0 %2905, %v2975_v43   ;;  %2903 = vset.pattern.permute.xlu1 %v3062_v61 }
 0x26e   : > { %2461 = vperm.xlu1 %2903, %v2971_v35   ;;  %v2987_v11 = vpop.eup %2986  ;;  %v2405_v35 = vld [vmem:[%s3174_s4 + $0x88] sm:$0xff] }
 0x270   : > { %v2989_v54 = vpop.eup %2988 }
 0x271   : > { %2908 = vset.pattern.permute.xlu0 %v3063_v24 }
 0x272   : > { %2336 = vperm.xlu0 %2908, %v2983_v39   ;;  %2906 = vset.pattern.permute.xlu1 %v3063_v24 }
 0x273   : > { %2331 = vperm.xlu1 %2906, %v2985_v0  }
 0x276   : > { %2909 = vset.pattern.permute.xlu0 %v3062_v61  ;;  %v2991_v13 = vpop.eup %2990 }
 0x277   : > { %2473 = vperm.xlu0 %2909, %v2983_v39   ;;  %2907 = vset.pattern.permute.xlu1 %v3062_v61  ;;  %v2993_v23 = vpop.eup %2992 }
 0x278   : > { %2469 = vperm.xlu1 %2907, %v2985_v0  }
 0x27b   : > { %2912 = vset.pattern.permute.xlu0 %v3063_v24 }
 0x27c   : > { %2346 = vperm.xlu0 %2912, %v2987_v11   ;;  %2910 = vset.pattern.permute.xlu1 %v3063_v24 }
 0x27d   : > { %2341 = vperm.xlu1 %2910, %v2989_v54  }
 0x280   : > { %2913 = vset.pattern.permute.xlu0 %v3062_v61 }
 0x281   : > { %2481 = vperm.xlu0 %2913, %v2987_v11   ;;  %2911 = vset.pattern.permute.xlu1 %v3062_v61  ;;  %v2407_v11 = vld [vmem:[%s3174_s4 + $0xa8] sm:$0xff] }
 0x282   : > { %2477 = vperm.xlu1 %2911, %v2989_v54   ;;  %v2406_v54 = vld [vmem:[%s3174_s4 + $0x98] sm:$0xff] }
 0x285   : > { %2915 = vset.pattern.permute.xlu0 %v3063_v24 }
 0x286   : > { %2356 = vperm.xlu0 %2915, %v2991_v13   ;;  %2914 = vset.pattern.permute.xlu1 %v3063_v24 }
 0x287   : > { %2351 = vperm.xlu1 %2914, %v2993_v23  }
 0x28a   : > { %2917 = vset.pattern.permute.xlu0 %v3062_v61 }
 0x28b   : > { %2489 = vperm.xlu0 %2917, %v2991_v13   ;;  %2916 = vset.pattern.permute.xlu1 %v3062_v61 }
 0x28c   : > { %2485 = vperm.xlu1 %2916, %v2993_v23  }
 0x2aa   : > { %v2418_v60 = vpop.permute.xlu1 %2417  ;;  %v2267_v56 = vpop.permute.xlu0 %2266 }
 0x2ab   : > { %v2492_v14 = vmul.f32 %v2418_v60, %v2397_v21  ;;  %v2359_v62 = vmul.f32 %v2267_v56, %v2245_v57  ;;  %v2257_v60 = vld [vmem:[%s3174_s4 + $0xc0] sm:$0xff]  ;;  %v2256_v56 = vld [vmem:[%s3174_s4 + $0xb0] sm:$0xff] }
 0x2ad   : > { %2809 = vst [vmem:[%s4732_s7 + $0x98] sm:$0xff] %v2492_v14  ;;  %2378 = vst [vmem:[%s4732_s7] sm:$0xff] %v2359_v62 }
 0x2ae   : > { %v2272_v61 = vpop.permute.xlu0 %2271 }
 0x2af   : > { %v2360_v24 = vmul.f32 %v2272_v61, %v2246_v42 }
 0x2b1   : > { %2379 = vst [vmem:[%s4732_s7 + $0x8] sm:$0xff] %v2360_v24  ;;  %v2409_v24 = vld [vmem:[%s3174_s4 + $0xc8] sm:$0xff] }
 0x2b2   : > { %v2277_v58 = vpop.permute.xlu1 %2276 }
 0x2b3   : > { %v2361_v15 = vmul.f32 %v2277_v58, %v2247_v51  ;;  %v2422_v52 = vpop.permute.xlu0 %2421  ;;  %v2408_v51 = vld [vmem:[%s3174_s4 + $0xb8] sm:$0xff] }
 0x2b4   : > { %v2493_v29 = vmul.f32 %v2422_v52, %v2398_v8 }
 0x2b5   : > { %2380 = vst [vmem:[%s4732_s7 + $0x10] sm:$0xff] %v2361_v15 }
 0x2b6   : > { %2810 = vst [vmem:[%s4732_s7 + $0xa0] sm:$0xff] %v2493_v29  ;;  %v2259_v29 = vld [vmem:[%s3174_s4 + $0xe0] sm:$0xff] }
 0x2b7   : > { %v2426_v46 = vpop.permute.xlu1 %2425 }
 0x2b8   : > { %v2494_v6 = vmul.f32 %v2426_v46, %v2399_v63  ;;  %v2258_v63 = vld [vmem:[%s3174_s4 + $0xd0] sm:$0xff] }
 0x2ba   : > { %2811 = vst [vmem:[%s4732_s7 + $0xa8] sm:$0xff] %v2494_v6 }
 0x2bb   : > { %v2287_v25 = vpop.permute.xlu0 %2286 }
 0x2bc   : > { %v2363_v9 = vmul.f32 %v2287_v25, %v2249_v34  ;;  %v2282_v7 = vpop.permute.xlu1 %2281  ;;  %v2411_v25 = vld [vmem:[%s3174_s4 + $0xe8] sm:$0xff] }
 0x2bd   : > { %v2362_v31 = vmul.f32 %v2282_v7, %v2248_v1 }
 0x2be   : > { %2382 = vst [vmem:[%s4732_s7 + $0x20] sm:$0xff] %v2363_v9  ;;  %v2410_v9 = vld [vmem:[%s3174_s4 + $0xd8] sm:$0xff] }
 0x2bf   : > { %2381 = vst [vmem:[%s4732_s7 + $0x18] sm:$0xff] %v2362_v31 }
 0x2c0   : > { %v2434_v3 = vpop.permute.xlu0 %2433 }
 0x2c1   : > { %v2496_v22 = vmul.f32 %v2434_v3, %v2401_v44  ;;  %v2430_v49 = vpop.permute.xlu1 %2429  ;;  %v2261_v3 = vld [vmem:[%s3174_s4 + $0x100] sm:$0xff] }
 0x2c2   : > { %v2495_v33 = vmul.f32 %v2430_v49, %v2400_v32 }
 0x2c3   : > { %2813 = vst [vmem:[%s4732_s7 + $0xb8] sm:$0xff] %v2496_v22  ;;  %v2260_v22 = vld [vmem:[%s3174_s4 + $0xf0] sm:$0xff] }
 0x2c4   : > { %2812 = vst [vmem:[%s4732_s7 + $0xb0] sm:$0xff] %v2495_v33 }
 0x2c5   : > { %v2297_v37 = vpop.permute.xlu0 %2296 }
 0x2c6   : > { %v2365_v38 = vmul.f32 %v2297_v37, %v2251_v2  ;;  %v2292_v55 = vpop.permute.xlu1 %2291  ;;  %v2413_v37 = vld [vmem:[%s3174_s4 + $0x108] sm:$0xff] }
 0x2c7   : > { %v2364_v30 = vmul.f32 %v2292_v55, %v2250_v36 }
 0x2c8   : > { %2384 = vst [vmem:[%s4732_s7 + $0x30] sm:$0xff] %v2365_v38  ;;  %v2412_v38 = vld [vmem:[%s3174_s4 + $0xf8] sm:$0xff] }
 0x2c9   : > { %2383 = vst [vmem:[%s4732_s7 + $0x28] sm:$0xff] %v2364_v30 }
 0x2ca   : > { %v2442_v48 = vpop.permute.xlu0 %2441 }
 0x2cb   : > { %v2498_v12 = vmul.f32 %v2442_v48, %v2403_v20  ;;  %v2438_v53 = vpop.permute.xlu1 %2437  ;;  %v2263_v48 = vld [vmem:[%s3174_s4 + $0x120] sm:$0xff] }
 0x2cc   : > { %v2497_v40 = vmul.f32 %v2438_v53, %v2402_v17 }
 0x2cd   : > { %2815 = vst [vmem:[%s4732_s7 + $0xc8] sm:$0xff] %v2498_v12  ;;  %v2262_v12 = vld [vmem:[%s3174_s4 + $0x110] sm:$0xff] }
 0x2ce   : > { %2814 = vst [vmem:[%s4732_s7 + $0xc0] sm:$0xff] %v2497_v40 }
 0x2cf   : > { %v2307_v50 = vpop.permute.xlu0 %2306 }
 0x2d0   : > { %v2367_v5 = vmul.f32 %v2307_v50, %v2253_v59  ;;  %v2302_v47 = vpop.permute.xlu1 %2301  ;;  %v2415_v50 = vld [vmem:[%s3174_s4 + $0x128] sm:$0xff] }
 0x2d1   : > { %v2366_v18 = vmul.f32 %v2302_v47, %v2252_v45 }
 0x2d2   : > { %2386 = vst [vmem:[%s4732_s7 + $0x40] sm:$0xff] %v2367_v5  ;;  %v2414_v5 = vld [vmem:[%s3174_s4 + $0x118] sm:$0xff] }
 0x2d3   : > { %2385 = vst [vmem:[%s4732_s7 + $0x38] sm:$0xff] %v2366_v18 }
 0x2d4   : > { %v2450_v43 = vpop.permute.xlu0 %2449 }
 0x2d5   : > { %v2500_v10 = vmul.f32 %v2450_v43, %v2405_v35  ;;  %v2446_v26 = vpop.permute.xlu1 %2445  ;;  %v2643_v43 = vld [vmem:[%s4732_s7] sm:$0xff] (%p5481_p9) }
 0x2d6   : > { %v2499_v16 = vmul.f32 %v2446_v26, %v2404_v27  ;;  %v2647_v26 = vld [vmem:[%s4732_s7 + $0x10] sm:$0xff] (%p5481_p9)  ;;  %2644 = vst [vmem:[%s4819_s22] sm:$0xff] (%p5481_p9), %v2643_v43 }
 0x2d7   : > { %2817 = vst [vmem:[%s4732_s7 + $0xd8] sm:$0xff] %v2500_v10  ;;  %v2645_v10 = vld [vmem:[%s4732_s7 + $0x8] sm:$0xff] (%p5481_p9)  ;;  %2648 = vst [vmem:[%s4819_s22 + $0x10] sm:$0xff] (%p5481_p9), %v2647_v26 }
 0x2d8   : > { %2816 = vst [vmem:[%s4732_s7 + $0xd0] sm:$0xff] %v2499_v16  ;;  %v2649_v16 = vld [vmem:[%s4732_s7 + $0x18] sm:$0xff] (%p5481_p9)  ;;  %2646 = vst [vmem:[%s4819_s22 + $0x8] sm:$0xff] (%p5481_p9), %v2645_v10 }
 0x2d9   : > { %v2317_v39 = vpop.permute.xlu0 %2316  ;;  %2650 = vst [vmem:[%s4819_s22 + $0x18] sm:$0xff] (%p5481_p9), %v2649_v16 }
 0x2da   : > { %v2369_v0 = vmul.f32 %v2317_v39, %v2255_v41  ;;  %v2312_v19 = vpop.permute.xlu1 %2311  ;;  %v2651_v41 = vld [vmem:[%s4732_s7 + $0x20] sm:$0xff] (%p5481_p9)  ;;  %v2655_v39 = vld [vmem:[%s4732_s7 + $0x30] sm:$0xff] (%p5481_p9) }
 0x2db   : > { %v2368_v28 = vmul.f32 %v2312_v19, %v2254_v4  ;;  %v2653_v4 = vld [vmem:[%s4732_s7 + $0x28] sm:$0xff] (%p5481_p9)  ;;  %v2659_v19 = vld [vmem:[%s4732_s7 + $0x40] sm:$0xff] (%p5481_p9)  ;;  %2652 = vst [vmem:[%s4819_s22 + $0x20] sm:$0xff] (%p5481_p9), %v2651_v41  ;;  %2656 = vst [vmem:[%s4819_s22 + $0x30] sm:$0xff] (%p5481_p9), %v2655_v39 }
 0x2dc   : > { %2388 = vst [vmem:[%s4732_s7 + $0x50] sm:$0xff] %v2369_v0  ;;  %v2657_v0 = vld [vmem:[%s4732_s7 + $0x38] sm:$0xff] (%p5481_p9)  ;;  %2654 = vst [vmem:[%s4819_s22 + $0x28] sm:$0xff] (%p5481_p9), %v2653_v4 }
 0x2dd   : > { %2387 = vst [vmem:[%s4732_s7 + $0x48] sm:$0xff] %v2368_v28  ;;  %2658 = vst [vmem:[%s4819_s22 + $0x38] sm:$0xff] (%p5481_p9), %v2657_v0 }
 0x2de   : > { %v2458_v13 = vpop.permute.xlu0 %2457  ;;  %2660 = vst [vmem:[%s4819_s22 + $0x40] sm:$0xff] (%p5481_p9), %v2659_v19 }
 0x2df   : > { %v2502_v23 = vmul.f32 %v2458_v13, %v2407_v11  ;;  %v2454_v21 = vpop.permute.xlu1 %2453 }
 0x2e0   : > { %v2501_v57 = vmul.f32 %v2454_v21, %v2406_v54 }
 0x2e1   : > { %2819 = vst [vmem:[%s4732_s7 + $0xe8] sm:$0xff] %v2502_v23 }
 0x2e2   : > { %2818 = vst [vmem:[%s4732_s7 + $0xe0] sm:$0xff] %v2501_v57 }
 0x2e3   : > { %v2327_v14 = vpop.permute.xlu0 %2326  ;;  %v2663_v11 = vld [vmem:[%s4732_s7 + $0x50] sm:$0xff] (%p5481_p9) }
 0x2e4   : > { %v2371_v62 = vmul.f32 %v2327_v14, %v2257_v60  ;;  %v2322_v42 = vpop.permute.xlu1 %2321  ;;  %v2661_v28 = vld [vmem:[%s4732_s7 + $0x48] sm:$0xff] (%p5481_p9)  ;;  %2664 = vst [vmem:[%s4819_s22 + $0x50] sm:$0xff] (%p5481_p9), %v2663_v11 }
 0x2e5   : > { %v2370_v61 = vmul.f32 %v2322_v42, %v2256_v56  ;;  %2662 = vst [vmem:[%s4819_s22 + $0x48] sm:$0xff] (%p5481_p9), %v2661_v28  ;;  %v2683_v42 = vld [vmem:[%s4732_s7 + $0xa0] sm:$0xff] (%p5481_p9) }
 0x2e6   : > { %2390 = vst [vmem:[%s4732_s7 + $0x60] sm:$0xff] %v2371_v62  ;;  %v2681_v62 = vld [vmem:[%s4732_s7 + $0x98] sm:$0xff] (%p5481_p9)  ;;  %2684 = vst [vmem:[%s4819_s22 + $0x138] sm:$0xff] (%p5481_p9), %v2683_v42 }
 0x2e7   : > { %2389 = vst [vmem:[%s4732_s7 + $0x58] sm:$0xff] %v2370_v61  ;;  %2682 = vst [vmem:[%s4819_s22 + $0x130] sm:$0xff] (%p5481_p9), %v2681_v62  ;;  %v2685_v61 = vld [vmem:[%s4732_s7 + $0xa8] sm:$0xff] (%p5481_p9) }
 0x2e8   : > { %v2466_v8 = vpop.permute.xlu0 %2465  ;;  %2686 = vst [vmem:[%s4819_s22 + $0x140] sm:$0xff] (%p5481_p9), %v2685_v61 }
 0x2e9   : > { %v2504_v58 = vmul.f32 %v2466_v8, %v2409_v24  ;;  %v2462_v15 = vpop.permute.xlu1 %2461  ;;  %v2687_v24 = vld [vmem:[%s4732_s7 + $0xb0] sm:$0xff] (%p5481_p9)  ;;  %v2691_v8 = vld [vmem:[%s4732_s7 + $0xc0] sm:$0xff] (%p5481_p9) }
 0x2ea   : > { %v2503_v52 = vmul.f32 %v2462_v15, %v2408_v51  ;;  %v2689_v51 = vld [vmem:[%s4732_s7 + $0xb8] sm:$0xff] (%p5481_p9)  ;;  %2688 = vst [vmem:[%s4819_s22 + $0x148] sm:$0xff] (%p5481_p9), %v2687_v24  ;;  %v2695_v15 = vld [vmem:[%s4732_s7 + $0xd0] sm:$0xff] (%p5481_p9)  ;;  %2692 = vst [vmem:[%s4819_s22 + $0x158] sm:$0xff] (%p5481_p9), %v2691_v8 }
 0x2eb   : > { %2821 = vst [vmem:[%s4732_s7 + $0xf8] sm:$0xff] %v2504_v58  ;;  %2690 = vst [vmem:[%s4819_s22 + $0x150] sm:$0xff] (%p5481_p9), %v2689_v51  ;;  %v2693_v58 = vld [vmem:[%s4732_s7 + $0xc8] sm:$0xff] (%p5481_p9) }
 0x2ec   : > { %2820 = vst [vmem:[%s4732_s7 + $0xf0] sm:$0xff] %v2503_v52  ;;  %2694 = vst [vmem:[%s4819_s22 + $0x160] sm:$0xff] (%p5481_p9), %v2693_v58  ;;  %v2697_v52 = vld [vmem:[%s4732_s7 + $0xd8] sm:$0xff] (%p5481_p9) }
 0x2ed   : > { %v2337_v46 = vpop.permute.xlu0 %2336  ;;  %v2667_v13 = vld [vmem:[%s4732_s7 + $0x60] sm:$0xff] (%p5481_p9)  ;;  %2696 = vst [vmem:[%s4819_s22 + $0x168] sm:$0xff] (%p5481_p9), %v2695_v15  ;;  %2698 = vst [vmem:[%s4819_s22 + $0x170] sm:$0xff] (%p5481_p9), %v2697_v52 }
 0x2ee   : > { %v2373_v6 = vmul.f32 %v2337_v46, %v2259_v29  ;;  %v2332_v34 = vpop.permute.xlu1 %2331  ;;  %v2665_v54 = vld [vmem:[%s4732_s7 + $0x58] sm:$0xff] (%p5481_p9)  ;;  %2668 = vst [vmem:[%s4819_s22 + $0x60] sm:$0xff] (%p5481_p9), %v2667_v13  ;;  %v2699_v29 = vld [vmem:[%s4732_s7 + $0xe0] sm:$0xff] (%p5481_p9) }
 0x2ef   : > { %v2372_v1 = vmul.f32 %v2332_v34, %v2258_v63  ;;  %2666 = vst [vmem:[%s4819_s22 + $0x58] sm:$0xff] (%p5481_p9), %v2665_v54  ;;  %v2701_v63 = vld [vmem:[%s4732_s7 + $0xe8] sm:$0xff] (%p5481_p9)  ;;  %2700 = vst [vmem:[%s4819_s22 + $0x178] sm:$0xff] (%p5481_p9), %v2699_v29 }
 0x2f0   : > { %2392 = vst [vmem:[%s4732_s7 + $0x70] sm:$0xff] %v2373_v6  ;;  %2702 = vst [vmem:[%s4819_s22 + $0x180] sm:$0xff] (%p5481_p9), %v2701_v63 }
 0x2f1   : > { %2391 = vst [vmem:[%s4732_s7 + $0x68] sm:$0xff] %v2372_v1 }
 0x2f2   : > { %v2474_v7 = vpop.permute.xlu0 %2473  ;;  %v2705_v6 = vld [vmem:[%s4732_s7 + $0xf8] sm:$0xff] (%p5481_p9) }
 0x2f3   : > { %v2506_v31 = vmul.f32 %v2474_v7, %v2411_v25  ;;  %v2470_v44 = vpop.permute.xlu1 %2469  ;;  %v2703_v46 = vld [vmem:[%s4732_s7 + $0xf0] sm:$0xff] (%p5481_p9)  ;;  %2706 = vst [vmem:[%s4819_s22 + $0x190] sm:$0xff] (%p5481_p9), %v2705_v6 }
 0x2f4   : > { %v2505_v32 = vmul.f32 %v2470_v44, %v2410_v9  ;;  %2704 = vst [vmem:[%s4819_s22 + $0x188] sm:$0xff] (%p5481_p9), %v2703_v46 }
 0x2f5   : > { %2823 = vst [vmem:[%s4732_s7 + $0x108] sm:$0xff] %v2506_v31 }
 0x2f6   : > { %2822 = vst [vmem:[%s4732_s7 + $0x100] sm:$0xff] %v2505_v32 }
 0x2f7   : > { %v2347_v49 = vpop.permute.xlu0 %2346  ;;  %v2671_v21 = vld [vmem:[%s4732_s7 + $0x70] sm:$0xff] (%p5481_p9) }
 0x2f8   : > { %v2375_v33 = vmul.f32 %v2347_v49, %v2261_v3  ;;  %v2342_v2 = vpop.permute.xlu1 %2341  ;;  %v2669_v23 = vld [vmem:[%s4732_s7 + $0x68] sm:$0xff] (%p5481_p9)  ;;  %2672 = vst [vmem:[%s4819_s22 + $0x70] sm:$0xff] (%p5481_p9), %v2671_v21 }
 0x2f9   : > { %v2374_v36 = vmul.f32 %v2342_v2, %v2260_v22  ;;  %2670 = vst [vmem:[%s4819_s22 + $0x68] sm:$0xff] (%p5481_p9), %v2669_v23 }
 0x2fa   : > { %2394 = vst [vmem:[%s4732_s7 + $0x80] sm:$0xff] %v2375_v33 }
 0x2fb   : > { %2393 = vst [vmem:[%s4732_s7 + $0x78] sm:$0xff] %v2374_v36 }
 0x2fc   : > { %v2482_v55 = vpop.permute.xlu0 %2481  ;;  %v2709_v1 = vld [vmem:[%s4732_s7 + $0x108] sm:$0xff] (%p5481_p9) }
 0x2fd   : > { %v2508_v30 = vmul.f32 %v2482_v55, %v2413_v37  ;;  %v2478_v20 = vpop.permute.xlu1 %2477  ;;  %v2707_v34 = vld [vmem:[%s4732_s7 + $0x100] sm:$0xff] (%p5481_p9)  ;;  %2710 = vst [vmem:[%s4819_s22 + $0x1a0] sm:$0xff] (%p5481_p9), %v2709_v1 }
 0x2fe   : > { %v2507_v17 = vmul.f32 %v2478_v20, %v2412_v38  ;;  %2708 = vst [vmem:[%s4819_s22 + $0x198] sm:$0xff] (%p5481_p9), %v2707_v34 }
 0x2ff   : > { %2825 = vst [vmem:[%s4732_s7 + $0x118] sm:$0xff] %v2508_v30 }
 0x300   : > { %2824 = vst [vmem:[%s4732_s7 + $0x110] sm:$0xff] %v2507_v17 }
 0x301   : > { %v2357_v53 = vpop.permute.xlu0 %2356  ;;  %v2675_v60 = vld [vmem:[%s4732_s7 + $0x80] sm:$0xff] (%p5481_p9) }
 0x302   : > { %v2377_v40 = vmul.f32 %v2357_v53, %v2263_v48  ;;  %v2352_v59 = vpop.permute.xlu1 %2351  ;;  %v2673_v57 = vld [vmem:[%s4732_s7 + $0x78] sm:$0xff] (%p5481_p9)  ;;  %2676 = vst [vmem:[%s4819_s22 + $0x80] sm:$0xff] (%p5481_p9), %v2675_v60 }
 0x303   : > { %v2376_v45 = vmul.f32 %v2352_v59, %v2262_v12  ;;  %2674 = vst [vmem:[%s4819_s22 + $0x78] sm:$0xff] (%p5481_p9), %v2673_v57 }
 0x304   : > { %2396 = vst [vmem:[%s4732_s7 + $0x90] sm:$0xff] %v2377_v40 }
 0x305   : > { %2395 = vst [vmem:[%s4732_s7 + $0x88] sm:$0xff] %v2376_v45 }
 0x306   : > { %v2490_v47 = vpop.permute.xlu0 %2489  ;;  %2537 = sbr.rel (!%p5481_p9) target bundleno = 787 (0x313), region = 40  ;;  %v2713_v9 = vld [vmem:[%s4732_s7 + $0x118] sm:$0xff] (%p5481_p9) }
 0x307   : > { %v2510_v18 = vmul.f32 %v2490_v47, %v2415_v50  ;;  %v2486_v35 = vpop.permute.xlu1 %2485  ;;  %v2711_v25 = vld [vmem:[%s4732_s7 + $0x110] sm:$0xff] (%p5481_p9)  ;;  %2714 = vst [vmem:[%s4819_s22 + $0x1b0] sm:$0xff] (%p5481_p9), %v2713_v9 }
 0x308   : > { %v2509_v27 = vmul.f32 %v2486_v35, %v2414_v5  ;;  %2712 = vst [vmem:[%s4819_s22 + $0x1a8] sm:$0xff] (%p5481_p9), %v2711_v25 }
 0x309   : > { %2827 = vst [vmem:[%s4732_s7 + $0x128] sm:$0xff] %v2510_v18 }
 0x30a   : > { %2826 = vst [vmem:[%s4732_s7 + $0x120] sm:$0xff] %v2509_v27 }
 0x30b   : > { %v2679_v14 = vld [vmem:[%s4732_s7 + $0x90] sm:$0xff] }
 0x30c   : > { %v2677_v56 = vld [vmem:[%s4732_s7 + $0x88] sm:$0xff]  ;;  %2680 = vst [vmem:[%s4819_s22 + $0x90] sm:$0xff] %v2679_v14 }
 0x30d   : > { %2678 = vst [vmem:[%s4819_s22 + $0x88] sm:$0xff] %v2677_v56 }
 0x310   : > { %v2717_v31 = vld [vmem:[%s4732_s7 + $0x128] sm:$0xff] }
 0x311   : > { %v2715_v7 = vld [vmem:[%s4732_s7 + $0x120] sm:$0xff]  ;;  %2718 = vst [vmem:[%s4819_s22 + $0x1c0] sm:$0xff] %v2717_v31 }
 0x312   : > { %2716 = vst [vmem:[%s4819_s22 + $0x1b8] sm:$0xff] %v2715_v7 }
 0x313 PF: > { %p14_p10 = scmp.ge.s32.totalorder %s3109_s18, 4   ;;  %s5482_s14 = smov %s3048_s15 }
 0x314   : > { %s5483_s15 = smov %s3052_s16  ;;  %s5484_s16 = smov %s3119_s21 }
 0x315   : > { %s5485_s17 = smov %s3109_s18  ;;  %16 = sbr.rel (!%p14_p10) target bundleno = 5 (0x5), region = 111 }
 0x31a   :  { %2734 = vsyncpa [#allocation4], 1 }
 0x31b   :  { %2736 = vsyncpa [#allocation4 + $0x1], 1 }

</bundles_post_ra>
